<compile_context>
chip_gen: v5e
topology: v5e:2x2
jax: 0.10.0
libtpu: 0.0.40
codegen_flags: <defaults>
</compile_context>

<pallas_src>
import math
import functools

import jax
import jax.numpy as jnp
from jax.experimental import pallas as pl
from jax.experimental.pallas import tpu as pltpu


# ----------------------------- in-kernel helpers ----------------------------

def _dot(a, b):
    """MXU matmul: bf16 operands, f32 accumulation."""
    return jnp.dot(a.astype(jnp.bfloat16), b.astype(jnp.bfloat16),
                   preferred_element_type=jnp.float32)


def _dot_nt(a, b):
    """a @ b.T without materializing the transpose: (M,K)x(N,K)->(M,N)."""
    return jax.lax.dot_general(
        a.astype(jnp.bfloat16), b.astype(jnp.bfloat16),
        (((1,), (1,)), ((), ())), preferred_element_type=jnp.float32)


def _layer_norm(x, g, b, eps=1e-5):
    mu = jnp.mean(x, axis=-1, keepdims=True)
    var = jnp.mean(jnp.square(x - mu), axis=-1, keepdims=True)
    return (x - mu) * jax.lax.rsqrt(var + eps) * g + b


def _gelu(x):
    # TODO(synk): tanh-approx GELU in-kernel (torch default is exact-erf GELU).
    return jax.nn.gelu(x, approximate=True)


def _multihead_attention(q, k, v, n_heads, causal, mix):
    """q: (L, D), k/v: (S, D), already projected.  Returns merged (L, D).

    mix=True reproduces torch's `out.transpose(2,1).contiguous().view(B,L,-1)`
    head mixing via 0/1 selection matmuls (avoids layout-hostile reshapes).
    """
    L, D = q.shape
    S = k.shape[0]
    H = n_heads
    dk = D // H
    scale = 1.0 / math.sqrt(dk)
    if causal:
        ri = jax.lax.broadcasted_iota(jnp.int32, (L, S), 0)
        ci = jax.lax.broadcasted_iota(jnp.int32, (L, S), 1)
        keep = ci <= ri
    outs = []
    for h in range(H):
        qh = q[:, h * dk:(h + 1) * dk]
        kh = k[:, h * dk:(h + 1) * dk]
        vh = v[:, h * dk:(h + 1) * dk]
        s = _dot_nt(qh, kh) * scale                        # (L, S) f32
        if causal:
            s = jnp.where(keep, s, -1e30)                  # finite, never all-masked
        m = jnp.max(s, axis=-1, keepdims=True)
        p = jnp.exp(s - m)
        a = p * pl.reciprocal(jnp.sum(p, axis=-1, keepdims=True), approx=True)
        outs.append(_dot(a, vh))                           # (L, dk)
    if not mix:
        return jnp.concatenate(outs, axis=-1)              # (L, D)
    # mixed[l, h2*dk + e] = stacked[l*H + h2, e],  stacked[h*L + l] = outs[h][l]
    stacked = jnp.concatenate(outs, axis=0)                # (H*L, dk)
    rows = jax.lax.broadcasted_iota(jnp.int32, (L, H * L), 0)
    cols = jax.lax.broadcasted_iota(jnp.int32, (L, H * L), 1)
    mixed = [_dot(jnp.where(cols == rows * H + h2, 1.0, 0.0), stacked)
             for h2 in range(H)]
    return jnp.concatenate(mixed, axis=-1)                 # (L, D)


# ------------------------------- Pallas kernels ------------------------------

def _embedding_kernel(x_ref, add_ref, w0_ref, w1_ref, w2_ref, o_ref):
    """TokenEmbedding: circular Conv1d(k=3, no bias) + (positional+temporal)."""
    x = x_ref[0]                                           # (L, C)
    L = x.shape[0]
    xm1 = jnp.concatenate([x[L - 1:, :], x[:L - 1, :]], axis=0)   # x_{l-1}
    xp1 = jnp.concatenate([x[1:, :], x[:1, :]], axis=0)           # x_{l+1}
    o_ref[0] = (_dot(xm1, w0_ref[...]) + _dot(x, w1_ref[...])
                + _dot(xp1, w2_ref[...]) + add_ref[0])


def _encoder_layer_kernel(x_ref, wqkv_ref, bqkv_ref, wo_ref, bo_ref,
                          wf1_ref, bf1_ref, wf2_ref, bf2_ref, ln_ref,
                          o_ref, *, n_heads, final_norm):
    x = x_ref[0]                                           # (L, D)
    D = x.shape[-1]
    qkv = _dot(x, wqkv_ref[...]) + bqkv_ref[...]           # fused QKV: (L, 3D)
    attn = _multihead_attention(qkv[:, :D], qkv[:, D:2 * D], qkv[:, 2 * D:],
                                n_heads, causal=False, mix=False)
    x = x + _dot(attn, wo_ref[...]) + bo_ref[...]
    x = _layer_norm(x, ln_ref[0:1, :], ln_ref[1:2, :])
    y = _gelu(_dot(x, wf1_ref[...]) + bf1_ref[...])
    y = _dot(y, wf2_ref[...]) + bf2_ref[...]
    x = _layer_norm(x + y, ln_ref[2:3, :], ln_ref[3:4, :])
    if final_norm:                                         # Encoder's final LayerNorm
        x = _layer_norm(x, ln_ref[4:5, :], ln_ref[5:6, :])
    o_ref[0] = x


def _decoder_layer_kernel(x_ref, cross_ref,
                          s_wqkv_ref, s_bqkv_ref, s_wo_ref, s_bo_ref,
                          c_wq_ref, c_bq_ref, c_wkv_ref, c_bkv_ref,
                          c_wo_ref, c_bo_ref,
                          wf1_ref, bf1_ref, wf2_ref, bf2_ref, ln_ref,
                          o_ref, *, n_heads, mix):
    x = x_ref[0]                                           # (L, D)
    cross = cross_ref[0]                                   # (S, D)
    D = x.shape[-1]
    # masked (causal) self-attention with the torch head "mix"
    qkv = _dot(x, s_wqkv_ref[...]) + s_bqkv_ref[...]
    attn = _multihead_attention(qkv[:, :D], qkv[:, D:2 * D], qkv[:, 2 * D:],
                                n_heads, causal=True, mix=mix)
    x = x + _dot(attn, s_wo_ref[...]) + s_bo_ref[...]
    x = _layer_norm(x, ln_ref[0:1, :], ln_ref[1:2, :])
    # cross attention (full, un-mixed)
    qc = _dot(x, c_wq_ref[...]) + c_bq_ref[...]
    kvc = _dot(cross, c_wkv_ref[...]) + c_bkv_ref[...]     # fused K/V: (S, 2D)
    attn = _multihead_attention(qc, kvc[:, :D], kvc[:, D:], n_heads,
                                causal=False, mix=False)
    x = x + _dot(attn, c_wo_ref[...]) + c_bo_ref[...]
    x = _layer_norm(x, ln_ref[2:3, :], ln_ref[3:4, :])
    # FFN (the 1x1 convs)
    y = _gelu(_dot(x, wf1_ref[...]) + bf1_ref[...])
    y = _dot(y, wf2_ref[...]) + bf2_ref[...]
    o_ref[0] = _layer_norm(x + y, ln_ref[4:5, :], ln_ref[5:6, :])


def _distil_conv_kernel(x_ref, w0_ref, w1_ref, w2_ref, b_ref, bn_ref, o_ref):
    """Circular conv k=3 -> BatchNorm1d (batch stats) -> ELU -> window max(3).
    The stride-2 subsample of MaxPool1d(k=3, s=2, p=1) is done by the caller."""
    B, L, C = x_ref.shape
    bias = b_ref[...]                                      # (1, C)
    ys = []
    for b in range(B):
        xb = x_ref[b]                                      # (L, C)
        xm1 = jnp.concatenate([xb[L - 1:, :], xb[:L - 1, :]], axis=0)
        xp1 = jnp.concatenate([xb[1:, :], xb[:1, :]], axis=0)
        ys.append(_dot(xm1, w0_ref[...]) + _dot(xb, w1_ref[...])
                  + _dot(xp1, w2_ref[...]) + bias)
    n = float(B * L)
    mu = sum(jnp.sum(yb, axis=0, keepdims=True) for yb in ys) / n
    var = sum(jnp.sum(jnp.square(yb - mu), axis=0, keepdims=True) for yb in ys) / n
    inv = jax.lax.rsqrt(var + 1e-5)
    g, beta = bn_ref[0:1, :], bn_ref[1:2, :]
    neg = jnp.full((1, C), -jnp.inf, dtype=jnp.float32)
    for b in range(B):
        yb = (ys[b] - mu) * inv * g + beta
        yb = jnp.where(yb > 0.0, yb, jnp.exp(yb) - 1.0)    # ELU
        prev = jnp.concatenate([neg, yb[:L - 1, :]], axis=0)
        nxt = jnp.concatenate([yb[1:, :], neg], axis=0)
        o_ref[b] = jnp.maximum(jnp.maximum(prev, yb), nxt)


def _norm_proj_kernel(x_ref, g_ref, b_ref, wp_ref, bp_ref, o_ref):
    x = _layer_norm(x_ref[...], g_ref[...], b_ref[...])    # decoder-final LN
    o_ref[...] = _dot(x, wp_ref[...]) + bp_ref[...]


# --------------------------------- wrappers ----------------------------------

_PAR = pltpu.CompilerParams(dimension_semantics=("parallel",))


def _full_spec(a):
    nd = a.ndim
    return pl.BlockSpec(a.shape, lambda i: (0,) * nd)


def data_embedding(x, x_mark, tok_p, pos_table, temporal):
    """DataEmbedding = TokenEmbedding(circular conv) + positional + temporal."""
    B, L, C = x.shape
    D = tok_p['w1'].shape[1]
    add = (pos_table[:L][None]
           + temporal['month'][x_mark[..., 0]]
           + temporal['day'][x_mark[..., 1]]
           + temporal['weekday'][x_mark[..., 2]]
           + temporal['hour'][x_mark[..., 3]])             # (B, L, D), f32
    return pl.pallas_call(
        _embedding_kernel,
        out_shape=jax.ShapeDtypeStruct((B, L, D), jnp.float32),
        grid=(B,),
        in_specs=[pl.BlockSpec((1, L, C), lambda b: (b, 0, 0)),
                  pl.BlockSpec((1, L, D), lambda b: (b, 0, 0)),
                  _full_spec(tok_p['w0']), _full_spec(tok_p['w1']),
                  _full_spec(tok_p['w2'])],
        out_specs=pl.BlockSpec((1, L, D), lambda b: (b, 0, 0)),
        compiler_params=_PAR,
    )(x, add, tok_p['w0'], tok_p['w1'], tok_p['w2'])


_ENC_KEYS = ('wqkv', 'bqkv', 'wo', 'bo', 'wf1', 'bf1', 'wf2', 'bf2', 'ln')
_DEC_KEYS = ('s_wqkv', 's_bqkv', 's_wo', 's_bo',
             'c_wq', 'c_bq', 'c_wkv', 'c_bkv', 'c_wo', 'c_bo',
             'wf1', 'bf1', 'wf2', 'bf2', 'ln')


def fused_encoder_layer(p, x, n_heads, final_norm):
    B, L, D = x.shape
    return pl.pallas_call(
        functools.partial(_encoder_layer_kernel, n_heads=n_heads,
                          final_norm=final_norm),
        out_shape=jax.ShapeDtypeStruct((B, L, D), jnp.float32),
        grid=(B,),
        in_specs=[pl.BlockSpec((1, L, D), lambda b: (b, 0, 0))]
                 + [_full_spec(p[k]) for k in _ENC_KEYS],
        out_specs=pl.BlockSpec((1, L, D), lambda b: (b, 0, 0)),
        compiler_params=_PAR,
    )(x, *[p[k] for k in _ENC_KEYS])


def fused_decoder_layer(p, x, cross, n_heads, mix):
    B, L, D = x.shape
    S = cross.shape[1]
    return pl.pallas_call(
        functools.partial(_decoder_layer_kernel, n_heads=n_heads, mix=mix),
        out_shape=jax.ShapeDtypeStruct((B, L, D), jnp.float32),
        grid=(B,),
        in_specs=[pl.BlockSpec((1, L, D), lambda b: (b, 0, 0)),
                  pl.BlockSpec((1, S, D), lambda b: (b, 0, 0))]
                 + [_full_spec(p[k]) for k in _DEC_KEYS],
        out_specs=pl.BlockSpec((1, L, D), lambda b: (b, 0, 0)),
        compiler_params=_PAR,
    )(x, cross, *[p[k] for k in _DEC_KEYS])


def distil_conv_layer(p, x):
    B, L, C = x.shape
    m = pl.pallas_call(
        _distil_conv_kernel,
        out_shape=jax.ShapeDtypeStruct((B, L, C), jnp.float32),
        grid=(1,),
        in_specs=[pl.BlockSpec((B, L, C), lambda i: (0, 0, 0)),
                  _full_spec(p['w0']), _full_spec(p['w1']), _full_spec(p['w2']),
                  _full_spec(p['b']), _full_spec(p['bn'])],
        out_specs=pl.BlockSpec((B, L, C), lambda i: (0, 0, 0)),
    )(x, p['w0'], p['w1'], p['w2'], p['b'], p['bn'])
    return m[:, ::2, :]    # MaxPool1d(k=3, s=2, p=1): stride-2 pick of window maxima


def norm_project(p, x):
    B, L, D = x.shape
    xf = x.reshape(B * L, D)
    c_out = p['wp'].shape[1]
    out = pl.pallas_call(
        _norm_proj_kernel,
        out_shape=jax.ShapeDtypeStruct((B * L, c_out), jnp.float32),
        grid=(1,),
        in_specs=[pl.BlockSpec((B * L, D), lambda i: (0, 0)),
                  _full_spec(p['g']), _full_spec(p['b']),
                  _full_spec(p['wp']), _full_spec(p['bp'])],
        out_specs=pl.BlockSpec((B * L, c_out), lambda i: (0, 0)),
    )(xf, p['g'], p['b'], p['wp'], p['bp'])
    return out.reshape(B, L, c_out)


# ------------------------------- model forward -------------------------------

def encoder_forward(p, x, n_heads):
    layers, convs = p['layers'], p['convs']
    if convs:
        for lp, cp in zip(layers[:-1], convs):
            x = fused_encoder_layer(lp, x, n_heads, final_norm=False)
            x = distil_conv_layer(cp, x)
        x = fused_encoder_layer(layers[-1], x, n_heads, final_norm=True)
    else:
        for lp in layers[:-1]:
            x = fused_encoder_layer(lp, x, n_heads, final_norm=False)
        x = fused_encoder_layer(layers[-1], x, n_heads, final_norm=True)
    return x


def encoder_stack_forward(p, x, inp_lens, n_heads):
    outs = []
    for i_len, enc_p in zip(inp_lens, p['encoders']):
        inp_len = x.shape[1] // (2 ** i_len)
        outs.append(encoder_forward(enc_p, x[:, -inp_len:, :], n_heads))
    return jnp.concatenate(outs, axis=-2)


def decoder_forward(p, x, cross, n_heads, mix):
    for lp in p['layers']:
        x = fused_decoder_layer(lp, x, cross, n_heads, mix)
    return x


def informer_stack_forward(params, x_enc, x_mark_enc, x_dec, x_mark_dec,
                           *, n_heads, pred_len, inp_lens, mix=True):
    enc_out = data_embedding(x_enc, x_mark_enc, params['enc_tok'],
                             params['pos_table'], params['temporal'])
    enc_out = encoder_stack_forward(params['enc_stack'], enc_out, inp_lens, n_heads)
    dec_out = data_embedding(x_dec, x_mark_dec, params['dec_tok'],
                             params['pos_table'], params['temporal'])
    dec_out = decoder_forward(params['decoder'], dec_out, enc_out, n_heads, mix)
    dec_out = norm_project(params['proj'], dec_out)    # decoder-final LN + Linear
    return dec_out[:, -pred_len:, :]


# --------------------------- parameter construction --------------------------

class KeyGen:
    def __init__(self, key):
        self.key = key

    def __call__(self):
        self.key, sub = jax.random.split(self.key)
        return sub


def _w(kg, din, dout, scale=0.02):
    return jax.random.normal(kg(), (din, dout), jnp.float32) * scale


def _zrow(n):
    return jnp.zeros((1, n), jnp.float32)


def _ln_pack(d, n_norms):
    rows = []
    for _ in range(n_norms):
        rows += [jnp.ones((d,), jnp.float32), jnp.zeros((d,), jnp.float32)]
    return jnp.stack(rows)


def tok_conv_params(kg, c_in, d_model):
    return {'w0': _w(kg, c_in, d_model), 'w1': _w(kg, c_in, d_model),
            'w2': _w(kg, c_in, d_model)}


def enc_layer_params(kg, d_model, d_ff, final_norm):
    return {'wqkv': _w(kg, d_model, 3 * d_model), 'bqkv': _zrow(3 * d_model),
            'wo': _w(kg, d_model, d_model), 'bo': _zrow(d_model),
            'wf1': _w(kg, d_model, d_ff), 'bf1': _zrow(d_ff),
            'wf2': _w(kg, d_ff, d_model), 'bf2': _zrow(d_model),
            'ln': _ln_pack(d_model, 3 if final_norm else 2)}


def dec_layer_params(kg, d_model, d_ff):
    return {'s_wqkv': _w(kg, d_model, 3 * d_model), 's_bqkv': _zrow(3 * d_model),
            's_wo': _w(kg, d_model, d_model), 's_bo': _zrow(d_model),
            'c_wq': _w(kg, d_model, d_model), 'c_bq': _zrow(d_model),
            'c_wkv': _w(kg, d_model, 2 * d_model), 'c_bkv': _zrow(2 * d_model),
            'c_wo': _w(kg, d_model, d_model), 'c_bo': _zrow(d_model),
            'wf1': _w(kg, d_model, d_ff), 'bf1': _zrow(d_ff),
            'wf2': _w(kg, d_ff, d_model), 'bf2': _zrow(d_model),
            'ln': _ln_pack(d_model, 3)}


def conv_layer_params(kg, d_model):
    return {'w0': _w(kg, d_model, d_model), 'w1': _w(kg, d_model, d_model),
            'w2': _w(kg, d_model, d_model), 'b': _zrow(d_model),
            'bn': _ln_pack(d_model, 1)}


def sinusoid_table(n, d):
    pos = jnp.arange(n, dtype=jnp.float32)[:, None]
    div = jnp.exp(jnp.arange(0, d, 2, dtype=jnp.float32) * (-(math.log(10000.0) / d)))
    tbl = jnp.zeros((n, d), jnp.float32)
    tbl = tbl.at[:, 0::2].set(jnp.sin(pos * div))
    tbl = tbl.at[:, 1::2].set(jnp.cos(pos * div))
    return tbl


def init_params(kg, *, enc_in, dec_in, c_out, d_model, e_layers, d_layers,
                d_ff, max_len):
    return {
        'enc_tok': tok_conv_params(kg, enc_in, d_model),
        'dec_tok': tok_conv_params(kg, dec_in, d_model),
        'pos_table': sinusoid_table(max_len, d_model),
        'temporal': {'month': sinusoid_table(13, d_model),
                     'day': sinusoid_table(32, d_model),
                     'weekday': sinusoid_table(7, d_model),
                     'hour': sinusoid_table(24, d_model)},
        'enc_stack': {'encoders': [
            {'layers': [enc_layer_params(kg, d_model, d_ff,
                                         final_norm=(l == el - 1))
                        for l in range(el)],
             'convs': [conv_layer_params(kg, d_model) for _ in range(el - 1)]}
            for el in e_layers]},
        'decoder': {'layers': [dec_layer_params(kg, d_model, d_ff)
                               for _ in range(d_layers)]},
        'proj': {'g': jnp.ones((1, d_model), jnp.float32),
                 'b': jnp.zeros((1, d_model), jnp.float32),
                 'wp': _w(kg, d_model, c_out), 'bp': _zrow(c_out)},
    }


# ------------------------------------ main -----------------------------------

if __name__ == "__main__":
    B = 2
    enc_in = dec_in = c_out = 4
    seq_len, label_len, pred_len = 16, 8, 4
    d_model, n_heads, d_ff = 32, 4, 32
    e_layers = [2, 1]            # stack of encoders (distil halves the length)
    d_layers = 1
    dec_len = label_len + pred_len

    kg = KeyGen(jax.random.PRNGKey(0))
    params = init_params(kg, enc_in=enc_in, dec_in=dec_in, c_out=c_out,
                         d_model=d_model, e_layers=e_layers, d_layers=d_layers,
                         d_ff=d_ff, max_len=max(seq_len, dec_len))

    x_enc = jax.random.normal(kg(), (B, seq_len, enc_in), jnp.float32)
    x_dec = jax.random.normal(kg(), (B, dec_len, dec_in), jnp.float32)

    def make_marks(key, L):
        km, kd, kw, kh = jax.random.split(key, 4)
        return jnp.stack([jax.random.randint(km, (B, L), 1, 13),   # month
                          jax.random.randint(kd, (B, L), 1, 32),   # day
                          jax.random.randint(kw, (B, L), 0, 7),    # weekday
                          jax.random.randint(kh, (B, L), 0, 24)],  # hour
                         axis=-1)

    x_mark_enc = make_marks(kg(), seq_len)
    x_mark_dec = make_marks(kg(), dec_len)

    inp_lens = tuple(range(len(e_layers)))
    fwd = jax.jit(functools.partial(informer_stack_forward,
                                    n_heads=n_heads, pred_len=pred_len,
                                    inp_lens=inp_lens, mix=True))
    out = jax.block_until_ready(fwd(params, x_enc, x_mark_enc, x_dec, x_mark_dec))
    assert out.shape == (B, pred_len, c_out), out.shape
    assert bool(jnp.all(jnp.isfinite(out)))
    print("KERNEL_OK")
</pallas_src>

<mosaic_0001>
module attributes {stable_mosaic.version = 11 : i64} {
  func.func @_embedding_kernel(%arg0: i32, %arg1: memref<1x16x4xf32, #tpu.memory_space<vmem>>, %arg2: memref<1x16x32xf32, #tpu.memory_space<vmem>>, %arg3: memref<4x32xf32, #tpu.memory_space<vmem>>, %arg4: memref<4x32xf32, #tpu.memory_space<vmem>>, %arg5: memref<4x32xf32, #tpu.memory_space<vmem>>, %arg6: memref<1x16x32xf32, #tpu.memory_space<vmem>>) attributes {dimension_semantics = [#tpu.dimension_semantics<parallel>], iteration_bounds = array<i64: 2>, scalar_prefetch = 0 : i64, scratch_operands = 0 : i64, tpu.core_type = #tpu.core_type<tc>, window_params = [{transform_indices = @transform_0, window_bounds = array<i64: 1, 16, 4>}, {transform_indices = @transform_1, window_bounds = array<i64: 1, 16, 32>}, {pipeline_mode = #tpu.pipeline_mode<synchronous>, transform_indices = @transform_2, window_bounds = array<i64: 4, 32>}, {pipeline_mode = #tpu.pipeline_mode<synchronous>, transform_indices = @transform_3, window_bounds = array<i64: 4, 32>}, {pipeline_mode = #tpu.pipeline_mode<synchronous>, transform_indices = @transform_4, window_bounds = array<i64: 4, 32>}, {transform_indices = @transform_5, window_bounds = array<i64: 1, 16, 32>}]} {
    %c0 = arith.constant 0 : index
    %c0_0 = arith.constant 0 : index
    %c0_1 = arith.constant 0 : index
    %0 = vector.load %arg1[%c0, %c0_0, %c0_1] : memref<1x16x4xf32, #tpu.memory_space<vmem>>, vector<1x16x4xf32>
    %1 = vector.shape_cast %0 : vector<1x16x4xf32> to vector<16x4xf32>
    %2 = vector.extract_strided_slice %1 {offsets = [15, 0], sizes = [1, 4], strides = [1, 1]} : vector<16x4xf32> to vector<1x4xf32>
    %3 = vector.extract_strided_slice %1 {offsets = [0, 0], sizes = [15, 4], strides = [1, 1]} : vector<16x4xf32> to vector<15x4xf32>
    %4 = tpu.concatenate %2, %3 in 0 : vector<1x4xf32>, vector<15x4xf32> -> vector<16x4xf32>
    %5 = vector.extract_strided_slice %1 {offsets = [1, 0], sizes = [15, 4], strides = [1, 1]} : vector<16x4xf32> to vector<15x4xf32>
    %6 = vector.extract_strided_slice %1 {offsets = [0, 0], sizes = [1, 4], strides = [1, 1]} : vector<16x4xf32> to vector<1x4xf32>
    %7 = tpu.concatenate %5, %6 in 0 : vector<15x4xf32>, vector<1x4xf32> -> vector<16x4xf32>
    %c0_2 = arith.constant 0 : index
    %c0_3 = arith.constant 0 : index
    %8 = vector.load %arg3[%c0_2, %c0_3] : memref<4x32xf32, #tpu.memory_space<vmem>>, vector<4x32xf32>
    %9 = arith.truncf %4 : vector<16x4xf32> to vector<16x4xbf16>
    %10 = arith.truncf %8 : vector<4x32xf32> to vector<4x32xbf16>
    %cst = arith.constant dense<0.000000e+00> : vector<16x32xf32>
    %11 = tpu.matmul %9, %10, %cst {dimension_numbers = #tpu.dot_dimension_numbers<[1], [0], [0], [1], [0, 0, 1, 1], [], []>} : vector<16x4xbf16>, vector<4x32xbf16>, vector<16x32xf32> -> vector<16x32xf32>
    %c0_4 = arith.constant 0 : index
    %c0_5 = arith.constant 0 : index
    %12 = vector.load %arg4[%c0_4, %c0_5] : memref<4x32xf32, #tpu.memory_space<vmem>>, vector<4x32xf32>
    %13 = arith.truncf %1 : vector<16x4xf32> to vector<16x4xbf16>
    %14 = arith.truncf %12 : vector<4x32xf32> to vector<4x32xbf16>
    %cst_6 = arith.constant dense<0.000000e+00> : vector<16x32xf32>
    %15 = tpu.matmul %13, %14, %cst_6 {dimension_numbers = #tpu.dot_dimension_numbers<[1], [0], [0], [1], [0, 0, 1, 1], [], []>} : vector<16x4xbf16>, vector<4x32xbf16>, vector<16x32xf32> -> vector<16x32xf32>
    %16 = arith.addf %11, %15 : vector<16x32xf32>
    %c0_7 = arith.constant 0 : index
    %c0_8 = arith.constant 0 : index
    %17 = vector.load %arg5[%c0_7, %c0_8] : memref<4x32xf32, #tpu.memory_space<vmem>>, vector<4x32xf32>
    %18 = arith.truncf %7 : vector<16x4xf32> to vector<16x4xbf16>
    %19 = arith.truncf %17 : vector<4x32xf32> to vector<4x32xbf16>
    %cst_9 = arith.constant dense<0.000000e+00> : vector<16x32xf32>
    %20 = tpu.matmul %18, %19, %cst_9 {dimension_numbers = #tpu.dot_dimension_numbers<[1], [0], [0], [1], [0, 0, 1, 1], [], []>} : vector<16x4xbf16>, vector<4x32xbf16>, vector<16x32xf32> -> vector<16x32xf32>
    %21 = arith.addf %16, %20 : vector<16x32xf32>
    %c0_10 = arith.constant 0 : index
    %c0_11 = arith.constant 0 : index
    %c0_12 = arith.constant 0 : index
    %22 = vector.load %arg2[%c0_10, %c0_11, %c0_12] : memref<1x16x32xf32, #tpu.memory_space<vmem>>, vector<1x16x32xf32>
    %23 = vector.shape_cast %22 : vector<1x16x32xf32> to vector<16x32xf32>
    %24 = arith.addf %21, %23 : vector<16x32xf32>
    %c0_13 = arith.constant 0 : index
    %c0_14 = arith.constant 0 : index
    %c0_15 = arith.constant 0 : index
    %25 = vector.load %arg6[%c0_13, %c0_14, %c0_15] : memref<1x16x32xf32, #tpu.memory_space<vmem>>, vector<1x16x32xf32>
    %26 = vector.shape_cast %25 : vector<1x16x32xf32> to vector<16x32xf32>
    %27 = vector.shape_cast %24 : vector<16x32xf32> to vector<1x16x32xf32>
    tpu.vector_store %arg6[%c0_13, %c0_14, %c0_15], %27 {strides = array<i32>} : memref<1x16x32xf32, #tpu.memory_space<vmem>>, vector<1x16x32xf32>,
    return
  }
  func.func @transform_0(%arg0: i32) -> (i32, i32, i32) {
    %c0_i32 = arith.constant 0 : i32
    %c0_i32_0 = arith.constant 0 : i32
    %c0_i32_1 = arith.constant 0 : i32
    return %arg0, %c0_i32, %c0_i32_0 : i32, i32, i32
  }
  func.func @transform_1(%arg0: i32) -> (i32, i32, i32) {
    %c0_i32 = arith.constant 0 : i32
    %c0_i32_0 = arith.constant 0 : i32
    %c0_i32_1 = arith.constant 0 : i32
    return %arg0, %c0_i32, %c0_i32_0 : i32, i32, i32
  }
  func.func @transform_2(%arg0: i32) -> (i32, i32) {
    %c0_i32 = arith.constant 0 : i32
    %c0_i32_0 = arith.constant 0 : i32
    %c0_i32_1 = arith.constant 0 : i32
    return %c0_i32, %c0_i32_0 : i32, i32
  }
  func.func @transform_3(%arg0: i32) -> (i32, i32) {
    %c0_i32 = arith.constant 0 : i32
    %c0_i32_0 = arith.constant 0 : i32
    %c0_i32_1 = arith.constant 0 : i32
    return %c0_i32, %c0_i32_0 : i32, i32
  }
  func.func @transform_4(%arg0: i32) -> (i32, i32) {
    %c0_i32 = arith.constant 0 : i32
    %c0_i32_0 = arith.constant 0 : i32
    %c0_i32_1 = arith.constant 0 : i32
    return %c0_i32, %c0_i32_0 : i32, i32
  }
  func.func @transform_5(%arg0: i32) -> (i32, i32, i32) {
    %c0_i32 = arith.constant 0 : i32
    %c0_i32_0 = arith.constant 0 : i32
    %c0_i32_1 = arith.constant 0 : i32
    return %arg0, %c0_i32, %c0_i32_0 : i32, i32, i32
  }
}

module attributes {stable_mosaic.version = 11 : i64} {
  func.func @_encoder_layer_kernel(%arg0: i32, %arg1: memref<1x16x32xf32, #tpu.memory_space<vmem>>, %arg2: memref<32x96xf32, #tpu.memory_space<vmem>>, %arg3: memref<1x96xf32, #tpu.memory_space<vmem>>, %arg4: memref<32x32xf32, #tpu.memory_space<vmem>>, %arg5: memref<1x32xf32, #tpu.memory_space<vmem>>, %arg6: memref<32x32xf32, #tpu.memory_space<vmem>>, %arg7: memref<1x32xf32, #tpu.memory_space<vmem>>, %arg8: memref<32x32xf32, #tpu.memory_space<vmem>>, %arg9: memref<1x32xf32, #tpu.memory_space<vmem>>, %arg10: memref<4x32xf32, #tpu.memory_space<vmem>>, %arg11: memref<1x16x32xf32, #tpu.memory_space<vmem>>) attributes {dimension_semantics = [#tpu.dimension_semantics<parallel>], iteration_bounds = array<i64: 2>, scalar_prefetch = 0 : i64, scratch_operands = 0 : i64, tpu.core_type = #tpu.core_type<tc>, window_params = [{transform_indices = @transform_0, window_bounds = array<i64: 1, 16, 32>}, {pipeline_mode = #tpu.pipeline_mode<synchronous>, transform_indices = @transform_1, window_bounds = array<i64: 32, 96>}, {pipeline_mode = #tpu.pipeline_mode<synchronous>, transform_indices = @transform_2, window_bounds = array<i64: 1, 96>}, {pipeline_mode = #tpu.pipeline_mode<synchronous>, transform_indices = @transform_3, window_bounds = array<i64: 32, 32>}, {pipeline_mode = #tpu.pipeline_mode<synchronous>, transform_indices = @transform_4, window_bounds = array<i64: 1, 32>}, {pipeline_mode = #tpu.pipeline_mode<synchronous>, transform_indices = @transform_5, window_bounds = array<i64: 32, 32>}, {pipeline_mode = #tpu.pipeline_mode<synchronous>, transform_indices = @transform_6, window_bounds = array<i64: 1, 32>}, {pipeline_mode = #tpu.pipeline_mode<synchronous>, transform_indices = @transform_7, window_bounds = array<i64: 32, 32>}, {pipeline_mode = #tpu.pipeline_mode<synchronous>, transform_indices = @transform_8, window_bounds = array<i64: 1, 32>}, {pipeline_mode = #tpu.pipeline_mode<synchronous>, transform_indices = @transform_9, window_bounds = array<i64: 4, 32>}, {transform_indices = @transform_10, window_bounds = array<i64: 1, 16, 32>}]} {
    %c0 = arith.constant 0 : index
    %c0_0 = arith.constant 0 : index
    %c0_1 = arith.constant 0 : index
    %0 = vector.load %arg1[%c0, %c0_0, %c0_1] : memref<1x16x32xf32, #tpu.memory_space<vmem>>, vector<1x16x32xf32>
    %1 = vector.shape_cast %0 : vector<1x16x32xf32> to vector<16x32xf32>
    %c0_2 = arith.constant 0 : index
    %c0_3 = arith.constant 0 : index
    %2 = vector.load %arg2[%c0_2, %c0_3] : memref<32x96xf32, #tpu.memory_space<vmem>>, vector<32x96xf32>
    %3 = arith.truncf %1 : vector<16x32xf32> to vector<16x32xbf16>
    %4 = arith.truncf %2 : vector<32x96xf32> to vector<32x96xbf16>
    %cst = arith.constant dense<0.000000e+00> : vector<16x96xf32>
    %5 = tpu.matmul %3, %4, %cst {dimension_numbers = #tpu.dot_dimension_numbers<[1], [0], [0], [1], [0, 0, 1, 1], [], []>} : vector<16x32xbf16>, vector<32x96xbf16>, vector<16x96xf32> -> vector<16x96xf32>
    %c0_4 = arith.constant 0 : index
    %c0_5 = arith.constant 0 : index
    %6 = vector.load %arg3[%c0_4, %c0_5] : memref<1x96xf32, #tpu.memory_space<vmem>>, vector<1x96xf32>
    %7 = vector.broadcast %6 : vector<1x96xf32> to vector<16x96xf32>
    %8 = arith.addf %5, %7 : vector<16x96xf32>
    %9 = vector.extract_strided_slice %8 {offsets = [0, 0], sizes = [16, 32], strides = [1, 1]} : vector<16x96xf32> to vector<16x32xf32>
    %10 = vector.extract_strided_slice %8 {offsets = [0, 32], sizes = [16, 32], strides = [1, 1]} : vector<16x96xf32> to vector<16x32xf32>
    %11 = vector.extract_strided_slice %8 {offsets = [0, 64], sizes = [16, 32], strides = [1, 1]} : vector<16x96xf32> to vector<16x32xf32>
    %12 = vector.extract_strided_slice %9 {offsets = [0, 0], sizes = [16, 8], strides = [1, 1]} : vector<16x32xf32> to vector<16x8xf32>
    %13 = vector.extract_strided_slice %10 {offsets = [0, 0], sizes = [16, 8], strides = [1, 1]} : vector<16x32xf32> to vector<16x8xf32>
    %14 = vector.extract_strided_slice %11 {offsets = [0, 0], sizes = [16, 8], strides = [1, 1]} : vector<16x32xf32> to vector<16x8xf32>
    %15 = arith.truncf %12 : vector<16x8xf32> to vector<16x8xbf16>
    %16 = arith.truncf %13 : vector<16x8xf32> to vector<16x8xbf16>
    %cst_6 = arith.constant dense<0.000000e+00> : vector<16x16xf32>
    %17 = tpu.matmul %15, %16, %cst_6 {dimension_numbers = #tpu.dot_dimension_numbers<[1], [1], [0], [0], [0, 0, 1, 0], [], []>} : vector<16x8xbf16>, vector<16x8xbf16>, vector<16x16xf32> -> vector<16x16xf32>
    %cst_7 = arith.constant 0.353553385 : f32
    %18 = vector.broadcast %cst_7 : f32 to vector<16x16xf32>
    %19 = arith.mulf %17, %18 : vector<16x16xf32>
    %cst_8 = arith.constant dense<0xFF800000> : vector<16xf32>
    %20 = vector.multi_reduction <maximumf>, %19, %cst_8 [1] : vector<16x16xf32> to vector<16xf32>
    %21 = vector.shape_cast %20 : vector<16xf32> to vector<16x1xf32>
    %22 = vector.broadcast %21 : vector<16x1xf32> to vector<16x16xf32>
    %23 = arith.subf %19, %22 : vector<16x16xf32>
    %24 = math.exp %23 : vector<16x16xf32>
    %cst_9 = arith.constant dense<0.000000e+00> : vector<16xf32>
    %25 = vector.multi_reduction <add>, %24, %cst_9 [1] : vector<16x16xf32> to vector<16xf32>
    %26 = vector.shape_cast %25 : vector<16xf32> to vector<16x1xf32>
    %27 = tpu.reciprocal %26 {approx = true} : vector<16x1xf32> -> vector<16x1xf32>
    %28 = vector.broadcast %27 : vector<16x1xf32> to vector<16x16xf32>
    %29 = arith.mulf %24, %28 : vector<16x16xf32>
    %30 = arith.truncf %29 : vector<16x16xf32> to vector<16x16xbf16>
    %31 = arith.truncf %14 : vector<16x8xf32> to vector<16x8xbf16>
    %cst_10 = arith.constant dense<0.000000e+00> : vector<16x8xf32>
    %32 = tpu.matmul %30, %31, %cst_10 {dimension_numbers = #tpu.dot_dimension_numbers<[1], [0], [0], [1], [0, 0, 1, 1], [], []>} : vector<16x16xbf16>, vector<16x8xbf16>, vector<16x8xf32> -> vector<16x8xf32>
    %33 = vector.extract_strided_slice %9 {offsets = [0, 8], sizes = [16, 8], strides = [1, 1]} : vector<16x32xf32> to vector<16x8xf32>
    %34 = vector.extract_strided_slice %10 {offsets = [0, 8], sizes = [16, 8], strides = [1, 1]} : vector<16x32xf32> to vector<16x8xf32>
    %35 = vector.extract_strided_slice %11 {offsets = [0, 8], sizes = [16, 8], strides = [1, 1]} : vector<16x32xf32> to vector<16x8xf32>
    %36 = arith.truncf %33 : vector<16x8xf32> to vector<16x8xbf16>
    %37 = arith.truncf %34 : vector<16x8xf32> to vector<16x8xbf16>
    %cst_11 = arith.constant dense<0.000000e+00> : vector<16x16xf32>
    %38 = tpu.matmul %36, %37, %cst_11 {dimension_numbers = #tpu.dot_dimension_numbers<[1], [1], [0], [0], [0, 0, 1, 0], [], []>} : vector<16x8xbf16>, vector<16x8xbf16>, vector<16x16xf32> -> vector<16x16xf32>
    %cst_12 = arith.constant 0.353553385 : f32
    %39 = vector.broadcast %cst_12 : f32 to vector<16x16xf32>
    %40 = arith.mulf %38, %39 : vector<16x16xf32>
    %cst_13 = arith.constant dense<0xFF800000> : vector<16xf32>
    %41 = vector.multi_reduction <maximumf>, %40, %cst_13 [1] : vector<16x16xf32> to vector<16xf32>
    %42 = vector.shape_cast %41 : vector<16xf32> to vector<16x1xf32>
    %43 = vector.broadcast %42 : vector<16x1xf32> to vector<16x16xf32>
    %44 = arith.subf %40, %43 : vector<16x16xf32>
    %45 = math.exp %44 : vector<16x16xf32>
    %cst_14 = arith.constant dense<0.000000e+00> : vector<16xf32>
    %46 = vector.multi_reduction <add>, %45, %cst_14 [1] : vector<16x16xf32> to vector<16xf32>
    %47 = vector.shape_cast %46 : vector<16xf32> to vector<16x1xf32>
    %48 = tpu.reciprocal %47 {approx = true} : vector<16x1xf32> -> vector<16x1xf32>
    %49 = vector.broadcast %48 : vector<16x1xf32> to vector<16x16xf32>
    %50 = arith.mulf %45, %49 : vector<16x16xf32>
    %51 = arith.truncf %50 : vector<16x16xf32> to vector<16x16xbf16>
    %52 = arith.truncf %35 : vector<16x8xf32> to vector<16x8xbf16>
    %cst_15 = arith.constant dense<0.000000e+00> : vector<16x8xf32>
    %53 = tpu.matmul %51, %52, %cst_15 {dimension_numbers = #tpu.dot_dimension_numbers<[1], [0], [0], [1], [0, 0, 1, 1], [], []>} : vector<16x16xbf16>, vector<16x8xbf16>, vector<16x8xf32> -> vector<16x8xf32>
    %54 = vector.extract_strided_slice %9 {offsets = [0, 16], sizes = [16, 8], strides = [1, 1]} : vector<16x32xf32> to vector<16x8xf32>
    %55 = vector.extract_strided_slice %10 {offsets = [0, 16], sizes = [16, 8], strides = [1, 1]} : vector<16x32xf32> to vector<16x8xf32>
    %56 = vector.extract_strided_slice %11 {offsets = [0, 16], sizes = [16, 8], strides = [1, 1]} : vector<16x32xf32> to vector<16x8xf32>
    %57 = arith.truncf %54 : vector<16x8xf32> to vector<16x8xbf16>
    %58 = arith.truncf %55 : vector<16x8xf32> to vector<16x8xbf16>
    %cst_16 = arith.constant dense<0.000000e+00> : vector<16x16xf32>
    %59 = tpu.matmul %57, %58, %cst_16 {dimension_numbers = #tpu.dot_dimension_numbers<[1], [1], [0], [0], [0, 0, 1, 0], [], []>} : vector<16x8xbf16>, vector<16x8xbf16>, vector<16x16xf32> -> vector<16x16xf32>
    %cst_17 = arith.constant 0.353553385 : f32
    %60 = vector.broadcast %cst_17 : f32 to vector<16x16xf32>
    %61 = arith.mulf %59, %60 : vector<16x16xf32>
    %cst_18 = arith.constant dense<0xFF800000> : vector<16xf32>
    %62 = vector.multi_reduction <maximumf>, %61, %cst_18 [1] : vector<16x16xf32> to vector<16xf32>
    %63 = vector.shape_cast %62 : vector<16xf32> to vector<16x1xf32>
    %64 = vector.broadcast %63 : vector<16x1xf32> to vector<16x16xf32>
    %65 = arith.subf %61, %64 : vector<16x16xf32>
    %66 = math.exp %65 : vector<16x16xf32>
    %cst_19 = arith.constant dense<0.000000e+00> : vector<16xf32>
    %67 = vector.multi_reduction <add>, %66, %cst_19 [1] : vector<16x16xf32> to vector<16xf32>
    %68 = vector.shape_cast %67 : vector<16xf32> to vector<16x1xf32>
    %69 = tpu.reciprocal %68 {approx = true} : vector<16x1xf32> -> vector<16x1xf32>
    %70 = vector.broadcast %69 : vector<16x1xf32> to vector<16x16xf32>
    %71 = arith.mulf %66, %70 : vector<16x16xf32>
    %72 = arith.truncf %71 : vector<16x16xf32> to vector<16x16xbf16>
    %73 = arith.truncf %56 : vector<16x8xf32> to vector<16x8xbf16>
    %cst_20 = arith.constant dense<0.000000e+00> : vector<16x8xf32>
    %74 = tpu.matmul %72, %73, %cst_20 {dimension_numbers = #tpu.dot_dimension_numbers<[1], [0], [0], [1], [0, 0, 1, 1], [], []>} : vector<16x16xbf16>, vector<16x8xbf16>, vector<16x8xf32> -> vector<16x8xf32>
    %75 = vector.extract_strided_slice %9 {offsets = [0, 24], sizes = [16, 8], strides = [1, 1]} : vector<16x32xf32> to vector<16x8xf32>
    %76 = vector.extract_strided_slice %10 {offsets = [0, 24], sizes = [16, 8], strides = [1, 1]} : vector<16x32xf32> to vector<16x8xf32>
    %77 = vector.extract_strided_slice %11 {offsets = [0, 24], sizes = [16, 8], strides = [1, 1]} : vector<16x32xf32> to vector<16x8xf32>
    %78 = arith.truncf %75 : vector<16x8xf32> to vector<16x8xbf16>
    %79 = arith.truncf %76 : vector<16x8xf32> to vector<16x8xbf16>
    %cst_21 = arith.constant dense<0.000000e+00> : vector<16x16xf32>
    %80 = tpu.matmul %78, %79, %cst_21 {dimension_numbers = #tpu.dot_dimension_numbers<[1], [1], [0], [0], [0, 0, 1, 0], [], []>} : vector<16x8xbf16>, vector<16x8xbf16>, vector<16x16xf32> -> vector<16x16xf32>
    %cst_22 = arith.constant 0.353553385 : f32
    %81 = vector.broadcast %cst_22 : f32 to vector<16x16xf32>
    %82 = arith.mulf %80, %81 : vector<16x16xf32>
    %cst_23 = arith.constant dense<0xFF800000> : vector<16xf32>
    %83 = vector.multi_reduction <maximumf>, %82, %cst_23 [1] : vector<16x16xf32> to vector<16xf32>
    %84 = vector.shape_cast %83 : vector<16xf32> to vector<16x1xf32>
    %85 = vector.broadcast %84 : vector<16x1xf32> to vector<16x16xf32>
    %86 = arith.subf %82, %85 : vector<16x16xf32>
    %87 = math.exp %86 : vector<16x16xf32>
    %cst_24 = arith.constant dense<0.000000e+00> : vector<16xf32>
    %88 = vector.multi_reduction <add>, %87, %cst_24 [1] : vector<16x16xf32> to vector<16xf32>
    %89 = vector.shape_cast %88 : vector<16xf32> to vector<16x1xf32>
    %90 = tpu.reciprocal %89 {approx = true} : vector<16x1xf32> -> vector<16x1xf32>
    %91 = vector.broadcast %90 : vector<16x1xf32> to vector<16x16xf32>
    %92 = arith.mulf %87, %91 : vector<16x16xf32>
    %93 = arith.truncf %92 : vector<16x16xf32> to vector<16x16xbf16>
    %94 = arith.truncf %77 : vector<16x8xf32> to vector<16x8xbf16>
    %cst_25 = arith.constant dense<0.000000e+00> : vector<16x8xf32>
    %95 = tpu.matmul %93, %94, %cst_25 {dimension_numbers = #tpu.dot_dimension_numbers<[1], [0], [0], [1], [0, 0, 1, 1], [], []>} : vector<16x16xbf16>, vector<16x8xbf16>, vector<16x8xf32> -> vector<16x8xf32>
    %96 = tpu.concatenate %32, %53, %74, %95 in 1 : vector<16x8xf32>, vector<16x8xf32>, vector<16x8xf32>, vector<16x8xf32> -> vector<16x32xf32>
    %c0_26 = arith.constant 0 : index
    %c0_27 = arith.constant 0 : index
    %97 = vector.load %arg4[%c0_26, %c0_27] : memref<32x32xf32, #tpu.memory_space<vmem>>, vector<32x32xf32>
    %98 = arith.truncf %96 : vector<16x32xf32> to vector<16x32xbf16>
    %99 = arith.truncf %97 : vector<32x32xf32> to vector<32x32xbf16>
    %cst_28 = arith.constant dense<0.000000e+00> : vector<16x32xf32>
    %100 = tpu.matmul %98, %99, %cst_28 {dimension_numbers = #tpu.dot_dimension_numbers<[1], [0], [0], [1], [0, 0, 1, 1], [], []>} : vector<16x32xbf16>, vector<32x32xbf16>, vector<16x32xf32> -> vector<16x32xf32>
    %101 = arith.addf %1, %100 : vector<16x32xf32>
    %c0_29 = arith.constant 0 : index
    %c0_30 = arith.constant 0 : index
    %102 = vector.load %arg5[%c0_29, %c0_30] : memref<1x32xf32, #tpu.memory_space<vmem>>, vector<1x32xf32>
    %103 = vector.broadcast %102 : vector<1x32xf32> to vector<16x32xf32>
    %104 = arith.addf %101, %103 : vector<16x32xf32>
    %c0_31 = arith.constant 0 : index
    %c0_32 = arith.constant 0 : index
    %105 = vector.load %arg10[%c0_31, %c0_32] : memref<4x32xf32, #tpu.memory_space<vmem>>, vector<1x32xf32>
    %c1 = arith.constant 1 : index
    %c0_33 = arith.constant 0 : index
    %106 = vector.load %arg10[%c1, %c0_33] : memref<4x32xf32, #tpu.memory_space<vmem>>, vector<1x32xf32>
    %cst_34 = arith.constant dense<0.000000e+00> : vector<16xf32>
    %107 = vector.multi_reduction <add>, %104, %cst_34 [1] : vector<16x32xf32> to vector<16xf32>
    %108 = vector.shape_cast %107 : vector<16xf32> to vector<16x1xf32>
    %cst_35 = arith.constant 3.200000e+01 : f32
    %109 = vector.broadcast %cst_35 : f32 to vector<16x1xf32>
    %110 = arith.divf %108, %109 : vector<16x1xf32>
    %111 = vector.broadcast %110 : vector<16x1xf32> to vector<16x32xf32>
    %112 = arith.subf %104, %111 : vector<16x32xf32>
    %113 = arith.mulf %112, %112 : vector<16x32xf32>
    %cst_36 = arith.constant dense<0.000000e+00> : vector<16xf32>
    %114 = vector.multi_reduction <add>, %113, %cst_36 [1] : vector<16x32xf32> to vector<16xf32>
    %115 = vector.shape_cast %114 : vector<16xf32> to vector<16x1xf32>
    %cst_37 = arith.constant 3.200000e+01 : f32
    %116 = vector.broadcast %cst_37 : f32 to vector<16x1xf32>
    %117 = arith.divf %115, %116 : vector<16x1xf32>
    %118 = vector.broadcast %110 : vector<16x1xf32> to vector<16x32xf32>
    %119 = arith.subf %104, %118 : vector<16x32xf32>
    %cst_38 = arith.constant 9.99999974E-6 : f32
    %120 = vector.broadcast %cst_38 : f32 to vector<16x1xf32>
    %121 = arith.addf %117, %120 : vector<16x1xf32>
    %122 = math.rsqrt %121 : vector<16x1xf32>
    %123 = vector.broadcast %122 : vector<16x1xf32> to vector<16x32xf32>
    %124 = arith.mulf %119, %123 : vector<16x32xf32>
    %125 = vector.broadcast %105 : vector<1x32xf32> to vector<16x32xf32>
    %126 = arith.mulf %124, %125 : vector<16x32xf32>
    %127 = vector.broadcast %106 : vector<1x32xf32> to vector<16x32xf32>
    %128 = arith.addf %126, %127 : vector<16x32xf32>
    %c0_39 = arith.constant 0 : index
    %c0_40 = arith.constant 0 : index
    %129 = vector.load %arg6[%c0_39, %c0_40] : memref<32x32xf32, #tpu.memory_space<vmem>>, vector<32x32xf32>
    %130 = arith.truncf %128 : vector<16x32xf32> to vector<16x32xbf16>
    %131 = arith.truncf %129 : vector<32x32xf32> to vector<32x32xbf16>
    %cst_41 = arith.constant dense<0.000000e+00> : vector<16x32xf32>
    %132 = tpu.matmul %130, %131, %cst_41 {dimension_numbers = #tpu.dot_dimension_numbers<[1], [0], [0], [1], [0, 0, 1, 1], [], []>} : vector<16x32xbf16>, vector<32x32xbf16>, vector<16x32xf32> -> vector<16x32xf32>
    %c0_42 = arith.constant 0 : index
    %c0_43 = arith.constant 0 : index
    %133 = vector.load %arg7[%c0_42, %c0_43] : memref<1x32xf32, #tpu.memory_space<vmem>>, vector<1x32xf32>
    %134 = vector.broadcast %133 : vector<1x32xf32> to vector<16x32xf32>
    %135 = arith.addf %132, %134 : vector<16x32xf32>
    %136 = arith.mulf %135, %135 : vector<16x32xf32>
    %137 = arith.mulf %135, %136 : vector<16x32xf32>
    %cst_44 = arith.constant 4.471500e-02 : f32
    %138 = vector.broadcast %cst_44 : f32 to vector<16x32xf32>
    %139 = arith.mulf %138, %137 : vector<16x32xf32>
    %140 = arith.addf %135, %139 : vector<16x32xf32>
    %cst_45 = arith.constant 0.797884583 : f32
    %141 = vector.broadcast %cst_45 : f32 to vector<16x32xf32>
    %142 = arith.mulf %141, %140 : vector<16x32xf32>
    %143 = math.tanh %142 : vector<16x32xf32>
    %cst_46 = arith.constant 1.000000e+00 : f32
    %144 = vector.broadcast %cst_46 : f32 to vector<16x32xf32>
    %145 = arith.addf %144, %143 : vector<16x32xf32>
    %cst_47 = arith.constant 5.000000e-01 : f32
    %146 = vector.broadcast %cst_47 : f32 to vector<16x32xf32>
    %147 = arith.mulf %146, %145 : vector<16x32xf32>
    %148 = arith.mulf %135, %147 : vector<16x32xf32>
    %c0_48 = arith.constant 0 : index
    %c0_49 = arith.constant 0 : index
    %149 = vector.load %arg8[%c0_48, %c0_49] : memref<32x32xf32, #tpu.memory_space<vmem>>, vector<32x32xf32>
    %150 = arith.truncf %148 : vector<16x32xf32> to vector<16x32xbf16>
    %151 = arith.truncf %149 : vector<32x32xf32> to vector<32x32xbf16>
    %cst_50 = arith.constant dense<0.000000e+00> : vector<16x32xf32>
    %152 = tpu.matmul %150, %151, %cst_50 {dimension_numbers = #tpu.dot_dimension_numbers<[1], [0], [0], [1], [0, 0, 1, 1], [], []>} : vector<16x32xbf16>, vector<32x32xbf16>, vector<16x32xf32> -> vector<16x32xf32>
    %c0_51 = arith.constant 0 : index
    %c0_52 = arith.constant 0 : index
    %153 = vector.load %arg9[%c0_51, %c0_52] : memref<1x32xf32, #tpu.memory_space<vmem>>, vector<1x32xf32>
    %154 = vector.broadcast %153 : vector<1x32xf32> to vector<16x32xf32>
    %155 = arith.addf %152, %154 : vector<16x32xf32>
    %156 = arith.addf %128, %155 : vector<16x32xf32>
    %c2 = arith.constant 2 : index
    %c0_53 = arith.constant 0 : index
    %157 = vector.load %arg10[%c2, %c0_53] : memref<4x32xf32, #tpu.memory_space<vmem>>, vector<1x32xf32>
    %c3 = arith.constant 3 : index
    %c0_54 = arith.constant 0 : index
    %158 = vector.load %arg10[%c3, %c0_54] : memref<4x32xf32, #tpu.memory_space<vmem>>, vector<1x32xf32>
    %cst_55 = arith.constant dense<0.000000e+00> : vector<16xf32>
    %159 = vector.multi_reduction <add>, %156, %cst_55 [1] : vector<16x32xf32> to vector<16xf32>
    %160 = vector.shape_cast %159 : vector<16xf32> to vector<16x1xf32>
    %cst_56 = arith.constant 3.200000e+01 : f32
    %161 = vector.broadcast %cst_56 : f32 to vector<16x1xf32>
    %162 = arith.divf %160, %161 : vector<16x1xf32>
    %163 = vector.broadcast %162 : vector<16x1xf32> to vector<16x32xf32>
    %164 = arith.subf %156, %163 : vector<16x32xf32>
    %165 = arith.mulf %164, %164 : vector<16x32xf32>
    %cst_57 = arith.constant dense<0.000000e+00> : vector<16xf32>
    %166 = vector.multi_reduction <add>, %165, %cst_57 [1] : vector<16x32xf32> to vector<16xf32>
    %167 = vector.shape_cast %166 : vector<16xf32> to vector<16x1xf32>
    %cst_58 = arith.constant 3.200000e+01 : f32
    %168 = vector.broadcast %cst_58 : f32 to vector<16x1xf32>
    %169 = arith.divf %167, %168 : vector<16x1xf32>
    %170 = vector.broadcast %162 : vector<16x1xf32> to vector<16x32xf32>
    %171 = arith.subf %156, %170 : vector<16x32xf32>
    %cst_59 = arith.constant 9.99999974E-6 : f32
    %172 = vector.broadcast %cst_59 : f32 to vector<16x1xf32>
    %173 = arith.addf %169, %172 : vector<16x1xf32>
    %174 = math.rsqrt %173 : vector<16x1xf32>
    %175 = vector.broadcast %174 : vector<16x1xf32> to vector<16x32xf32>
    %176 = arith.mulf %171, %175 : vector<16x32xf32>
    %177 = vector.broadcast %157 : vector<1x32xf32> to vector<16x32xf32>
    %178 = arith.mulf %176, %177 : vector<16x32xf32>
    %179 = vector.broadcast %158 : vector<1x32xf32> to vector<16x32xf32>
    %180 = arith.addf %178, %179 : vector<16x32xf32>
    %c0_60 = arith.constant 0 : index
    %c0_61 = arith.constant 0 : index
    %c0_62 = arith.constant 0 : index
    %181 = vector.load %arg11[%c0_60, %c0_61, %c0_62] : memref<1x16x32xf32, #tpu.memory_space<vmem>>, vector<1x16x32xf32>
    %182 = vector.shape_cast %181 : vector<1x16x32xf32> to vector<16x32xf32>
    %183 = vector.shape_cast %180 : vector<16x32xf32> to vector<1x16x32xf32>
    tpu.vector_store %arg11[%c0_60, %c0_61, %c0_62], %183 {strides = array<i32>} : memref<1x16x32xf32, #tpu.memory_space<vmem>>, vector<1x16x32xf32>,
    return
  }
  func.func @transform_0(%arg0: i32) -> (i32, i32, i32) {
    %c0_i32 = arith.constant 0 : i32
    %c0_i32_0 = arith.constant 0 : i32
    %c0_i32_1 = arith.constant 0 : i32
    return %arg0, %c0_i32, %c0_i32_0 : i32, i32, i32
  }
  func.func @transform_1(%arg0: i32) -> (i32, i32) {
    %c0_i32 = arith.constant 0 : i32
    %c0_i32_0 = arith.constant 0 : i32
    %c0_i32_1 = arith.constant 0 : i32
    return %c0_i32, %c0_i32_0 : i32, i32
  }
  func.func @transform_2(%arg0: i32) -> (i32, i32) {
    %c0_i32 = arith.constant 0 : i32
    %c0_i32_0 = arith.constant 0 : i32
    %c0_i32_1 = arith.constant 0 : i32
    return %c0_i32, %c0_i32_0 : i32, i32
  }
  func.func @transform_3(%arg0: i32) -> (i32, i32) {
    %c0_i32 = arith.constant 0 : i32
    %c0_i32_0 = arith.constant 0 : i32
    %c0_i32_1 = arith.constant 0 : i32
    return %c0_i32, %c0_i32_0 : i32, i32
  }
  func.func @transform_4(%arg0: i32) -> (i32, i32) {
    %c0_i32 = arith.constant 0 : i32
    %c0_i32_0 = arith.constant 0 : i32
    %c0_i32_1 = arith.constant 0 : i32
    return %c0_i32, %c0_i32_0 : i32, i32
  }
  func.func @transform_5(%arg0: i32) -> (i32, i32) {
    %c0_i32 = arith.constant 0 : i32
    %c0_i32_0 = arith.constant 0 : i32
    %c0_i32_1 = arith.constant 0 : i32
    return %c0_i32, %c0_i32_0 : i32, i32
  }
  func.func @transform_6(%arg0: i32) -> (i32, i32) {
    %c0_i32 = arith.constant 0 : i32
    %c0_i32_0 = arith.constant 0 : i32
    %c0_i32_1 = arith.constant 0 : i32
    return %c0_i32, %c0_i32_0 : i32, i32
  }
  func.func @transform_7(%arg0: i32) -> (i32, i32) {
    %c0_i32 = arith.constant 0 : i32
    %c0_i32_0 = arith.constant 0 : i32
    %c0_i32_1 = arith.constant 0 : i32
    return %c0_i32, %c0_i32_0 : i32, i32
  }
  func.func @transform_8(%arg0: i32) -> (i32, i32) {
    %c0_i32 = arith.constant 0 : i32
    %c0_i32_0 = arith.constant 0 : i32
    %c0_i32_1 = arith.constant 0 : i32
    return %c0_i32, %c0_i32_0 : i32, i32
  }
  func.func @transform_9(%arg0: i32) -> (i32, i32) {
    %c0_i32 = arith.constant 0 : i32
    %c0_i32_0 = arith.constant 0 : i32
    %c0_i32_1 = arith.constant 0 : i32
    return %c0_i32, %c0_i32_0 : i32, i32
  }
  func.func @transform_10(%arg0: i32) -> (i32, i32, i32) {
    %c0_i32 = arith.constant 0 : i32
    %c0_i32_0 = arith.constant 0 : i32
    %c0_i32_1 = arith.constant 0 : i32
    return %arg0, %c0_i32, %c0_i32_0 : i32, i32, i32
  }
}

module attributes {stable_mosaic.version = 11 : i64} {
  func.func @_distil_conv_kernel(%arg0: i32, %arg1: memref<2x16x32xf32, #tpu.memory_space<vmem>>, %arg2: memref<32x32xf32, #tpu.memory_space<vmem>>, %arg3: memref<32x32xf32, #tpu.memory_space<vmem>>, %arg4: memref<32x32xf32, #tpu.memory_space<vmem>>, %arg5: memref<1x32xf32, #tpu.memory_space<vmem>>, %arg6: memref<2x32xf32, #tpu.memory_space<vmem>>, %arg7: memref<2x16x32xf32, #tpu.memory_space<vmem>>) attributes {dimension_semantics = [#tpu.dimension_semantics<arbitrary>], iteration_bounds = array<i64: 1>, scalar_prefetch = 0 : i64, scratch_operands = 0 : i64, tpu.core_type = #tpu.core_type<tc>, window_params = [{pipeline_mode = #tpu.pipeline_mode<synchronous>, transform_indices = @transform_0, window_bounds = array<i64: 2, 16, 32>}, {pipeline_mode = #tpu.pipeline_mode<synchronous>, transform_indices = @transform_1, window_bounds = array<i64: 32, 32>}, {pipeline_mode = #tpu.pipeline_mode<synchronous>, transform_indices = @transform_2, window_bounds = array<i64: 32, 32>}, {pipeline_mode = #tpu.pipeline_mode<synchronous>, transform_indices = @transform_3, window_bounds = array<i64: 32, 32>}, {pipeline_mode = #tpu.pipeline_mode<synchronous>, transform_indices = @transform_4, window_bounds = array<i64: 1, 32>}, {pipeline_mode = #tpu.pipeline_mode<synchronous>, transform_indices = @transform_5, window_bounds = array<i64: 2, 32>}, {pipeline_mode = #tpu.pipeline_mode<synchronous>, transform_indices = @transform_6, window_bounds = array<i64: 2, 16, 32>}]} {
    %c0 = arith.constant 0 : index
    %c0_0 = arith.constant 0 : index
    %0 = vector.load %arg5[%c0, %c0_0] : memref<1x32xf32, #tpu.memory_space<vmem>>, vector<1x32xf32>
    %c0_1 = arith.constant 0 : index
    %c0_2 = arith.constant 0 : index
    %c0_3 = arith.constant 0 : index
    %1 = vector.load %arg1[%c0_1, %c0_2, %c0_3] : memref<2x16x32xf32, #tpu.memory_space<vmem>>, vector<1x16x32xf32>
    %2 = vector.shape_cast %1 : vector<1x16x32xf32> to vector<16x32xf32>
    %3 = vector.extract_strided_slice %2 {offsets = [15, 0], sizes = [1, 32], strides = [1, 1]} : vector<16x32xf32> to vector<1x32xf32>
    %4 = vector.extract_strided_slice %2 {offsets = [0, 0], sizes = [15, 32], strides = [1, 1]} : vector<16x32xf32> to vector<15x32xf32>
    %5 = tpu.concatenate %3, %4 in 0 : vector<1x32xf32>, vector<15x32xf32> -> vector<16x32xf32>
    %6 = vector.extract_strided_slice %2 {offsets = [1, 0], sizes = [15, 32], strides = [1, 1]} : vector<16x32xf32> to vector<15x32xf32>
    %7 = vector.extract_strided_slice %2 {offsets = [0, 0], sizes = [1, 32], strides = [1, 1]} : vector<16x32xf32> to vector<1x32xf32>
    %8 = tpu.concatenate %6, %7 in 0 : vector<15x32xf32>, vector<1x32xf32> -> vector<16x32xf32>
    %c0_4 = arith.constant 0 : index
    %c0_5 = arith.constant 0 : index
    %9 = vector.load %arg2[%c0_4, %c0_5] : memref<32x32xf32, #tpu.memory_space<vmem>>, vector<32x32xf32>
    %10 = arith.truncf %5 : vector<16x32xf32> to vector<16x32xbf16>
    %11 = arith.truncf %9 : vector<32x32xf32> to vector<32x32xbf16>
    %cst = arith.constant dense<0.000000e+00> : vector<16x32xf32>
    %12 = tpu.matmul %10, %11, %cst {dimension_numbers = #tpu.dot_dimension_numbers<[1], [0], [0], [1], [0, 0, 1, 1], [], []>} : vector<16x32xbf16>, vector<32x32xbf16>, vector<16x32xf32> -> vector<16x32xf32>
    %c0_6 = arith.constant 0 : index
    %c0_7 = arith.constant 0 : index
    %13 = vector.load %arg3[%c0_6, %c0_7] : memref<32x32xf32, #tpu.memory_space<vmem>>, vector<32x32xf32>
    %14 = arith.truncf %2 : vector<16x32xf32> to vector<16x32xbf16>
    %15 = arith.truncf %13 : vector<32x32xf32> to vector<32x32xbf16>
    %cst_8 = arith.constant dense<0.000000e+00> : vector<16x32xf32>
    %16 = tpu.matmul %14, %15, %cst_8 {dimension_numbers = #tpu.dot_dimension_numbers<[1], [0], [0], [1], [0, 0, 1, 1], [], []>} : vector<16x32xbf16>, vector<32x32xbf16>, vector<16x32xf32> -> vector<16x32xf32>
    %17 = arith.addf %12, %16 : vector<16x32xf32>
    %c0_9 = arith.constant 0 : index
    %c0_10 = arith.constant 0 : index
    %18 = vector.load %arg4[%c0_9, %c0_10] : memref<32x32xf32, #tpu.memory_space<vmem>>, vector<32x32xf32>
    %19 = arith.truncf %8 : vector<16x32xf32> to vector<16x32xbf16>
    %20 = arith.truncf %18 : vector<32x32xf32> to vector<32x32xbf16>
    %cst_11 = arith.constant dense<0.000000e+00> : vector<16x32xf32>
    %21 = tpu.matmul %19, %20, %cst_11 {dimension_numbers = #tpu.dot_dimension_numbers<[1], [0], [0], [1], [0, 0, 1, 1], [], []>} : vector<16x32xbf16>, vector<32x32xbf16>, vector<16x32xf32> -> vector<16x32xf32>
    %22 = arith.addf %17, %21 : vector<16x32xf32>
    %23 = vector.broadcast %0 : vector<1x32xf32> to vector<16x32xf32>
    %24 = arith.addf %22, %23 : vector<16x32xf32>
    %c1 = arith.constant 1 : index
    %c0_12 = arith.constant 0 : index
    %c0_13 = arith.constant 0 : index
    %25 = vector.load %arg1[%c1, %c0_12, %c0_13] : memref<2x16x32xf32, #tpu.memory_space<vmem>>, vector<1x16x32xf32>
    %26 = vector.shape_cast %25 : vector<1x16x32xf32> to vector<16x32xf32>
    %27 = vector.extract_strided_slice %26 {offsets = [15, 0], sizes = [1, 32], strides = [1, 1]} : vector<16x32xf32> to vector<1x32xf32>
    %28 = vector.extract_strided_slice %26 {offsets = [0, 0], sizes = [15, 32], strides = [1, 1]} : vector<16x32xf32> to vector<15x32xf32>
    %29 = tpu.concatenate %27, %28 in 0 : vector<1x32xf32>, vector<15x32xf32> -> vector<16x32xf32>
    %30 = vector.extract_strided_slice %26 {offsets = [1, 0], sizes = [15, 32], strides = [1, 1]} : vector<16x32xf32> to vector<15x32xf32>
    %31 = vector.extract_strided_slice %26 {offsets = [0, 0], sizes = [1, 32], strides = [1, 1]} : vector<16x32xf32> to vector<1x32xf32>
    %32 = tpu.concatenate %30, %31 in 0 : vector<15x32xf32>, vector<1x32xf32> -> vector<16x32xf32>
    %c0_14 = arith.constant 0 : index
    %c0_15 = arith.constant 0 : index
    %33 = vector.load %arg2[%c0_14, %c0_15] : memref<32x32xf32, #tpu.memory_space<vmem>>, vector<32x32xf32>
    %34 = arith.truncf %29 : vector<16x32xf32> to vector<16x32xbf16>
    %35 = arith.truncf %33 : vector<32x32xf32> to vector<32x32xbf16>
    %cst_16 = arith.constant dense<0.000000e+00> : vector<16x32xf32>
    %36 = tpu.matmul %34, %35, %cst_16 {dimension_numbers = #tpu.dot_dimension_numbers<[1], [0], [0], [1], [0, 0, 1, 1], [], []>} : vector<16x32xbf16>, vector<32x32xbf16>, vector<16x32xf32> -> vector<16x32xf32>
    %c0_17 = arith.constant 0 : index
    %c0_18 = arith.constant 0 : index
    %37 = vector.load %arg3[%c0_17, %c0_18] : memref<32x32xf32, #tpu.memory_space<vmem>>, vector<32x32xf32>
    %38 = arith.truncf %26 : vector<16x32xf32> to vector<16x32xbf16>
    %39 = arith.truncf %37 : vector<32x32xf32> to vector<32x32xbf16>
    %cst_19 = arith.constant dense<0.000000e+00> : vector<16x32xf32>
    %40 = tpu.matmul %38, %39, %cst_19 {dimension_numbers = #tpu.dot_dimension_numbers<[1], [0], [0], [1], [0, 0, 1, 1], [], []>} : vector<16x32xbf16>, vector<32x32xbf16>, vector<16x32xf32> -> vector<16x32xf32>
    %41 = arith.addf %36, %40 : vector<16x32xf32>
    %c0_20 = arith.constant 0 : index
    %c0_21 = arith.constant 0 : index
    %42 = vector.load %arg4[%c0_20, %c0_21] : memref<32x32xf32, #tpu.memory_space<vmem>>, vector<32x32xf32>
    %43 = arith.truncf %32 : vector<16x32xf32> to vector<16x32xbf16>
    %44 = arith.truncf %42 : vector<32x32xf32> to vector<32x32xbf16>
    %cst_22 = arith.constant dense<0.000000e+00> : vector<16x32xf32>
    %45 = tpu.matmul %43, %44, %cst_22 {dimension_numbers = #tpu.dot_dimension_numbers<[1], [0], [0], [1], [0, 0, 1, 1], [], []>} : vector<16x32xbf16>, vector<32x32xbf16>, vector<16x32xf32> -> vector<16x32xf32>
    %46 = arith.addf %41, %45 : vector<16x32xf32>
    %47 = vector.broadcast %0 : vector<1x32xf32> to vector<16x32xf32>
    %48 = arith.addf %46, %47 : vector<16x32xf32>
    %cst_23 = arith.constant dense<0.000000e+00> : vector<32xf32>
    %49 = vector.multi_reduction <add>, %24, %cst_23 [0] : vector<16x32xf32> to vector<32xf32>
    %50 = vector.shape_cast %49 : vector<32xf32> to vector<1x32xf32>
    %cst_24 = arith.constant 0.000000e+00 : f32
    %51 = vector.broadcast %cst_24 : f32 to vector<1x32xf32>
    %52 = arith.addf %51, %50 : vector<1x32xf32>
    %cst_25 = arith.constant dense<0.000000e+00> : vector<32xf32>
    %53 = vector.multi_reduction <add>, %48, %cst_25 [0] : vector<16x32xf32> to vector<32xf32>
    %54 = vector.shape_cast %53 : vector<32xf32> to vector<1x32xf32>
    %55 = arith.addf %52, %54 : vector<1x32xf32>
    %cst_26 = arith.constant 3.200000e+01 : f32
    %56 = vector.broadcast %cst_26 : f32 to vector<1x32xf32>
    %57 = arith.divf %55, %56 : vector<1x32xf32>
    %58 = vector.broadcast %57 : vector<1x32xf32> to vector<16x32xf32>
    %59 = arith.subf %24, %58 : vector<16x32xf32>
    %60 = arith.mulf %59, %59 : vector<16x32xf32>
    %cst_27 = arith.constant dense<0.000000e+00> : vector<32xf32>
    %61 = vector.multi_reduction <add>, %60, %cst_27 [0] : vector<16x32xf32> to vector<32xf32>
    %62 = vector.shape_cast %61 : vector<32xf32> to vector<1x32xf32>
    %cst_28 = arith.constant 0.000000e+00 : f32
    %63 = vector.broadcast %cst_28 : f32 to vector<1x32xf32>
    %64 = arith.addf %63, %62 : vector<1x32xf32>
    %65 = vector.broadcast %57 : vector<1x32xf32> to vector<16x32xf32>
    %66 = arith.subf %48, %65 : vector<16x32xf32>
    %67 = arith.mulf %66, %66 : vector<16x32xf32>
    %cst_29 = arith.constant dense<0.000000e+00> : vector<32xf32>
    %68 = vector.multi_reduction <add>, %67, %cst_29 [0] : vector<16x32xf32> to vector<32xf32>
    %69 = vector.shape_cast %68 : vector<32xf32> to vector<1x32xf32>
    %70 = arith.addf %64, %69 : vector<1x32xf32>
    %cst_30 = arith.constant 3.200000e+01 : f32
    %71 = vector.broadcast %cst_30 : f32 to vector<1x32xf32>
    %72 = arith.divf %70, %71 : vector<1x32xf32>
    %cst_31 = arith.constant 9.99999974E-6 : f32
    %73 = vector.broadcast %cst_31 : f32 to vector<1x32xf32>
    %74 = arith.addf %72, %73 : vector<1x32xf32>
    %75 = math.rsqrt %74 : vector<1x32xf32>
    %c0_32 = arith.constant 0 : index
    %c0_33 = arith.constant 0 : index
    %76 = vector.load %arg6[%c0_32, %c0_33] : memref<2x32xf32, #tpu.memory_space<vmem>>, vector<1x32xf32>
    %c1_34 = arith.constant 1 : index
    %c0_35 = arith.constant 0 : index
    %77 = vector.load %arg6[%c1_34, %c0_35] : memref<2x32xf32, #tpu.memory_space<vmem>>, vector<1x32xf32>
    %cst_36 = arith.constant 0xFF800000 : f32
    %78 = vector.broadcast %cst_36 : f32 to vector<1x32xf32>
    %79 = vector.broadcast %57 : vector<1x32xf32> to vector<16x32xf32>
    %80 = arith.subf %24, %79 : vector<16x32xf32>
    %81 = vector.broadcast %75 : vector<1x32xf32> to vector<16x32xf32>
    %82 = arith.mulf %80, %81 : vector<16x32xf32>
    %83 = vector.broadcast %76 : vector<1x32xf32> to vector<16x32xf32>
    %84 = arith.mulf %82, %83 : vector<16x32xf32>
    %85 = vector.broadcast %77 : vector<1x32xf32> to vector<16x32xf32>
    %86 = arith.addf %84, %85 : vector<16x32xf32>
    %cst_37 = arith.constant 0.000000e+00 : f32
    %87 = vector.broadcast %cst_37 : f32 to vector<16x32xf32>
    %88 = arith.cmpf ogt, %86, %87 : vector<16x32xf32>
    %89 = math.exp %86 : vector<16x32xf32>
    %cst_38 = arith.constant 1.000000e+00 : f32
    %90 = vector.broadcast %cst_38 : f32 to vector<16x32xf32>
    %91 = arith.subf %89, %90 : vector<16x32xf32>
    %92 = arith.select %88, %86, %91 : vector<16x32xi1>, vector<16x32xf32>
    %93 = vector.extract_strided_slice %92 {offsets = [0, 0], sizes = [15, 32], strides = [1, 1]} : vector<16x32xf32> to vector<15x32xf32>
    %94 = tpu.concatenate %78, %93 in 0 : vector<1x32xf32>, vector<15x32xf32> -> vector<16x32xf32>
    %95 = vector.extract_strided_slice %92 {offsets = [1, 0], sizes = [15, 32], strides = [1, 1]} : vector<16x32xf32> to vector<15x32xf32>
    %96 = tpu.concatenate %95, %78 in 0 : vector<15x32xf32>, vector<1x32xf32> -> vector<16x32xf32>
    %97 = arith.maximumf %94, %92 : vector<16x32xf32>
    %98 = arith.maximumf %97, %96 : vector<16x32xf32>
    %c0_39 = arith.constant 0 : index
    %c0_40 = arith.constant 0 : index
    %c0_41 = arith.constant 0 : index
    %99 = vector.load %arg7[%c0_39, %c0_40, %c0_41] : memref<2x16x32xf32, #tpu.memory_space<vmem>>, vector<1x16x32xf32>
    %100 = vector.shape_cast %99 : vector<1x16x32xf32> to vector<16x32xf32>
    %101 = vector.shape_cast %98 : vector<16x32xf32> to vector<1x16x32xf32>
    tpu.vector_store %arg7[%c0_39, %c0_40, %c0_41], %101 {strides = array<i32>} : memref<2x16x32xf32, #tpu.memory_space<vmem>>, vector<1x16x32xf32>,
    %102 = vector.broadcast %57 : vector<1x32xf32> to vector<16x32xf32>
    %103 = arith.subf %48, %102 : vector<16x32xf32>
    %104 = vector.broadcast %75 : vector<1x32xf32> to vector<16x32xf32>
    %105 = arith.mulf %103, %104 : vector<16x32xf32>
    %106 = vector.broadcast %76 : vector<1x32xf32> to vector<16x32xf32>
    %107 = arith.mulf %105, %106 : vector<16x32xf32>
    %108 = vector.broadcast %77 : vector<1x32xf32> to vector<16x32xf32>
    %109 = arith.addf %107, %108 : vector<16x32xf32>
    %cst_42 = arith.constant 0.000000e+00 : f32
    %110 = vector.broadcast %cst_42 : f32 to vector<16x32xf32>
    %111 = arith.cmpf ogt, %109, %110 : vector<16x32xf32>
    %112 = math.exp %109 : vector<16x32xf32>
    %cst_43 = arith.constant 1.000000e+00 : f32
    %113 = vector.broadcast %cst_43 : f32 to vector<16x32xf32>
    %114 = arith.subf %112, %113 : vector<16x32xf32>
    %115 = arith.select %111, %109, %114 : vector<16x32xi1>, vector<16x32xf32>
    %116 = vector.extract_strided_slice %115 {offsets = [0, 0], sizes = [15, 32], strides = [1, 1]} : vector<16x32xf32> to vector<15x32xf32>
    %117 = tpu.concatenate %78, %116 in 0 : vector<1x32xf32>, vector<15x32xf32> -> vector<16x32xf32>
    %118 = vector.extract_strided_slice %115 {offsets = [1, 0], sizes = [15, 32], strides = [1, 1]} : vector<16x32xf32> to vector<15x32xf32>
    %119 = tpu.concatenate %118, %78 in 0 : vector<15x32xf32>, vector<1x32xf32> -> vector<16x32xf32>
    %120 = arith.maximumf %117, %115 : vector<16x32xf32>
    %121 = arith.maximumf %120, %119 : vector<16x32xf32>
    %c1_44 = arith.constant 1 : index
    %c0_45 = arith.constant 0 : index
    %c0_46 = arith.constant 0 : index
    %122 = vector.load %arg7[%c1_44, %c0_45, %c0_46] : memref<2x16x32xf32, #tpu.memory_space<vmem>>, vector<1x16x32xf32>
    %123 = vector.shape_cast %122 : vector<1x16x32xf32> to vector<16x32xf32>
    %124 = vector.shape_cast %121 : vector<16x32xf32> to vector<1x16x32xf32>
    tpu.vector_store %arg7[%c1_44, %c0_45, %c0_46], %124 {strides = array<i32>} : memref<2x16x32xf32, #tpu.memory_space<vmem>>, vector<1x16x32xf32>,
    return
  }
  func.func @transform_0(%arg0: i32) -> (i32, i32, i32) {
    %c0_i32 = arith.constant 0 : i32
    %c0_i32_0 = arith.constant 0 : i32
    %c0_i32_1 = arith.constant 0 : i32
    %c0_i32_2 = arith.constant 0 : i32
    return %c0_i32, %c0_i32_0, %c0_i32_1 : i32, i32, i32
  }
  func.func @transform_1(%arg0: i32) -> (i32, i32) {
    %c0_i32 = arith.constant 0 : i32
    %c0_i32_0 = arith.constant 0 : i32
    %c0_i32_1 = arith.constant 0 : i32
    return %c0_i32, %c0_i32_0 : i32, i32
  }
  func.func @transform_2(%arg0: i32) -> (i32, i32) {
    %c0_i32 = arith.constant 0 : i32
    %c0_i32_0 = arith.constant 0 : i32
    %c0_i32_1 = arith.constant 0 : i32
    return %c0_i32, %c0_i32_0 : i32, i32
  }
  func.func @transform_3(%arg0: i32) -> (i32, i32) {
    %c0_i32 = arith.constant 0 : i32
    %c0_i32_0 = arith.constant 0 : i32
    %c0_i32_1 = arith.constant 0 : i32
    return %c0_i32, %c0_i32_0 : i32, i32
  }
  func.func @transform_4(%arg0: i32) -> (i32, i32) {
    %c0_i32 = arith.constant 0 : i32
    %c0_i32_0 = arith.constant 0 : i32
    %c0_i32_1 = arith.constant 0 : i32
    return %c0_i32, %c0_i32_0 : i32, i32
  }
  func.func @transform_5(%arg0: i32) -> (i32, i32) {
    %c0_i32 = arith.constant 0 : i32
    %c0_i32_0 = arith.constant 0 : i32
    %c0_i32_1 = arith.constant 0 : i32
    return %c0_i32, %c0_i32_0 : i32, i32
  }
  func.func @transform_6(%arg0: i32) -> (i32, i32, i32) {
    %c0_i32 = arith.constant 0 : i32
    %c0_i32_0 = arith.constant 0 : i32
    %c0_i32_1 = arith.constant 0 : i32
    %c0_i32_2 = arith.constant 0 : i32
    return %c0_i32, %c0_i32_0, %c0_i32_1 : i32, i32, i32
  }
}

module attributes {stable_mosaic.version = 11 : i64} {
  func.func @_encoder_layer_kernel(%arg0: i32, %arg1: memref<1x8x32xf32, #tpu.memory_space<vmem>>, %arg2: memref<32x96xf32, #tpu.memory_space<vmem>>, %arg3: memref<1x96xf32, #tpu.memory_space<vmem>>, %arg4: memref<32x32xf32, #tpu.memory_space<vmem>>, %arg5: memref<1x32xf32, #tpu.memory_space<vmem>>, %arg6: memref<32x32xf32, #tpu.memory_space<vmem>>, %arg7: memref<1x32xf32, #tpu.memory_space<vmem>>, %arg8: memref<32x32xf32, #tpu.memory_space<vmem>>, %arg9: memref<1x32xf32, #tpu.memory_space<vmem>>, %arg10: memref<6x32xf32, #tpu.memory_space<vmem>>, %arg11: memref<1x8x32xf32, #tpu.memory_space<vmem>>) attributes {dimension_semantics = [#tpu.dimension_semantics<parallel>], iteration_bounds = array<i64: 2>, scalar_prefetch = 0 : i64, scratch_operands = 0 : i64, tpu.core_type = #tpu.core_type<tc>, window_params = [{transform_indices = @transform_0, window_bounds = array<i64: 1, 8, 32>}, {pipeline_mode = #tpu.pipeline_mode<synchronous>, transform_indices = @transform_1, window_bounds = array<i64: 32, 96>}, {pipeline_mode = #tpu.pipeline_mode<synchronous>, transform_indices = @transform_2, window_bounds = array<i64: 1, 96>}, {pipeline_mode = #tpu.pipeline_mode<synchronous>, transform_indices = @transform_3, window_bounds = array<i64: 32, 32>}, {pipeline_mode = #tpu.pipeline_mode<synchronous>, transform_indices = @transform_4, window_bounds = array<i64: 1, 32>}, {pipeline_mode = #tpu.pipeline_mode<synchronous>, transform_indices = @transform_5, window_bounds = array<i64: 32, 32>}, {pipeline_mode = #tpu.pipeline_mode<synchronous>, transform_indices = @transform_6, window_bounds = array<i64: 1, 32>}, {pipeline_mode = #tpu.pipeline_mode<synchronous>, transform_indices = @transform_7, window_bounds = array<i64: 32, 32>}, {pipeline_mode = #tpu.pipeline_mode<synchronous>, transform_indices = @transform_8, window_bounds = array<i64: 1, 32>}, {pipeline_mode = #tpu.pipeline_mode<synchronous>, transform_indices = @transform_9, window_bounds = array<i64: 6, 32>}, {transform_indices = @transform_10, window_bounds = array<i64: 1, 8, 32>}]} {
    %c0 = arith.constant 0 : index
    %c0_0 = arith.constant 0 : index
    %c0_1 = arith.constant 0 : index
    %0 = vector.load %arg1[%c0, %c0_0, %c0_1] : memref<1x8x32xf32, #tpu.memory_space<vmem>>, vector<1x8x32xf32>
    %1 = vector.shape_cast %0 : vector<1x8x32xf32> to vector<8x32xf32>
    %c0_2 = arith.constant 0 : index
    %c0_3 = arith.constant 0 : index
    %2 = vector.load %arg2[%c0_2, %c0_3] : memref<32x96xf32, #tpu.memory_space<vmem>>, vector<32x96xf32>
    %3 = arith.truncf %1 : vector<8x32xf32> to vector<8x32xbf16>
    %4 = arith.truncf %2 : vector<32x96xf32> to vector<32x96xbf16>
    %cst = arith.constant dense<0.000000e+00> : vector<8x96xf32>
    %5 = tpu.matmul %3, %4, %cst {dimension_numbers = #tpu.dot_dimension_numbers<[1], [0], [0], [1], [0, 0, 1, 1], [], []>} : vector<8x32xbf16>, vector<32x96xbf16>, vector<8x96xf32> -> vector<8x96xf32>
    %c0_4 = arith.constant 0 : index
    %c0_5 = arith.constant 0 : index
    %6 = vector.load %arg3[%c0_4, %c0_5] : memref<1x96xf32, #tpu.memory_space<vmem>>, vector<1x96xf32>
    %7 = vector.broadcast %6 : vector<1x96xf32> to vector<8x96xf32>
    %8 = arith.addf %5, %7 : vector<8x96xf32>
    %9 = vector.extract_strided_slice %8 {offsets = [0, 0], sizes = [8, 32], strides = [1, 1]} : vector<8x96xf32> to vector<8x32xf32>
    %10 = vector.extract_strided_slice %8 {offsets = [0, 32], sizes = [8, 32], strides = [1, 1]} : vector<8x96xf32> to vector<8x32xf32>
    %11 = vector.extract_strided_slice %8 {offsets = [0, 64], sizes = [8, 32], strides = [1, 1]} : vector<8x96xf32> to vector<8x32xf32>
    %12 = vector.extract_strided_slice %9 {offsets = [0, 0], sizes = [8, 8], strides = [1, 1]} : vector<8x32xf32> to vector<8x8xf32>
    %13 = vector.extract_strided_slice %10 {offsets = [0, 0], sizes = [8, 8], strides = [1, 1]} : vector<8x32xf32> to vector<8x8xf32>
    %14 = vector.extract_strided_slice %11 {offsets = [0, 0], sizes = [8, 8], strides = [1, 1]} : vector<8x32xf32> to vector<8x8xf32>
    %15 = arith.truncf %12 : vector<8x8xf32> to vector<8x8xbf16>
    %16 = arith.truncf %13 : vector<8x8xf32> to vector<8x8xbf16>
    %cst_6 = arith.constant dense<0.000000e+00> : vector<8x8xf32>
    %17 = tpu.matmul %15, %16, %cst_6 {dimension_numbers = #tpu.dot_dimension_numbers<[1], [1], [0], [0], [0, 0, 1, 0], [], []>} : vector<8x8xbf16>, vector<8x8xbf16>, vector<8x8xf32> -> vector<8x8xf32>
    %cst_7 = arith.constant 0.353553385 : f32
    %18 = vector.broadcast %cst_7 : f32 to vector<8x8xf32>
    %19 = arith.mulf %17, %18 : vector<8x8xf32>
    %cst_8 = arith.constant dense<0xFF800000> : vector<8xf32>
    %20 = vector.multi_reduction <maximumf>, %19, %cst_8 [1] : vector<8x8xf32> to vector<8xf32>
    %21 = vector.shape_cast %20 : vector<8xf32> to vector<8x1xf32>
    %22 = vector.broadcast %21 : vector<8x1xf32> to vector<8x8xf32>
    %23 = arith.subf %19, %22 : vector<8x8xf32>
    %24 = math.exp %23 : vector<8x8xf32>
    %cst_9 = arith.constant dense<0.000000e+00> : vector<8xf32>
    %25 = vector.multi_reduction <add>, %24, %cst_9 [1] : vector<8x8xf32> to vector<8xf32>
    %26 = vector.shape_cast %25 : vector<8xf32> to vector<8x1xf32>
    %27 = tpu.reciprocal %26 {approx = true} : vector<8x1xf32> -> vector<8x1xf32>
    %28 = vector.broadcast %27 : vector<8x1xf32> to vector<8x8xf32>
    %29 = arith.mulf %24, %28 : vector<8x8xf32>
    %30 = arith.truncf %29 : vector<8x8xf32> to vector<8x8xbf16>
    %31 = arith.truncf %14 : vector<8x8xf32> to vector<8x8xbf16>
    %cst_10 = arith.constant dense<0.000000e+00> : vector<8x8xf32>
    %32 = tpu.matmul %30, %31, %cst_10 {dimension_numbers = #tpu.dot_dimension_numbers<[1], [0], [0], [1], [0, 0, 1, 1], [], []>} : vector<8x8xbf16>, vector<8x8xbf16>, vector<8x8xf32> -> vector<8x8xf32>
    %33 = vector.extract_strided_slice %9 {offsets = [0, 8], sizes = [8, 8], strides = [1, 1]} : vector<8x32xf32> to vector<8x8xf32>
    %34 = vector.extract_strided_slice %10 {offsets = [0, 8], sizes = [8, 8], strides = [1, 1]} : vector<8x32xf32> to vector<8x8xf32>
    %35 = vector.extract_strided_slice %11 {offsets = [0, 8], sizes = [8, 8], strides = [1, 1]} : vector<8x32xf32> to vector<8x8xf32>
    %36 = arith.truncf %33 : vector<8x8xf32> to vector<8x8xbf16>
    %37 = arith.truncf %34 : vector<8x8xf32> to vector<8x8xbf16>
    %cst_11 = arith.constant dense<0.000000e+00> : vector<8x8xf32>
    %38 = tpu.matmul %36, %37, %cst_11 {dimension_numbers = #tpu.dot_dimension_numbers<[1], [1], [0], [0], [0, 0, 1, 0], [], []>} : vector<8x8xbf16>, vector<8x8xbf16>, vector<8x8xf32> -> vector<8x8xf32>
    %cst_12 = arith.constant 0.353553385 : f32
    %39 = vector.broadcast %cst_12 : f32 to vector<8x8xf32>
    %40 = arith.mulf %38, %39 : vector<8x8xf32>
    %cst_13 = arith.constant dense<0xFF800000> : vector<8xf32>
    %41 = vector.multi_reduction <maximumf>, %40, %cst_13 [1] : vector<8x8xf32> to vector<8xf32>
    %42 = vector.shape_cast %41 : vector<8xf32> to vector<8x1xf32>
    %43 = vector.broadcast %42 : vector<8x1xf32> to vector<8x8xf32>
    %44 = arith.subf %40, %43 : vector<8x8xf32>
    %45 = math.exp %44 : vector<8x8xf32>
    %cst_14 = arith.constant dense<0.000000e+00> : vector<8xf32>
    %46 = vector.multi_reduction <add>, %45, %cst_14 [1] : vector<8x8xf32> to vector<8xf32>
    %47 = vector.shape_cast %46 : vector<8xf32> to vector<8x1xf32>
    %48 = tpu.reciprocal %47 {approx = true} : vector<8x1xf32> -> vector<8x1xf32>
    %49 = vector.broadcast %48 : vector<8x1xf32> to vector<8x8xf32>
    %50 = arith.mulf %45, %49 : vector<8x8xf32>
    %51 = arith.truncf %50 : vector<8x8xf32> to vector<8x8xbf16>
    %52 = arith.truncf %35 : vector<8x8xf32> to vector<8x8xbf16>
    %cst_15 = arith.constant dense<0.000000e+00> : vector<8x8xf32>
    %53 = tpu.matmul %51, %52, %cst_15 {dimension_numbers = #tpu.dot_dimension_numbers<[1], [0], [0], [1], [0, 0, 1, 1], [], []>} : vector<8x8xbf16>, vector<8x8xbf16>, vector<8x8xf32> -> vector<8x8xf32>
    %54 = vector.extract_strided_slice %9 {offsets = [0, 16], sizes = [8, 8], strides = [1, 1]} : vector<8x32xf32> to vector<8x8xf32>
    %55 = vector.extract_strided_slice %10 {offsets = [0, 16], sizes = [8, 8], strides = [1, 1]} : vector<8x32xf32> to vector<8x8xf32>
    %56 = vector.extract_strided_slice %11 {offsets = [0, 16], sizes = [8, 8], strides = [1, 1]} : vector<8x32xf32> to vector<8x8xf32>
    %57 = arith.truncf %54 : vector<8x8xf32> to vector<8x8xbf16>
    %58 = arith.truncf %55 : vector<8x8xf32> to vector<8x8xbf16>
    %cst_16 = arith.constant dense<0.000000e+00> : vector<8x8xf32>
    %59 = tpu.matmul %57, %58, %cst_16 {dimension_numbers = #tpu.dot_dimension_numbers<[1], [1], [0], [0], [0, 0, 1, 0], [], []>} : vector<8x8xbf16>, vector<8x8xbf16>, vector<8x8xf32> -> vector<8x8xf32>
    %cst_17 = arith.constant 0.353553385 : f32
    %60 = vector.broadcast %cst_17 : f32 to vector<8x8xf32>
    %61 = arith.mulf %59, %60 : vector<8x8xf32>
    %cst_18 = arith.constant dense<0xFF800000> : vector<8xf32>
    %62 = vector.multi_reduction <maximumf>, %61, %cst_18 [1] : vector<8x8xf32> to vector<8xf32>
    %63 = vector.shape_cast %62 : vector<8xf32> to vector<8x1xf32>
    %64 = vector.broadcast %63 : vector<8x1xf32> to vector<8x8xf32>
    %65 = arith.subf %61, %64 : vector<8x8xf32>
    %66 = math.exp %65 : vector<8x8xf32>
    %cst_19 = arith.constant dense<0.000000e+00> : vector<8xf32>
    %67 = vector.multi_reduction <add>, %66, %cst_19 [1] : vector<8x8xf32> to vector<8xf32>
    %68 = vector.shape_cast %67 : vector<8xf32> to vector<8x1xf32>
    %69 = tpu.reciprocal %68 {approx = true} : vector<8x1xf32> -> vector<8x1xf32>
    %70 = vector.broadcast %69 : vector<8x1xf32> to vector<8x8xf32>
    %71 = arith.mulf %66, %70 : vector<8x8xf32>
    %72 = arith.truncf %71 : vector<8x8xf32> to vector<8x8xbf16>
    %73 = arith.truncf %56 : vector<8x8xf32> to vector<8x8xbf16>
    %cst_20 = arith.constant dense<0.000000e+00> : vector<8x8xf32>
    %74 = tpu.matmul %72, %73, %cst_20 {dimension_numbers = #tpu.dot_dimension_numbers<[1], [0], [0], [1], [0, 0, 1, 1], [], []>} : vector<8x8xbf16>, vector<8x8xbf16>, vector<8x8xf32> -> vector<8x8xf32>
    %75 = vector.extract_strided_slice %9 {offsets = [0, 24], sizes = [8, 8], strides = [1, 1]} : vector<8x32xf32> to vector<8x8xf32>
    %76 = vector.extract_strided_slice %10 {offsets = [0, 24], sizes = [8, 8], strides = [1, 1]} : vector<8x32xf32> to vector<8x8xf32>
    %77 = vector.extract_strided_slice %11 {offsets = [0, 24], sizes = [8, 8], strides = [1, 1]} : vector<8x32xf32> to vector<8x8xf32>
    %78 = arith.truncf %75 : vector<8x8xf32> to vector<8x8xbf16>
    %79 = arith.truncf %76 : vector<8x8xf32> to vector<8x8xbf16>
    %cst_21 = arith.constant dense<0.000000e+00> : vector<8x8xf32>
    %80 = tpu.matmul %78, %79, %cst_21 {dimension_numbers = #tpu.dot_dimension_numbers<[1], [1], [0], [0], [0, 0, 1, 0], [], []>} : vector<8x8xbf16>, vector<8x8xbf16>, vector<8x8xf32> -> vector<8x8xf32>
    %cst_22 = arith.constant 0.353553385 : f32
    %81 = vector.broadcast %cst_22 : f32 to vector<8x8xf32>
    %82 = arith.mulf %80, %81 : vector<8x8xf32>
    %cst_23 = arith.constant dense<0xFF800000> : vector<8xf32>
    %83 = vector.multi_reduction <maximumf>, %82, %cst_23 [1] : vector<8x8xf32> to vector<8xf32>
    %84 = vector.shape_cast %83 : vector<8xf32> to vector<8x1xf32>
    %85 = vector.broadcast %84 : vector<8x1xf32> to vector<8x8xf32>
    %86 = arith.subf %82, %85 : vector<8x8xf32>
    %87 = math.exp %86 : vector<8x8xf32>
    %cst_24 = arith.constant dense<0.000000e+00> : vector<8xf32>
    %88 = vector.multi_reduction <add>, %87, %cst_24 [1] : vector<8x8xf32> to vector<8xf32>
    %89 = vector.shape_cast %88 : vector<8xf32> to vector<8x1xf32>
    %90 = tpu.reciprocal %89 {approx = true} : vector<8x1xf32> -> vector<8x1xf32>
    %91 = vector.broadcast %90 : vector<8x1xf32> to vector<8x8xf32>
    %92 = arith.mulf %87, %91 : vector<8x8xf32>
    %93 = arith.truncf %92 : vector<8x8xf32> to vector<8x8xbf16>
    %94 = arith.truncf %77 : vector<8x8xf32> to vector<8x8xbf16>
    %cst_25 = arith.constant dense<0.000000e+00> : vector<8x8xf32>
    %95 = tpu.matmul %93, %94, %cst_25 {dimension_numbers = #tpu.dot_dimension_numbers<[1], [0], [0], [1], [0, 0, 1, 1], [], []>} : vector<8x8xbf16>, vector<8x8xbf16>, vector<8x8xf32> -> vector<8x8xf32>
    %96 = tpu.concatenate %32, %53, %74, %95 in 1 : vector<8x8xf32>, vector<8x8xf32>, vector<8x8xf32>, vector<8x8xf32> -> vector<8x32xf32>
    %c0_26 = arith.constant 0 : index
    %c0_27 = arith.constant 0 : index
    %97 = vector.load %arg4[%c0_26, %c0_27] : memref<32x32xf32, #tpu.memory_space<vmem>>, vector<32x32xf32>
    %98 = arith.truncf %96 : vector<8x32xf32> to vector<8x32xbf16>
    %99 = arith.truncf %97 : vector<32x32xf32> to vector<32x32xbf16>
    %cst_28 = arith.constant dense<0.000000e+00> : vector<8x32xf32>
    %100 = tpu.matmul %98, %99, %cst_28 {dimension_numbers = #tpu.dot_dimension_numbers<[1], [0], [0], [1], [0, 0, 1, 1], [], []>} : vector<8x32xbf16>, vector<32x32xbf16>, vector<8x32xf32> -> vector<8x32xf32>
    %101 = arith.addf %1, %100 : vector<8x32xf32>
    %c0_29 = arith.constant 0 : index
    %c0_30 = arith.constant 0 : index
    %102 = vector.load %arg5[%c0_29, %c0_30] : memref<1x32xf32, #tpu.memory_space<vmem>>, vector<1x32xf32>
    %103 = vector.broadcast %102 : vector<1x32xf32> to vector<8x32xf32>
    %104 = arith.addf %101, %103 : vector<8x32xf32>
    %c0_31 = arith.constant 0 : index
    %c0_32 = arith.constant 0 : index
    %105 = vector.load %arg10[%c0_31, %c0_32] : memref<6x32xf32, #tpu.memory_space<vmem>>, vector<1x32xf32>
    %c1 = arith.constant 1 : index
    %c0_33 = arith.constant 0 : index
    %106 = vector.load %arg10[%c1, %c0_33] : memref<6x32xf32, #tpu.memory_space<vmem>>, vector<1x32xf32>
    %cst_34 = arith.constant dense<0.000000e+00> : vector<8xf32>
    %107 = vector.multi_reduction <add>, %104, %cst_34 [1] : vector<8x32xf32> to vector<8xf32>
    %108 = vector.shape_cast %107 : vector<8xf32> to vector<8x1xf32>
    %cst_35 = arith.constant 3.200000e+01 : f32
    %109 = vector.broadcast %cst_35 : f32 to vector<8x1xf32>
    %110 = arith.divf %108, %109 : vector<8x1xf32>
    %111 = vector.broadcast %110 : vector<8x1xf32> to vector<8x32xf32>
    %112 = arith.subf %104, %111 : vector<8x32xf32>
    %113 = arith.mulf %112, %112 : vector<8x32xf32>
    %cst_36 = arith.constant dense<0.000000e+00> : vector<8xf32>
    %114 = vector.multi_reduction <add>, %113, %cst_36 [1] : vector<8x32xf32> to vector<8xf32>
    %115 = vector.shape_cast %114 : vector<8xf32> to vector<8x1xf32>
    %cst_37 = arith.constant 3.200000e+01 : f32
    %116 = vector.broadcast %cst_37 : f32 to vector<8x1xf32>
    %117 = arith.divf %115, %116 : vector<8x1xf32>
    %118 = vector.broadcast %110 : vector<8x1xf32> to vector<8x32xf32>
    %119 = arith.subf %104, %118 : vector<8x32xf32>
    %cst_38 = arith.constant 9.99999974E-6 : f32
    %120 = vector.broadcast %cst_38 : f32 to vector<8x1xf32>
    %121 = arith.addf %117, %120 : vector<8x1xf32>
    %122 = math.rsqrt %121 : vector<8x1xf32>
    %123 = vector.broadcast %122 : vector<8x1xf32> to vector<8x32xf32>
    %124 = arith.mulf %119, %123 : vector<8x32xf32>
    %125 = vector.broadcast %105 : vector<1x32xf32> to vector<8x32xf32>
    %126 = arith.mulf %124, %125 : vector<8x32xf32>
    %127 = vector.broadcast %106 : vector<1x32xf32> to vector<8x32xf32>
    %128 = arith.addf %126, %127 : vector<8x32xf32>
    %c0_39 = arith.constant 0 : index
    %c0_40 = arith.constant 0 : index
    %129 = vector.load %arg6[%c0_39, %c0_40] : memref<32x32xf32, #tpu.memory_space<vmem>>, vector<32x32xf32>
    %130 = arith.truncf %128 : vector<8x32xf32> to vector<8x32xbf16>
    %131 = arith.truncf %129 : vector<32x32xf32> to vector<32x32xbf16>
    %cst_41 = arith.constant dense<0.000000e+00> : vector<8x32xf32>
    %132 = tpu.matmul %130, %131, %cst_41 {dimension_numbers = #tpu.dot_dimension_numbers<[1], [0], [0], [1], [0, 0, 1, 1], [], []>} : vector<8x32xbf16>, vector<32x32xbf16>, vector<8x32xf32> -> vector<8x32xf32>
    %c0_42 = arith.constant 0 : index
    %c0_43 = arith.constant 0 : index
    %133 = vector.load %arg7[%c0_42, %c0_43] : memref<1x32xf32, #tpu.memory_space<vmem>>, vector<1x32xf32>
    %134 = vector.broadcast %133 : vector<1x32xf32> to vector<8x32xf32>
    %135 = arith.addf %132, %134 : vector<8x32xf32>
    %136 = arith.mulf %135, %135 : vector<8x32xf32>
    %137 = arith.mulf %135, %136 : vector<8x32xf32>
    %cst_44 = arith.constant 4.471500e-02 : f32
    %138 = vector.broadcast %cst_44 : f32 to vector<8x32xf32>
    %139 = arith.mulf %138, %137 : vector<8x32xf32>
    %140 = arith.addf %135, %139 : vector<8x32xf32>
    %cst_45 = arith.constant 0.797884583 : f32
    %141 = vector.broadcast %cst_45 : f32 to vector<8x32xf32>
    %142 = arith.mulf %141, %140 : vector<8x32xf32>
    %143 = math.tanh %142 : vector<8x32xf32>
    %cst_46 = arith.constant 1.000000e+00 : f32
    %144 = vector.broadcast %cst_46 : f32 to vector<8x32xf32>
    %145 = arith.addf %144, %143 : vector<8x32xf32>
    %cst_47 = arith.constant 5.000000e-01 : f32
    %146 = vector.broadcast %cst_47 : f32 to vector<8x32xf32>
    %147 = arith.mulf %146, %145 : vector<8x32xf32>
    %148 = arith.mulf %135, %147 : vector<8x32xf32>
    %c0_48 = arith.constant 0 : index
    %c0_49 = arith.constant 0 : index
    %149 = vector.load %arg8[%c0_48, %c0_49] : memref<32x32xf32, #tpu.memory_space<vmem>>, vector<32x32xf32>
    %150 = arith.truncf %148 : vector<8x32xf32> to vector<8x32xbf16>
    %151 = arith.truncf %149 : vector<32x32xf32> to vector<32x32xbf16>
    %cst_50 = arith.constant dense<0.000000e+00> : vector<8x32xf32>
    %152 = tpu.matmul %150, %151, %cst_50 {dimension_numbers = #tpu.dot_dimension_numbers<[1], [0], [0], [1], [0, 0, 1, 1], [], []>} : vector<8x32xbf16>, vector<32x32xbf16>, vector<8x32xf32> -> vector<8x32xf32>
    %c0_51 = arith.constant 0 : index
    %c0_52 = arith.constant 0 : index
    %153 = vector.load %arg9[%c0_51, %c0_52] : memref<1x32xf32, #tpu.memory_space<vmem>>, vector<1x32xf32>
    %154 = vector.broadcast %153 : vector<1x32xf32> to vector<8x32xf32>
    %155 = arith.addf %152, %154 : vector<8x32xf32>
    %156 = arith.addf %128, %155 : vector<8x32xf32>
    %c2 = arith.constant 2 : index
    %c0_53 = arith.constant 0 : index
    %157 = vector.load %arg10[%c2, %c0_53] : memref<6x32xf32, #tpu.memory_space<vmem>>, vector<1x32xf32>
    %c3 = arith.constant 3 : index
    %c0_54 = arith.constant 0 : index
    %158 = vector.load %arg10[%c3, %c0_54] : memref<6x32xf32, #tpu.memory_space<vmem>>, vector<1x32xf32>
    %cst_55 = arith.constant dense<0.000000e+00> : vector<8xf32>
    %159 = vector.multi_reduction <add>, %156, %cst_55 [1] : vector<8x32xf32> to vector<8xf32>
    %160 = vector.shape_cast %159 : vector<8xf32> to vector<8x1xf32>
    %cst_56 = arith.constant 3.200000e+01 : f32
    %161 = vector.broadcast %cst_56 : f32 to vector<8x1xf32>
    %162 = arith.divf %160, %161 : vector<8x1xf32>
    %163 = vector.broadcast %162 : vector<8x1xf32> to vector<8x32xf32>
    %164 = arith.subf %156, %163 : vector<8x32xf32>
    %165 = arith.mulf %164, %164 : vector<8x32xf32>
    %cst_57 = arith.constant dense<0.000000e+00> : vector<8xf32>
    %166 = vector.multi_reduction <add>, %165, %cst_57 [1] : vector<8x32xf32> to vector<8xf32>
    %167 = vector.shape_cast %166 : vector<8xf32> to vector<8x1xf32>
    %cst_58 = arith.constant 3.200000e+01 : f32
    %168 = vector.broadcast %cst_58 : f32 to vector<8x1xf32>
    %169 = arith.divf %167, %168 : vector<8x1xf32>
    %170 = vector.broadcast %162 : vector<8x1xf32> to vector<8x32xf32>
    %171 = arith.subf %156, %170 : vector<8x32xf32>
    %cst_59 = arith.constant 9.99999974E-6 : f32
    %172 = vector.broadcast %cst_59 : f32 to vector<8x1xf32>
    %173 = arith.addf %169, %172 : vector<8x1xf32>
    %174 = math.rsqrt %173 : vector<8x1xf32>
    %175 = vector.broadcast %174 : vector<8x1xf32> to vector<8x32xf32>
    %176 = arith.mulf %171, %175 : vector<8x32xf32>
    %177 = vector.broadcast %157 : vector<1x32xf32> to vector<8x32xf32>
    %178 = arith.mulf %176, %177 : vector<8x32xf32>
    %179 = vector.broadcast %158 : vector<1x32xf32> to vector<8x32xf32>
    %180 = arith.addf %178, %179 : vector<8x32xf32>
    %c4 = arith.constant 4 : index
    %c0_60 = arith.constant 0 : index
    %181 = vector.load %arg10[%c4, %c0_60] : memref<6x32xf32, #tpu.memory_space<vmem>>, vector<1x32xf32>
    %c5 = arith.constant 5 : index
    %c0_61 = arith.constant 0 : index
    %182 = vector.load %arg10[%c5, %c0_61] : memref<6x32xf32, #tpu.memory_space<vmem>>, vector<1x32xf32>
    %cst_62 = arith.constant dense<0.000000e+00> : vector<8xf32>
    %183 = vector.multi_reduction <add>, %180, %cst_62 [1] : vector<8x32xf32> to vector<8xf32>
    %184 = vector.shape_cast %183 : vector<8xf32> to vector<8x1xf32>
    %cst_63 = arith.constant 3.200000e+01 : f32
    %185 = vector.broadcast %cst_63 : f32 to vector<8x1xf32>
    %186 = arith.divf %184, %185 : vector<8x1xf32>
    %187 = vector.broadcast %186 : vector<8x1xf32> to vector<8x32xf32>
    %188 = arith.subf %180, %187 : vector<8x32xf32>
    %189 = arith.mulf %188, %188 : vector<8x32xf32>
    %cst_64 = arith.constant dense<0.000000e+00> : vector<8xf32>
    %190 = vector.multi_reduction <add>, %189, %cst_64 [1] : vector<8x32xf32> to vector<8xf32>
    %191 = vector.shape_cast %190 : vector<8xf32> to vector<8x1xf32>
    %cst_65 = arith.constant 3.200000e+01 : f32
    %192 = vector.broadcast %cst_65 : f32 to vector<8x1xf32>
    %193 = arith.divf %191, %192 : vector<8x1xf32>
    %194 = vector.broadcast %186 : vector<8x1xf32> to vector<8x32xf32>
    %195 = arith.subf %180, %194 : vector<8x32xf32>
    %cst_66 = arith.constant 9.99999974E-6 : f32
    %196 = vector.broadcast %cst_66 : f32 to vector<8x1xf32>
    %197 = arith.addf %193, %196 : vector<8x1xf32>
    %198 = math.rsqrt %197 : vector<8x1xf32>
    %199 = vector.broadcast %198 : vector<8x1xf32> to vector<8x32xf32>
    %200 = arith.mulf %195, %199 : vector<8x32xf32>
    %201 = vector.broadcast %181 : vector<1x32xf32> to vector<8x32xf32>
    %202 = arith.mulf %200, %201 : vector<8x32xf32>
    %203 = vector.broadcast %182 : vector<1x32xf32> to vector<8x32xf32>
    %204 = arith.addf %202, %203 : vector<8x32xf32>
    %c0_67 = arith.constant 0 : index
    %c0_68 = arith.constant 0 : index
    %c0_69 = arith.constant 0 : index
    %205 = vector.load %arg11[%c0_67, %c0_68, %c0_69] : memref<1x8x32xf32, #tpu.memory_space<vmem>>, vector<1x8x32xf32>
    %206 = vector.shape_cast %205 : vector<1x8x32xf32> to vector<8x32xf32>
    %207 = vector.shape_cast %204 : vector<8x32xf32> to vector<1x8x32xf32>
    tpu.vector_store %arg11[%c0_67, %c0_68, %c0_69], %207 {strides = array<i32>} : memref<1x8x32xf32, #tpu.memory_space<vmem>>, vector<1x8x32xf32>,
    return
  }
  func.func @transform_0(%arg0: i32) -> (i32, i32, i32) {
    %c0_i32 = arith.constant 0 : i32
    %c0_i32_0 = arith.constant 0 : i32
    %c0_i32_1 = arith.constant 0 : i32
    return %arg0, %c0_i32, %c0_i32_0 : i32, i32, i32
  }
  func.func @transform_1(%arg0: i32) -> (i32, i32) {
    %c0_i32 = arith.constant 0 : i32
    %c0_i32_0 = arith.constant 0 : i32
    %c0_i32_1 = arith.constant 0 : i32
    return %c0_i32, %c0_i32_0 : i32, i32
  }
  func.func @transform_2(%arg0: i32) -> (i32, i32) {
    %c0_i32 = arith.constant 0 : i32
    %c0_i32_0 = arith.constant 0 : i32
    %c0_i32_1 = arith.constant 0 : i32
    return %c0_i32, %c0_i32_0 : i32, i32
  }
  func.func @transform_3(%arg0: i32) -> (i32, i32) {
    %c0_i32 = arith.constant 0 : i32
    %c0_i32_0 = arith.constant 0 : i32
    %c0_i32_1 = arith.constant 0 : i32
    return %c0_i32, %c0_i32_0 : i32, i32
  }
  func.func @transform_4(%arg0: i32) -> (i32, i32) {
    %c0_i32 = arith.constant 0 : i32
    %c0_i32_0 = arith.constant 0 : i32
    %c0_i32_1 = arith.constant 0 : i32
    return %c0_i32, %c0_i32_0 : i32, i32
  }
  func.func @transform_5(%arg0: i32) -> (i32, i32) {
    %c0_i32 = arith.constant 0 : i32
    %c0_i32_0 = arith.constant 0 : i32
    %c0_i32_1 = arith.constant 0 : i32
    return %c0_i32, %c0_i32_0 : i32, i32
  }
  func.func @transform_6(%arg0: i32) -> (i32, i32) {
    %c0_i32 = arith.constant 0 : i32
    %c0_i32_0 = arith.constant 0 : i32
    %c0_i32_1 = arith.constant 0 : i32
    return %c0_i32, %c0_i32_0 : i32, i32
  }
  func.func @transform_7(%arg0: i32) -> (i32, i32) {
    %c0_i32 = arith.constant 0 : i32
    %c0_i32_0 = arith.constant 0 : i32
    %c0_i32_1 = arith.constant 0 : i32
    return %c0_i32, %c0_i32_0 : i32, i32
  }
  func.func @transform_8(%arg0: i32) -> (i32, i32) {
    %c0_i32 = arith.constant 0 : i32
    %c0_i32_0 = arith.constant 0 : i32
    %c0_i32_1 = arith.constant 0 : i32
    return %c0_i32, %c0_i32_0 : i32, i32
  }
  func.func @transform_9(%arg0: i32) -> (i32, i32) {
    %c0_i32 = arith.constant 0 : i32
    %c0_i32_0 = arith.constant 0 : i32
    %c0_i32_1 = arith.constant 0 : i32
    return %c0_i32, %c0_i32_0 : i32, i32
  }
  func.func @transform_10(%arg0: i32) -> (i32, i32, i32) {
    %c0_i32 = arith.constant 0 : i32
    %c0_i32_0 = arith.constant 0 : i32
    %c0_i32_1 = arith.constant 0 : i32
    return %arg0, %c0_i32, %c0_i32_0 : i32, i32, i32
  }
}

module attributes {stable_mosaic.version = 11 : i64} {
  func.func @_norm_proj_kernel(%arg0: i32, %arg1: memref<24x32xf32, #tpu.memory_space<vmem>>, %arg2: memref<1x32xf32, #tpu.memory_space<vmem>>, %arg3: memref<1x32xf32, #tpu.memory_space<vmem>>, %arg4: memref<32x4xf32, #tpu.memory_space<vmem>>, %arg5: memref<1x4xf32, #tpu.memory_space<vmem>>, %arg6: memref<24x4xf32, #tpu.memory_space<vmem>>) attributes {dimension_semantics = [#tpu.dimension_semantics<arbitrary>], iteration_bounds = array<i64: 1>, scalar_prefetch = 0 : i64, scratch_operands = 0 : i64, tpu.core_type = #tpu.core_type<tc>, window_params = [{pipeline_mode = #tpu.pipeline_mode<synchronous>, transform_indices = @transform_0, window_bounds = array<i64: 24, 32>}, {pipeline_mode = #tpu.pipeline_mode<synchronous>, transform_indices = @transform_1, window_bounds = array<i64: 1, 32>}, {pipeline_mode = #tpu.pipeline_mode<synchronous>, transform_indices = @transform_2, window_bounds = array<i64: 1, 32>}, {pipeline_mode = #tpu.pipeline_mode<synchronous>, transform_indices = @transform_3, window_bounds = array<i64: 32, 4>}, {pipeline_mode = #tpu.pipeline_mode<synchronous>, transform_indices = @transform_4, window_bounds = array<i64: 1, 4>}, {pipeline_mode = #tpu.pipeline_mode<synchronous>, transform_indices = @transform_5, window_bounds = array<i64: 24, 4>}]} {
    %c0 = arith.constant 0 : index
    %c0_0 = arith.constant 0 : index
    %0 = vector.load %arg1[%c0, %c0_0] : memref<24x32xf32, #tpu.memory_space<vmem>>, vector<24x32xf32>
    %c0_1 = arith.constant 0 : index
    %c0_2 = arith.constant 0 : index
    %1 = vector.load %arg2[%c0_1, %c0_2] : memref<1x32xf32, #tpu.memory_space<vmem>>, vector<1x32xf32>
    %c0_3 = arith.constant 0 : index
    %c0_4 = arith.constant 0 : index
    %2 = vector.load %arg3[%c0_3, %c0_4] : memref<1x32xf32, #tpu.memory_space<vmem>>, vector<1x32xf32>
    %cst = arith.constant dense<0.000000e+00> : vector<24xf32>
    %3 = vector.multi_reduction <add>, %0, %cst [1] : vector<24x32xf32> to vector<24xf32>
    %4 = vector.shape_cast %3 : vector<24xf32> to vector<24x1xf32>
    %cst_5 = arith.constant 3.200000e+01 : f32
    %5 = vector.broadcast %cst_5 : f32 to vector<24x1xf32>
    %6 = arith.divf %4, %5 : vector<24x1xf32>
    %7 = vector.broadcast %6 : vector<24x1xf32> to vector<24x32xf32>
    %8 = arith.subf %0, %7 : vector<24x32xf32>
    %9 = arith.mulf %8, %8 : vector<24x32xf32>
    %cst_6 = arith.constant dense<0.000000e+00> : vector<24xf32>
    %10 = vector.multi_reduction <add>, %9, %cst_6 [1] : vector<24x32xf32> to vector<24xf32>
    %11 = vector.shape_cast %10 : vector<24xf32> to vector<24x1xf32>
    %cst_7 = arith.constant 3.200000e+01 : f32
    %12 = vector.broadcast %cst_7 : f32 to vector<24x1xf32>
    %13 = arith.divf %11, %12 : vector<24x1xf32>
    %14 = vector.broadcast %6 : vector<24x1xf32> to vector<24x32xf32>
    %15 = arith.subf %0, %14 : vector<24x32xf32>
    %cst_8 = arith.constant 9.99999974E-6 : f32
    %16 = vector.broadcast %cst_8 : f32 to vector<24x1xf32>
    %17 = arith.addf %13, %16 : vector<24x1xf32>
    %18 = math.rsqrt %17 : vector<24x1xf32>
    %19 = vector.broadcast %18 : vector<24x1xf32> to vector<24x32xf32>
    %20 = arith.mulf %15, %19 : vector<24x32xf32>
    %21 = vector.broadcast %1 : vector<1x32xf32> to vector<24x32xf32>
    %22 = arith.mulf %20, %21 : vector<24x32xf32>
    %23 = vector.broadcast %2 : vector<1x32xf32> to vector<24x32xf32>
    %24 = arith.addf %22, %23 : vector<24x32xf32>
    %c0_9 = arith.constant 0 : index
    %c0_10 = arith.constant 0 : index
    %25 = vector.load %arg4[%c0_9, %c0_10] : memref<32x4xf32, #tpu.memory_space<vmem>>, vector<32x4xf32>
    %26 = arith.truncf %24 : vector<24x32xf32> to vector<24x32xbf16>
    %27 = arith.truncf %25 : vector<32x4xf32> to vector<32x4xbf16>
    %cst_11 = arith.constant dense<0.000000e+00> : vector<24x4xf32>
    %28 = tpu.matmul %26, %27, %cst_11 {dimension_numbers = #tpu.dot_dimension_numbers<[1], [0], [0], [1], [0, 0, 1, 1], [], []>} : vector<24x32xbf16>, vector<32x4xbf16>, vector<24x4xf32> -> vector<24x4xf32>
    %c0_12 = arith.constant 0 : index
    %c0_13 = arith.constant 0 : index
    %29 = vector.load %arg5[%c0_12, %c0_13] : memref<1x4xf32, #tpu.memory_space<vmem>>, vector<1x4xf32>
    %30 = vector.broadcast %29 : vector<1x4xf32> to vector<24x4xf32>
    %31 = arith.addf %28, %30 : vector<24x4xf32>
    %c0_14 = arith.constant 0 : index
    %c0_15 = arith.constant 0 : index
    %32 = vector.load %arg6[%c0_14, %c0_15] : memref<24x4xf32, #tpu.memory_space<vmem>>, vector<24x4xf32>
    tpu.vector_store %arg6[%c0_14, %c0_15], %31 {strides = array<i32>} : memref<24x4xf32, #tpu.memory_space<vmem>>, vector<24x4xf32>,
    return
  }
  func.func @transform_0(%arg0: i32) -> (i32, i32) {
    %c0_i32 = arith.constant 0 : i32
    %c0_i32_0 = arith.constant 0 : i32
    %c0_i32_1 = arith.constant 0 : i32
    return %c0_i32, %c0_i32_0 : i32, i32
  }
  func.func @transform_1(%arg0: i32) -> (i32, i32) {
    %c0_i32 = arith.constant 0 : i32
    %c0_i32_0 = arith.constant 0 : i32
    %c0_i32_1 = arith.constant 0 : i32
    return %c0_i32, %c0_i32_0 : i32, i32
  }
  func.func @transform_2(%arg0: i32) -> (i32, i32) {
    %c0_i32 = arith.constant 0 : i32
    %c0_i32_0 = arith.constant 0 : i32
    %c0_i32_1 = arith.constant 0 : i32
    return %c0_i32, %c0_i32_0 : i32, i32
  }
  func.func @transform_3(%arg0: i32) -> (i32, i32) {
    %c0_i32 = arith.constant 0 : i32
    %c0_i32_0 = arith.constant 0 : i32
    %c0_i32_1 = arith.constant 0 : i32
    return %c0_i32, %c0_i32_0 : i32, i32
  }
  func.func @transform_4(%arg0: i32) -> (i32, i32) {
    %c0_i32 = arith.constant 0 : i32
    %c0_i32_0 = arith.constant 0 : i32
    %c0_i32_1 = arith.constant 0 : i32
    return %c0_i32, %c0_i32_0 : i32, i32
  }
  func.func @transform_5(%arg0: i32) -> (i32, i32) {
    %c0_i32 = arith.constant 0 : i32
    %c0_i32_0 = arith.constant 0 : i32
    %c0_i32_1 = arith.constant 0 : i32
    return %c0_i32, %c0_i32_0 : i32, i32
  }
}

module attributes {stable_mosaic.version = 11 : i64} {
  func.func @_embedding_kernel(%arg0: i32, %arg1: memref<1x12x4xf32, #tpu.memory_space<vmem>>, %arg2: memref<1x12x32xf32, #tpu.memory_space<vmem>>, %arg3: memref<4x32xf32, #tpu.memory_space<vmem>>, %arg4: memref<4x32xf32, #tpu.memory_space<vmem>>, %arg5: memref<4x32xf32, #tpu.memory_space<vmem>>, %arg6: memref<1x12x32xf32, #tpu.memory_space<vmem>>) attributes {dimension_semantics = [#tpu.dimension_semantics<parallel>], iteration_bounds = array<i64: 2>, scalar_prefetch = 0 : i64, scratch_operands = 0 : i64, tpu.core_type = #tpu.core_type<tc>, window_params = [{transform_indices = @transform_0, window_bounds = array<i64: 1, 12, 4>}, {transform_indices = @transform_1, window_bounds = array<i64: 1, 12, 32>}, {pipeline_mode = #tpu.pipeline_mode<synchronous>, transform_indices = @transform_2, window_bounds = array<i64: 4, 32>}, {pipeline_mode = #tpu.pipeline_mode<synchronous>, transform_indices = @transform_3, window_bounds = array<i64: 4, 32>}, {pipeline_mode = #tpu.pipeline_mode<synchronous>, transform_indices = @transform_4, window_bounds = array<i64: 4, 32>}, {transform_indices = @transform_5, window_bounds = array<i64: 1, 12, 32>}]} {
    %c0 = arith.constant 0 : index
    %c0_0 = arith.constant 0 : index
    %c0_1 = arith.constant 0 : index
    %0 = vector.load %arg1[%c0, %c0_0, %c0_1] : memref<1x12x4xf32, #tpu.memory_space<vmem>>, vector<1x12x4xf32>
    %1 = vector.shape_cast %0 : vector<1x12x4xf32> to vector<12x4xf32>
    %2 = vector.extract_strided_slice %1 {offsets = [11, 0], sizes = [1, 4], strides = [1, 1]} : vector<12x4xf32> to vector<1x4xf32>
    %3 = vector.extract_strided_slice %1 {offsets = [0, 0], sizes = [11, 4], strides = [1, 1]} : vector<12x4xf32> to vector<11x4xf32>
    %4 = tpu.concatenate %2, %3 in 0 : vector<1x4xf32>, vector<11x4xf32> -> vector<12x4xf32>
    %5 = vector.extract_strided_slice %1 {offsets = [1, 0], sizes = [11, 4], strides = [1, 1]} : vector<12x4xf32> to vector<11x4xf32>
    %6 = vector.extract_strided_slice %1 {offsets = [0, 0], sizes = [1, 4], strides = [1, 1]} : vector<12x4xf32> to vector<1x4xf32>
    %7 = tpu.concatenate %5, %6 in 0 : vector<11x4xf32>, vector<1x4xf32> -> vector<12x4xf32>
    %c0_2 = arith.constant 0 : index
    %c0_3 = arith.constant 0 : index
    %8 = vector.load %arg3[%c0_2, %c0_3] : memref<4x32xf32, #tpu.memory_space<vmem>>, vector<4x32xf32>
    %9 = arith.truncf %4 : vector<12x4xf32> to vector<12x4xbf16>
    %10 = arith.truncf %8 : vector<4x32xf32> to vector<4x32xbf16>
    %cst = arith.constant dense<0.000000e+00> : vector<12x32xf32>
    %11 = tpu.matmul %9, %10, %cst {dimension_numbers = #tpu.dot_dimension_numbers<[1], [0], [0], [1], [0, 0, 1, 1], [], []>} : vector<12x4xbf16>, vector<4x32xbf16>, vector<12x32xf32> -> vector<12x32xf32>
    %c0_4 = arith.constant 0 : index
    %c0_5 = arith.constant 0 : index
    %12 = vector.load %arg4[%c0_4, %c0_5] : memref<4x32xf32, #tpu.memory_space<vmem>>, vector<4x32xf32>
    %13 = arith.truncf %1 : vector<12x4xf32> to vector<12x4xbf16>
    %14 = arith.truncf %12 : vector<4x32xf32> to vector<4x32xbf16>
    %cst_6 = arith.constant dense<0.000000e+00> : vector<12x32xf32>
    %15 = tpu.matmul %13, %14, %cst_6 {dimension_numbers = #tpu.dot_dimension_numbers<[1], [0], [0], [1], [0, 0, 1, 1], [], []>} : vector<12x4xbf16>, vector<4x32xbf16>, vector<12x32xf32> -> vector<12x32xf32>
    %16 = arith.addf %11, %15 : vector<12x32xf32>
    %c0_7 = arith.constant 0 : index
    %c0_8 = arith.constant 0 : index
    %17 = vector.load %arg5[%c0_7, %c0_8] : memref<4x32xf32, #tpu.memory_space<vmem>>, vector<4x32xf32>
    %18 = arith.truncf %7 : vector<12x4xf32> to vector<12x4xbf16>
    %19 = arith.truncf %17 : vector<4x32xf32> to vector<4x32xbf16>
    %cst_9 = arith.constant dense<0.000000e+00> : vector<12x32xf32>
    %20 = tpu.matmul %18, %19, %cst_9 {dimension_numbers = #tpu.dot_dimension_numbers<[1], [0], [0], [1], [0, 0, 1, 1], [], []>} : vector<12x4xbf16>, vector<4x32xbf16>, vector<12x32xf32> -> vector<12x32xf32>
    %21 = arith.addf %16, %20 : vector<12x32xf32>
    %c0_10 = arith.constant 0 : index
    %c0_11 = arith.constant 0 : index
    %c0_12 = arith.constant 0 : index
    %22 = vector.load %arg2[%c0_10, %c0_11, %c0_12] : memref<1x12x32xf32, #tpu.memory_space<vmem>>, vector<1x12x32xf32>
    %23 = vector.shape_cast %22 : vector<1x12x32xf32> to vector<12x32xf32>
    %24 = arith.addf %21, %23 : vector<12x32xf32>
    %c0_13 = arith.constant 0 : index
    %c0_14 = arith.constant 0 : index
    %c0_15 = arith.constant 0 : index
    %25 = vector.load %arg6[%c0_13, %c0_14, %c0_15] : memref<1x12x32xf32, #tpu.memory_space<vmem>>, vector<1x12x32xf32>
    %26 = vector.shape_cast %25 : vector<1x12x32xf32> to vector<12x32xf32>
    %27 = vector.shape_cast %24 : vector<12x32xf32> to vector<1x12x32xf32>
    tpu.vector_store %arg6[%c0_13, %c0_14, %c0_15], %27 {strides = array<i32>} : memref<1x12x32xf32, #tpu.memory_space<vmem>>, vector<1x12x32xf32>,
    return
  }
  func.func @transform_0(%arg0: i32) -> (i32, i32, i32) {
    %c0_i32 = arith.constant 0 : i32
    %c0_i32_0 = arith.constant 0 : i32
    %c0_i32_1 = arith.constant 0 : i32
    return %arg0, %c0_i32, %c0_i32_0 : i32, i32, i32
  }
  func.func @transform_1(%arg0: i32) -> (i32, i32, i32) {
    %c0_i32 = arith.constant 0 : i32
    %c0_i32_0 = arith.constant 0 : i32
    %c0_i32_1 = arith.constant 0 : i32
    return %arg0, %c0_i32, %c0_i32_0 : i32, i32, i32
  }
  func.func @transform_2(%arg0: i32) -> (i32, i32) {
    %c0_i32 = arith.constant 0 : i32
    %c0_i32_0 = arith.constant 0 : i32
    %c0_i32_1 = arith.constant 0 : i32
    return %c0_i32, %c0_i32_0 : i32, i32
  }
  func.func @transform_3(%arg0: i32) -> (i32, i32) {
    %c0_i32 = arith.constant 0 : i32
    %c0_i32_0 = arith.constant 0 : i32
    %c0_i32_1 = arith.constant 0 : i32
    return %c0_i32, %c0_i32_0 : i32, i32
  }
  func.func @transform_4(%arg0: i32) -> (i32, i32) {
    %c0_i32 = arith.constant 0 : i32
    %c0_i32_0 = arith.constant 0 : i32
    %c0_i32_1 = arith.constant 0 : i32
    return %c0_i32, %c0_i32_0 : i32, i32
  }
  func.func @transform_5(%arg0: i32) -> (i32, i32, i32) {
    %c0_i32 = arith.constant 0 : i32
    %c0_i32_0 = arith.constant 0 : i32
    %c0_i32_1 = arith.constant 0 : i32
    return %arg0, %c0_i32, %c0_i32_0 : i32, i32, i32
  }
}

module attributes {stable_mosaic.version = 11 : i64} {
  func.func @_decoder_layer_kernel(%arg0: i32, %arg1: memref<1x12x32xf32, #tpu.memory_space<vmem>>, %arg2: memref<1x16x32xf32, #tpu.memory_space<vmem>>, %arg3: memref<32x96xf32, #tpu.memory_space<vmem>>, %arg4: memref<1x96xf32, #tpu.memory_space<vmem>>, %arg5: memref<32x32xf32, #tpu.memory_space<vmem>>, %arg6: memref<1x32xf32, #tpu.memory_space<vmem>>, %arg7: memref<32x32xf32, #tpu.memory_space<vmem>>, %arg8: memref<1x32xf32, #tpu.memory_space<vmem>>, %arg9: memref<32x64xf32, #tpu.memory_space<vmem>>, %arg10: memref<1x64xf32, #tpu.memory_space<vmem>>, %arg11: memref<32x32xf32, #tpu.memory_space<vmem>>, %arg12: memref<1x32xf32, #tpu.memory_space<vmem>>, %arg13: memref<32x32xf32, #tpu.memory_space<vmem>>, %arg14: memref<1x32xf32, #tpu.memory_space<vmem>>, %arg15: memref<32x32xf32, #tpu.memory_space<vmem>>, %arg16: memref<1x32xf32, #tpu.memory_space<vmem>>, %arg17: memref<6x32xf32, #tpu.memory_space<vmem>>, %arg18: memref<1x12x32xf32, #tpu.memory_space<vmem>>) attributes {dimension_semantics = [#tpu.dimension_semantics<parallel>], iteration_bounds = array<i64: 2>, scalar_prefetch = 0 : i64, scratch_operands = 0 : i64, tpu.core_type = #tpu.core_type<tc>, window_params = [{transform_indices = @transform_0, window_bounds = array<i64: 1, 12, 32>}, {transform_indices = @transform_1, window_bounds = array<i64: 1, 16, 32>}, {pipeline_mode = #tpu.pipeline_mode<synchronous>, transform_indices = @transform_2, window_bounds = array<i64: 32, 96>}, {pipeline_mode = #tpu.pipeline_mode<synchronous>, transform_indices = @transform_3, window_bounds = array<i64: 1, 96>}, {pipeline_mode = #tpu.pipeline_mode<synchronous>, transform_indices = @transform_4, window_bounds = array<i64: 32, 32>}, {pipeline_mode = #tpu.pipeline_mode<synchronous>, transform_indices = @transform_5, window_bounds = array<i64: 1, 32>}, {pipeline_mode = #tpu.pipeline_mode<synchronous>, transform_indices = @transform_6, window_bounds = array<i64: 32, 32>}, {pipeline_mode = #tpu.pipeline_mode<synchronous>, transform_indices = @transform_7, window_bounds = array<i64: 1, 32>}, {pipeline_mode = #tpu.pipeline_mode<synchronous>, transform_indices = @transform_8, window_bounds = array<i64: 32, 64>}, {pipeline_mode = #tpu.pipeline_mode<synchronous>, transform_indices = @transform_9, window_bounds = array<i64: 1, 64>}, {pipeline_mode = #tpu.pipeline_mode<synchronous>, transform_indices = @transform_10, window_bounds = array<i64: 32, 32>}, {pipeline_mode = #tpu.pipeline_mode<synchronous>, transform_indices = @transform_11, window_bounds = array<i64: 1, 32>}, {pipeline_mode = #tpu.pipeline_mode<synchronous>, transform_indices = @transform_12, window_bounds = array<i64: 32, 32>}, {pipeline_mode = #tpu.pipeline_mode<synchronous>, transform_indices = @transform_13, window_bounds = array<i64: 1, 32>}, {pipeline_mode = #tpu.pipeline_mode<synchronous>, transform_indices = @transform_14, window_bounds = array<i64: 32, 32>}, {pipeline_mode = #tpu.pipeline_mode<synchronous>, transform_indices = @transform_15, window_bounds = array<i64: 1, 32>}, {pipeline_mode = #tpu.pipeline_mode<synchronous>, transform_indices = @transform_16, window_bounds = array<i64: 6, 32>}, {transform_indices = @transform_17, window_bounds = array<i64: 1, 12, 32>}]} {
    %c0 = arith.constant 0 : index
    %c0_0 = arith.constant 0 : index
    %c0_1 = arith.constant 0 : index
    %0 = vector.load %arg1[%c0, %c0_0, %c0_1] : memref<1x12x32xf32, #tpu.memory_space<vmem>>, vector<1x12x32xf32>
    %1 = vector.shape_cast %0 : vector<1x12x32xf32> to vector<12x32xf32>
    %c0_2 = arith.constant 0 : index
    %c0_3 = arith.constant 0 : index
    %c0_4 = arith.constant 0 : index
    %2 = vector.load %arg2[%c0_2, %c0_3, %c0_4] : memref<1x16x32xf32, #tpu.memory_space<vmem>>, vector<1x16x32xf32>
    %3 = vector.shape_cast %2 : vector<1x16x32xf32> to vector<16x32xf32>
    %c0_5 = arith.constant 0 : index
    %c0_6 = arith.constant 0 : index
    %4 = vector.load %arg3[%c0_5, %c0_6] : memref<32x96xf32, #tpu.memory_space<vmem>>, vector<32x96xf32>
    %5 = arith.truncf %1 : vector<12x32xf32> to vector<12x32xbf16>
    %6 = arith.truncf %4 : vector<32x96xf32> to vector<32x96xbf16>
    %cst = arith.constant dense<0.000000e+00> : vector<12x96xf32>
    %7 = tpu.matmul %5, %6, %cst {dimension_numbers = #tpu.dot_dimension_numbers<[1], [0], [0], [1], [0, 0, 1, 1], [], []>} : vector<12x32xbf16>, vector<32x96xbf16>, vector<12x96xf32> -> vector<12x96xf32>
    %c0_7 = arith.constant 0 : index
    %c0_8 = arith.constant 0 : index
    %8 = vector.load %arg4[%c0_7, %c0_8] : memref<1x96xf32, #tpu.memory_space<vmem>>, vector<1x96xf32>
    %9 = vector.broadcast %8 : vector<1x96xf32> to vector<12x96xf32>
    %10 = arith.addf %7, %9 : vector<12x96xf32>
    %11 = vector.extract_strided_slice %10 {offsets = [0, 0], sizes = [12, 32], strides = [1, 1]} : vector<12x96xf32> to vector<12x32xf32>
    %12 = vector.extract_strided_slice %10 {offsets = [0, 32], sizes = [12, 32], strides = [1, 1]} : vector<12x96xf32> to vector<12x32xf32>
    %13 = vector.extract_strided_slice %10 {offsets = [0, 64], sizes = [12, 32], strides = [1, 1]} : vector<12x96xf32> to vector<12x32xf32>
    %14 = tpu.iota {dimensions = array<i32: 0>} : vector<12x12xi32>
    %15 = tpu.iota {dimensions = array<i32: 1>} : vector<12x12xi32>
    %16 = arith.cmpi sle, %15, %14 : vector<12x12xi32>
    %17 = vector.extract_strided_slice %11 {offsets = [0, 0], sizes = [12, 8], strides = [1, 1]} : vector<12x32xf32> to vector<12x8xf32>
    %18 = vector.extract_strided_slice %12 {offsets = [0, 0], sizes = [12, 8], strides = [1, 1]} : vector<12x32xf32> to vector<12x8xf32>
    %19 = vector.extract_strided_slice %13 {offsets = [0, 0], sizes = [12, 8], strides = [1, 1]} : vector<12x32xf32> to vector<12x8xf32>
    %20 = arith.truncf %17 : vector<12x8xf32> to vector<12x8xbf16>
    %21 = arith.truncf %18 : vector<12x8xf32> to vector<12x8xbf16>
    %cst_9 = arith.constant dense<0.000000e+00> : vector<12x12xf32>
    %22 = tpu.matmul %20, %21, %cst_9 {dimension_numbers = #tpu.dot_dimension_numbers<[1], [1], [0], [0], [0, 0, 1, 0], [], []>} : vector<12x8xbf16>, vector<12x8xbf16>, vector<12x12xf32> -> vector<12x12xf32>
    %cst_10 = arith.constant 0.353553385 : f32
    %23 = vector.broadcast %cst_10 : f32 to vector<12x12xf32>
    %24 = arith.mulf %22, %23 : vector<12x12xf32>
    %cst_11 = arith.constant -1.000000e+30 : f32
    %25 = vector.broadcast %cst_11 : f32 to vector<12x12xf32>
    %26 = arith.select %16, %24, %25 : vector<12x12xi1>, vector<12x12xf32>
    %cst_12 = arith.constant dense<0xFF800000> : vector<12xf32>
    %27 = vector.multi_reduction <maximumf>, %26, %cst_12 [1] : vector<12x12xf32> to vector<12xf32>
    %28 = vector.shape_cast %27 : vector<12xf32> to vector<12x1xf32>
    %29 = vector.broadcast %28 : vector<12x1xf32> to vector<12x12xf32>
    %30 = arith.subf %26, %29 : vector<12x12xf32>
    %31 = math.exp %30 : vector<12x12xf32>
    %cst_13 = arith.constant dense<0.000000e+00> : vector<12xf32>
    %32 = vector.multi_reduction <add>, %31, %cst_13 [1] : vector<12x12xf32> to vector<12xf32>
    %33 = vector.shape_cast %32 : vector<12xf32> to vector<12x1xf32>
    %34 = tpu.reciprocal %33 {approx = true} : vector<12x1xf32> -> vector<12x1xf32>
    %35 = vector.broadcast %34 : vector<12x1xf32> to vector<12x12xf32>
    %36 = arith.mulf %31, %35 : vector<12x12xf32>
    %37 = arith.truncf %36 : vector<12x12xf32> to vector<12x12xbf16>
    %38 = arith.truncf %19 : vector<12x8xf32> to vector<12x8xbf16>
    %cst_14 = arith.constant dense<0.000000e+00> : vector<12x8xf32>
    %39 = tpu.matmul %37, %38, %cst_14 {dimension_numbers = #tpu.dot_dimension_numbers<[1], [0], [0], [1], [0, 0, 1, 1], [], []>} : vector<12x12xbf16>, vector<12x8xbf16>, vector<12x8xf32> -> vector<12x8xf32>
    %40 = vector.extract_strided_slice %11 {offsets = [0, 8], sizes = [12, 8], strides = [1, 1]} : vector<12x32xf32> to vector<12x8xf32>
    %41 = vector.extract_strided_slice %12 {offsets = [0, 8], sizes = [12, 8], strides = [1, 1]} : vector<12x32xf32> to vector<12x8xf32>
    %42 = vector.extract_strided_slice %13 {offsets = [0, 8], sizes = [12, 8], strides = [1, 1]} : vector<12x32xf32> to vector<12x8xf32>
    %43 = arith.truncf %40 : vector<12x8xf32> to vector<12x8xbf16>
    %44 = arith.truncf %41 : vector<12x8xf32> to vector<12x8xbf16>
    %cst_15 = arith.constant dense<0.000000e+00> : vector<12x12xf32>
    %45 = tpu.matmul %43, %44, %cst_15 {dimension_numbers = #tpu.dot_dimension_numbers<[1], [1], [0], [0], [0, 0, 1, 0], [], []>} : vector<12x8xbf16>, vector<12x8xbf16>, vector<12x12xf32> -> vector<12x12xf32>
    %cst_16 = arith.constant 0.353553385 : f32
    %46 = vector.broadcast %cst_16 : f32 to vector<12x12xf32>
    %47 = arith.mulf %45, %46 : vector<12x12xf32>
    %cst_17 = arith.constant -1.000000e+30 : f32
    %48 = vector.broadcast %cst_17 : f32 to vector<12x12xf32>
    %49 = arith.select %16, %47, %48 : vector<12x12xi1>, vector<12x12xf32>
    %cst_18 = arith.constant dense<0xFF800000> : vector<12xf32>
    %50 = vector.multi_reduction <maximumf>, %49, %cst_18 [1] : vector<12x12xf32> to vector<12xf32>
    %51 = vector.shape_cast %50 : vector<12xf32> to vector<12x1xf32>
    %52 = vector.broadcast %51 : vector<12x1xf32> to vector<12x12xf32>
    %53 = arith.subf %49, %52 : vector<12x12xf32>
    %54 = math.exp %53 : vector<12x12xf32>
    %cst_19 = arith.constant dense<0.000000e+00> : vector<12xf32>
    %55 = vector.multi_reduction <add>, %54, %cst_19 [1] : vector<12x12xf32> to vector<12xf32>
    %56 = vector.shape_cast %55 : vector<12xf32> to vector<12x1xf32>
    %57 = tpu.reciprocal %56 {approx = true} : vector<12x1xf32> -> vector<12x1xf32>
    %58 = vector.broadcast %57 : vector<12x1xf32> to vector<12x12xf32>
    %59 = arith.mulf %54, %58 : vector<12x12xf32>
    %60 = arith.truncf %59 : vector<12x12xf32> to vector<12x12xbf16>
    %61 = arith.truncf %42 : vector<12x8xf32> to vector<12x8xbf16>
    %cst_20 = arith.constant dense<0.000000e+00> : vector<12x8xf32>
    %62 = tpu.matmul %60, %61, %cst_20 {dimension_numbers = #tpu.dot_dimension_numbers<[1], [0], [0], [1], [0, 0, 1, 1], [], []>} : vector<12x12xbf16>, vector<12x8xbf16>, vector<12x8xf32> -> vector<12x8xf32>
    %63 = vector.extract_strided_slice %11 {offsets = [0, 16], sizes = [12, 8], strides = [1, 1]} : vector<12x32xf32> to vector<12x8xf32>
    %64 = vector.extract_strided_slice %12 {offsets = [0, 16], sizes = [12, 8], strides = [1, 1]} : vector<12x32xf32> to vector<12x8xf32>
    %65 = vector.extract_strided_slice %13 {offsets = [0, 16], sizes = [12, 8], strides = [1, 1]} : vector<12x32xf32> to vector<12x8xf32>
    %66 = arith.truncf %63 : vector<12x8xf32> to vector<12x8xbf16>
    %67 = arith.truncf %64 : vector<12x8xf32> to vector<12x8xbf16>
    %cst_21 = arith.constant dense<0.000000e+00> : vector<12x12xf32>
    %68 = tpu.matmul %66, %67, %cst_21 {dimension_numbers = #tpu.dot_dimension_numbers<[1], [1], [0], [0], [0, 0, 1, 0], [], []>} : vector<12x8xbf16>, vector<12x8xbf16>, vector<12x12xf32> -> vector<12x12xf32>
    %cst_22 = arith.constant 0.353553385 : f32
    %69 = vector.broadcast %cst_22 : f32 to vector<12x12xf32>
    %70 = arith.mulf %68, %69 : vector<12x12xf32>
    %cst_23 = arith.constant -1.000000e+30 : f32
    %71 = vector.broadcast %cst_23 : f32 to vector<12x12xf32>
    %72 = arith.select %16, %70, %71 : vector<12x12xi1>, vector<12x12xf32>
    %cst_24 = arith.constant dense<0xFF800000> : vector<12xf32>
    %73 = vector.multi_reduction <maximumf>, %72, %cst_24 [1] : vector<12x12xf32> to vector<12xf32>
    %74 = vector.shape_cast %73 : vector<12xf32> to vector<12x1xf32>
    %75 = vector.broadcast %74 : vector<12x1xf32> to vector<12x12xf32>
    %76 = arith.subf %72, %75 : vector<12x12xf32>
    %77 = math.exp %76 : vector<12x12xf32>
    %cst_25 = arith.constant dense<0.000000e+00> : vector<12xf32>
    %78 = vector.multi_reduction <add>, %77, %cst_25 [1] : vector<12x12xf32> to vector<12xf32>
    %79 = vector.shape_cast %78 : vector<12xf32> to vector<12x1xf32>
    %80 = tpu.reciprocal %79 {approx = true} : vector<12x1xf32> -> vector<12x1xf32>
    %81 = vector.broadcast %80 : vector<12x1xf32> to vector<12x12xf32>
    %82 = arith.mulf %77, %81 : vector<12x12xf32>
    %83 = arith.truncf %82 : vector<12x12xf32> to vector<12x12xbf16>
    %84 = arith.truncf %65 : vector<12x8xf32> to vector<12x8xbf16>
    %cst_26 = arith.constant dense<0.000000e+00> : vector<12x8xf32>
    %85 = tpu.matmul %83, %84, %cst_26 {dimension_numbers = #tpu.dot_dimension_numbers<[1], [0], [0], [1], [0, 0, 1, 1], [], []>} : vector<12x12xbf16>, vector<12x8xbf16>, vector<12x8xf32> -> vector<12x8xf32>
    %86 = vector.extract_strided_slice %11 {offsets = [0, 24], sizes = [12, 8], strides = [1, 1]} : vector<12x32xf32> to vector<12x8xf32>
    %87 = vector.extract_strided_slice %12 {offsets = [0, 24], sizes = [12, 8], strides = [1, 1]} : vector<12x32xf32> to vector<12x8xf32>
    %88 = vector.extract_strided_slice %13 {offsets = [0, 24], sizes = [12, 8], strides = [1, 1]} : vector<12x32xf32> to vector<12x8xf32>
    %89 = arith.truncf %86 : vector<12x8xf32> to vector<12x8xbf16>
    %90 = arith.truncf %87 : vector<12x8xf32> to vector<12x8xbf16>
    %cst_27 = arith.constant dense<0.000000e+00> : vector<12x12xf32>
    %91 = tpu.matmul %89, %90, %cst_27 {dimension_numbers = #tpu.dot_dimension_numbers<[1], [1], [0], [0], [0, 0, 1, 0], [], []>} : vector<12x8xbf16>, vector<12x8xbf16>, vector<12x12xf32> -> vector<12x12xf32>
    %cst_28 = arith.constant 0.353553385 : f32
    %92 = vector.broadcast %cst_28 : f32 to vector<12x12xf32>
    %93 = arith.mulf %91, %92 : vector<12x12xf32>
    %cst_29 = arith.constant -1.000000e+30 : f32
    %94 = vector.broadcast %cst_29 : f32 to vector<12x12xf32>
    %95 = arith.select %16, %93, %94 : vector<12x12xi1>, vector<12x12xf32>
    %cst_30 = arith.constant dense<0xFF800000> : vector<12xf32>
    %96 = vector.multi_reduction <maximumf>, %95, %cst_30 [1] : vector<12x12xf32> to vector<12xf32>
    %97 = vector.shape_cast %96 : vector<12xf32> to vector<12x1xf32>
    %98 = vector.broadcast %97 : vector<12x1xf32> to vector<12x12xf32>
    %99 = arith.subf %95, %98 : vector<12x12xf32>
    %100 = math.exp %99 : vector<12x12xf32>
    %cst_31 = arith.constant dense<0.000000e+00> : vector<12xf32>
    %101 = vector.multi_reduction <add>, %100, %cst_31 [1] : vector<12x12xf32> to vector<12xf32>
    %102 = vector.shape_cast %101 : vector<12xf32> to vector<12x1xf32>
    %103 = tpu.reciprocal %102 {approx = true} : vector<12x1xf32> -> vector<12x1xf32>
    %104 = vector.broadcast %103 : vector<12x1xf32> to vector<12x12xf32>
    %105 = arith.mulf %100, %104 : vector<12x12xf32>
    %106 = arith.truncf %105 : vector<12x12xf32> to vector<12x12xbf16>
    %107 = arith.truncf %88 : vector<12x8xf32> to vector<12x8xbf16>
    %cst_32 = arith.constant dense<0.000000e+00> : vector<12x8xf32>
    %108 = tpu.matmul %106, %107, %cst_32 {dimension_numbers = #tpu.dot_dimension_numbers<[1], [0], [0], [1], [0, 0, 1, 1], [], []>} : vector<12x12xbf16>, vector<12x8xbf16>, vector<12x8xf32> -> vector<12x8xf32>
    %109 = tpu.concatenate %39, %62, %85, %108 in 0 : vector<12x8xf32>, vector<12x8xf32>, vector<12x8xf32>, vector<12x8xf32> -> vector<48x8xf32>
    %110 = tpu.iota {dimensions = array<i32: 0>} : vector<12x48xi32>
    %111 = tpu.iota {dimensions = array<i32: 1>} : vector<12x48xi32>
    %c4_i32 = arith.constant 4 : i32
    %112 = vector.broadcast %c4_i32 : i32 to vector<12x48xi32>
    %113 = arith.muli %110, %112 : vector<12x48xi32>
    %c0_i32 = arith.constant 0 : i32
    %114 = vector.broadcast %c0_i32 : i32 to vector<12x48xi32>
    %115 = arith.addi %113, %114 : vector<12x48xi32>
    %116 = arith.cmpi eq, %111, %115 : vector<12x48xi32>
    %cst_33 = arith.constant 1.000000e+00 : f32
    %cst_34 = arith.constant 0.000000e+00 : f32
    %117 = vector.broadcast %cst_33 : f32 to vector<12x48xf32>
    %118 = vector.broadcast %cst_34 : f32 to vector<12x48xf32>
    %119 = arith.select %116, %117, %118 : vector<12x48xi1>, vector<12x48xf32>
    %120 = arith.truncf %119 : vector<12x48xf32> to vector<12x48xbf16>
    %121 = arith.truncf %109 : vector<48x8xf32> to vector<48x8xbf16>
    %cst_35 = arith.constant dense<0.000000e+00> : vector<12x8xf32>
    %122 = tpu.matmul %120, %121, %cst_35 {dimension_numbers = #tpu.dot_dimension_numbers<[1], [0], [0], [1], [0, 0, 1, 1], [], []>} : vector<12x48xbf16>, vector<48x8xbf16>, vector<12x8xf32> -> vector<12x8xf32>
    %c4_i32_36 = arith.constant 4 : i32
    %123 = vector.broadcast %c4_i32_36 : i32 to vector<12x48xi32>
    %124 = arith.muli %110, %123 : vector<12x48xi32>
    %c1_i32 = arith.constant 1 : i32
    %125 = vector.broadcast %c1_i32 : i32 to vector<12x48xi32>
    %126 = arith.addi %124, %125 : vector<12x48xi32>
    %127 = arith.cmpi eq, %111, %126 : vector<12x48xi32>
    %cst_37 = arith.constant 1.000000e+00 : f32
    %cst_38 = arith.constant 0.000000e+00 : f32
    %128 = vector.broadcast %cst_37 : f32 to vector<12x48xf32>
    %129 = vector.broadcast %cst_38 : f32 to vector<12x48xf32>
    %130 = arith.select %127, %128, %129 : vector<12x48xi1>, vector<12x48xf32>
    %131 = arith.truncf %130 : vector<12x48xf32> to vector<12x48xbf16>
    %132 = arith.truncf %109 : vector<48x8xf32> to vector<48x8xbf16>
    %cst_39 = arith.constant dense<0.000000e+00> : vector<12x8xf32>
    %133 = tpu.matmul %131, %132, %cst_39 {dimension_numbers = #tpu.dot_dimension_numbers<[1], [0], [0], [1], [0, 0, 1, 1], [], []>} : vector<12x48xbf16>, vector<48x8xbf16>, vector<12x8xf32> -> vector<12x8xf32>
    %c4_i32_40 = arith.constant 4 : i32
    %134 = vector.broadcast %c4_i32_40 : i32 to vector<12x48xi32>
    %135 = arith.muli %110, %134 : vector<12x48xi32>
    %c2_i32 = arith.constant 2 : i32
    %136 = vector.broadcast %c2_i32 : i32 to vector<12x48xi32>
    %137 = arith.addi %135, %136 : vector<12x48xi32>
    %138 = arith.cmpi eq, %111, %137 : vector<12x48xi32>
    %cst_41 = arith.constant 1.000000e+00 : f32
    %cst_42 = arith.constant 0.000000e+00 : f32
    %139 = vector.broadcast %cst_41 : f32 to vector<12x48xf32>
    %140 = vector.broadcast %cst_42 : f32 to vector<12x48xf32>
    %141 = arith.select %138, %139, %140 : vector<12x48xi1>, vector<12x48xf32>
    %142 = arith.truncf %141 : vector<12x48xf32> to vector<12x48xbf16>
    %143 = arith.truncf %109 : vector<48x8xf32> to vector<48x8xbf16>
    %cst_43 = arith.constant dense<0.000000e+00> : vector<12x8xf32>
    %144 = tpu.matmul %142, %143, %cst_43 {dimension_numbers = #tpu.dot_dimension_numbers<[1], [0], [0], [1], [0, 0, 1, 1], [], []>} : vector<12x48xbf16>, vector<48x8xbf16>, vector<12x8xf32> -> vector<12x8xf32>
    %c4_i32_44 = arith.constant 4 : i32
    %145 = vector.broadcast %c4_i32_44 : i32 to vector<12x48xi32>
    %146 = arith.muli %110, %145 : vector<12x48xi32>
    %c3_i32 = arith.constant 3 : i32
    %147 = vector.broadcast %c3_i32 : i32 to vector<12x48xi32>
    %148 = arith.addi %146, %147 : vector<12x48xi32>
    %149 = arith.cmpi eq, %111, %148 : vector<12x48xi32>
    %cst_45 = arith.constant 1.000000e+00 : f32
    %cst_46 = arith.constant 0.000000e+00 : f32
    %150 = vector.broadcast %cst_45 : f32 to vector<12x48xf32>
    %151 = vector.broadcast %cst_46 : f32 to vector<12x48xf32>
    %152 = arith.select %149, %150, %151 : vector<12x48xi1>, vector<12x48xf32>
    %153 = arith.truncf %152 : vector<12x48xf32> to vector<12x48xbf16>
    %154 = arith.truncf %109 : vector<48x8xf32> to vector<48x8xbf16>
    %cst_47 = arith.constant dense<0.000000e+00> : vector<12x8xf32>
    %155 = tpu.matmul %153, %154, %cst_47 {dimension_numbers = #tpu.dot_dimension_numbers<[1], [0], [0], [1], [0, 0, 1, 1], [], []>} : vector<12x48xbf16>, vector<48x8xbf16>, vector<12x8xf32> -> vector<12x8xf32>
    %156 = tpu.concatenate %122, %133, %144, %155 in 1 : vector<12x8xf32>, vector<12x8xf32>, vector<12x8xf32>, vector<12x8xf32> -> vector<12x32xf32>
    %c0_48 = arith.constant 0 : index
    %c0_49 = arith.constant 0 : index
    %157 = vector.load %arg5[%c0_48, %c0_49] : memref<32x32xf32, #tpu.memory_space<vmem>>, vector<32x32xf32>
    %158 = arith.truncf %156 : vector<12x32xf32> to vector<12x32xbf16>
    %159 = arith.truncf %157 : vector<32x32xf32> to vector<32x32xbf16>
    %cst_50 = arith.constant dense<0.000000e+00> : vector<12x32xf32>
    %160 = tpu.matmul %158, %159, %cst_50 {dimension_numbers = #tpu.dot_dimension_numbers<[1], [0], [0], [1], [0, 0, 1, 1], [], []>} : vector<12x32xbf16>, vector<32x32xbf16>, vector<12x32xf32> -> vector<12x32xf32>
    %161 = arith.addf %1, %160 : vector<12x32xf32>
    %c0_51 = arith.constant 0 : index
    %c0_52 = arith.constant 0 : index
    %162 = vector.load %arg6[%c0_51, %c0_52] : memref<1x32xf32, #tpu.memory_space<vmem>>, vector<1x32xf32>
    %163 = vector.broadcast %162 : vector<1x32xf32> to vector<12x32xf32>
    %164 = arith.addf %161, %163 : vector<12x32xf32>
    %c0_53 = arith.constant 0 : index
    %c0_54 = arith.constant 0 : index
    %165 = vector.load %arg17[%c0_53, %c0_54] : memref<6x32xf32, #tpu.memory_space<vmem>>, vector<1x32xf32>
    %c1 = arith.constant 1 : index
    %c0_55 = arith.constant 0 : index
    %166 = vector.load %arg17[%c1, %c0_55] : memref<6x32xf32, #tpu.memory_space<vmem>>, vector<1x32xf32>
    %cst_56 = arith.constant dense<0.000000e+00> : vector<12xf32>
    %167 = vector.multi_reduction <add>, %164, %cst_56 [1] : vector<12x32xf32> to vector<12xf32>
    %168 = vector.shape_cast %167 : vector<12xf32> to vector<12x1xf32>
    %cst_57 = arith.constant 3.200000e+01 : f32
    %169 = vector.broadcast %cst_57 : f32 to vector<12x1xf32>
    %170 = arith.divf %168, %169 : vector<12x1xf32>
    %171 = vector.broadcast %170 : vector<12x1xf32> to vector<12x32xf32>
    %172 = arith.subf %164, %171 : vector<12x32xf32>
    %173 = arith.mulf %172, %172 : vector<12x32xf32>
    %cst_58 = arith.constant dense<0.000000e+00> : vector<12xf32>
    %174 = vector.multi_reduction <add>, %173, %cst_58 [1] : vector<12x32xf32> to vector<12xf32>
    %175 = vector.shape_cast %174 : vector<12xf32> to vector<12x1xf32>
    %cst_59 = arith.constant 3.200000e+01 : f32
    %176 = vector.broadcast %cst_59 : f32 to vector<12x1xf32>
    %177 = arith.divf %175, %176 : vector<12x1xf32>
    %178 = vector.broadcast %170 : vector<12x1xf32> to vector<12x32xf32>
    %179 = arith.subf %164, %178 : vector<12x32xf32>
    %cst_60 = arith.constant 9.99999974E-6 : f32
    %180 = vector.broadcast %cst_60 : f32 to vector<12x1xf32>
    %181 = arith.addf %177, %180 : vector<12x1xf32>
    %182 = math.rsqrt %181 : vector<12x1xf32>
    %183 = vector.broadcast %182 : vector<12x1xf32> to vector<12x32xf32>
    %184 = arith.mulf %179, %183 : vector<12x32xf32>
    %185 = vector.broadcast %165 : vector<1x32xf32> to vector<12x32xf32>
    %186 = arith.mulf %184, %185 : vector<12x32xf32>
    %187 = vector.broadcast %166 : vector<1x32xf32> to vector<12x32xf32>
    %188 = arith.addf %186, %187 : vector<12x32xf32>
    %c0_61 = arith.constant 0 : index
    %c0_62 = arith.constant 0 : index
    %189 = vector.load %arg7[%c0_61, %c0_62] : memref<32x32xf32, #tpu.memory_space<vmem>>, vector<32x32xf32>
    %190 = arith.truncf %188 : vector<12x32xf32> to vector<12x32xbf16>
    %191 = arith.truncf %189 : vector<32x32xf32> to vector<32x32xbf16>
    %cst_63 = arith.constant dense<0.000000e+00> : vector<12x32xf32>
    %192 = tpu.matmul %190, %191, %cst_63 {dimension_numbers = #tpu.dot_dimension_numbers<[1], [0], [0], [1], [0, 0, 1, 1], [], []>} : vector<12x32xbf16>, vector<32x32xbf16>, vector<12x32xf32> -> vector<12x32xf32>
    %c0_64 = arith.constant 0 : index
    %c0_65 = arith.constant 0 : index
    %193 = vector.load %arg8[%c0_64, %c0_65] : memref<1x32xf32, #tpu.memory_space<vmem>>, vector<1x32xf32>
    %194 = vector.broadcast %193 : vector<1x32xf32> to vector<12x32xf32>
    %195 = arith.addf %192, %194 : vector<12x32xf32>
    %c0_66 = arith.constant 0 : index
    %c0_67 = arith.constant 0 : index
    %196 = vector.load %arg9[%c0_66, %c0_67] : memref<32x64xf32, #tpu.memory_space<vmem>>, vector<32x64xf32>
    %197 = arith.truncf %3 : vector<16x32xf32> to vector<16x32xbf16>
    %198 = arith.truncf %196 : vector<32x64xf32> to vector<32x64xbf16>
    %cst_68 = arith.constant dense<0.000000e+00> : vector<16x64xf32>
    %199 = tpu.matmul %197, %198, %cst_68 {dimension_numbers = #tpu.dot_dimension_numbers<[1], [0], [0], [1], [0, 0, 1, 1], [], []>} : vector<16x32xbf16>, vector<32x64xbf16>, vector<16x64xf32> -> vector<16x64xf32>
    %c0_69 = arith.constant 0 : index
    %c0_70 = arith.constant 0 : index
    %200 = vector.load %arg10[%c0_69, %c0_70] : memref<1x64xf32, #tpu.memory_space<vmem>>, vector<1x64xf32>
    %201 = vector.broadcast %200 : vector<1x64xf32> to vector<16x64xf32>
    %202 = arith.addf %199, %201 : vector<16x64xf32>
    %203 = vector.extract_strided_slice %202 {offsets = [0, 0], sizes = [16, 32], strides = [1, 1]} : vector<16x64xf32> to vector<16x32xf32>
    %204 = vector.extract_strided_slice %202 {offsets = [0, 32], sizes = [16, 32], strides = [1, 1]} : vector<16x64xf32> to vector<16x32xf32>
    %205 = vector.extract_strided_slice %195 {offsets = [0, 0], sizes = [12, 8], strides = [1, 1]} : vector<12x32xf32> to vector<12x8xf32>
    %206 = vector.extract_strided_slice %203 {offsets = [0, 0], sizes = [16, 8], strides = [1, 1]} : vector<16x32xf32> to vector<16x8xf32>
    %207 = vector.extract_strided_slice %204 {offsets = [0, 0], sizes = [16, 8], strides = [1, 1]} : vector<16x32xf32> to vector<16x8xf32>
    %208 = arith.truncf %205 : vector<12x8xf32> to vector<12x8xbf16>
    %209 = arith.truncf %206 : vector<16x8xf32> to vector<16x8xbf16>
    %cst_71 = arith.constant dense<0.000000e+00> : vector<12x16xf32>
    %210 = tpu.matmul %208, %209, %cst_71 {dimension_numbers = #tpu.dot_dimension_numbers<[1], [1], [0], [0], [0, 0, 1, 0], [], []>} : vector<12x8xbf16>, vector<16x8xbf16>, vector<12x16xf32> -> vector<12x16xf32>
    %cst_72 = arith.constant 0.353553385 : f32
    %211 = vector.broadcast %cst_72 : f32 to vector<12x16xf32>
    %212 = arith.mulf %210, %211 : vector<12x16xf32>
    %cst_73 = arith.constant dense<0xFF800000> : vector<12xf32>
    %213 = vector.multi_reduction <maximumf>, %212, %cst_73 [1] : vector<12x16xf32> to vector<12xf32>
    %214 = vector.shape_cast %213 : vector<12xf32> to vector<12x1xf32>
    %215 = vector.broadcast %214 : vector<12x1xf32> to vector<12x16xf32>
    %216 = arith.subf %212, %215 : vector<12x16xf32>
    %217 = math.exp %216 : vector<12x16xf32>
    %cst_74 = arith.constant dense<0.000000e+00> : vector<12xf32>
    %218 = vector.multi_reduction <add>, %217, %cst_74 [1] : vector<12x16xf32> to vector<12xf32>
    %219 = vector.shape_cast %218 : vector<12xf32> to vector<12x1xf32>
    %220 = tpu.reciprocal %219 {approx = true} : vector<12x1xf32> -> vector<12x1xf32>
    %221 = vector.broadcast %220 : vector<12x1xf32> to vector<12x16xf32>
    %222 = arith.mulf %217, %221 : vector<12x16xf32>
    %223 = arith.truncf %222 : vector<12x16xf32> to vector<12x16xbf16>
    %224 = arith.truncf %207 : vector<16x8xf32> to vector<16x8xbf16>
    %cst_75 = arith.constant dense<0.000000e+00> : vector<12x8xf32>
    %225 = tpu.matmul %223, %224, %cst_75 {dimension_numbers = #tpu.dot_dimension_numbers<[1], [0], [0], [1], [0, 0, 1, 1], [], []>} : vector<12x16xbf16>, vector<16x8xbf16>, vector<12x8xf32> -> vector<12x8xf32>
    %226 = vector.extract_strided_slice %195 {offsets = [0, 8], sizes = [12, 8], strides = [1, 1]} : vector<12x32xf32> to vector<12x8xf32>
    %227 = vector.extract_strided_slice %203 {offsets = [0, 8], sizes = [16, 8], strides = [1, 1]} : vector<16x32xf32> to vector<16x8xf32>
    %228 = vector.extract_strided_slice %204 {offsets = [0, 8], sizes = [16, 8], strides = [1, 1]} : vector<16x32xf32> to vector<16x8xf32>
    %229 = arith.truncf %226 : vector<12x8xf32> to vector<12x8xbf16>
    %230 = arith.truncf %227 : vector<16x8xf32> to vector<16x8xbf16>
    %cst_76 = arith.constant dense<0.000000e+00> : vector<12x16xf32>
    %231 = tpu.matmul %229, %230, %cst_76 {dimension_numbers = #tpu.dot_dimension_numbers<[1], [1], [0], [0], [0, 0, 1, 0], [], []>} : vector<12x8xbf16>, vector<16x8xbf16>, vector<12x16xf32> -> vector<12x16xf32>
    %cst_77 = arith.constant 0.353553385 : f32
    %232 = vector.broadcast %cst_77 : f32 to vector<12x16xf32>
    %233 = arith.mulf %231, %232 : vector<12x16xf32>
    %cst_78 = arith.constant dense<0xFF800000> : vector<12xf32>
    %234 = vector.multi_reduction <maximumf>, %233, %cst_78 [1] : vector<12x16xf32> to vector<12xf32>
    %235 = vector.shape_cast %234 : vector<12xf32> to vector<12x1xf32>
    %236 = vector.broadcast %235 : vector<12x1xf32> to vector<12x16xf32>
    %237 = arith.subf %233, %236 : vector<12x16xf32>
    %238 = math.exp %237 : vector<12x16xf32>
    %cst_79 = arith.constant dense<0.000000e+00> : vector<12xf32>
    %239 = vector.multi_reduction <add>, %238, %cst_79 [1] : vector<12x16xf32> to vector<12xf32>
    %240 = vector.shape_cast %239 : vector<12xf32> to vector<12x1xf32>
    %241 = tpu.reciprocal %240 {approx = true} : vector<12x1xf32> -> vector<12x1xf32>
    %242 = vector.broadcast %241 : vector<12x1xf32> to vector<12x16xf32>
    %243 = arith.mulf %238, %242 : vector<12x16xf32>
    %244 = arith.truncf %243 : vector<12x16xf32> to vector<12x16xbf16>
    %245 = arith.truncf %228 : vector<16x8xf32> to vector<16x8xbf16>
    %cst_80 = arith.constant dense<0.000000e+00> : vector<12x8xf32>
    %246 = tpu.matmul %244, %245, %cst_80 {dimension_numbers = #tpu.dot_dimension_numbers<[1], [0], [0], [1], [0, 0, 1, 1], [], []>} : vector<12x16xbf16>, vector<16x8xbf16>, vector<12x8xf32> -> vector<12x8xf32>
    %247 = vector.extract_strided_slice %195 {offsets = [0, 16], sizes = [12, 8], strides = [1, 1]} : vector<12x32xf32> to vector<12x8xf32>
    %248 = vector.extract_strided_slice %203 {offsets = [0, 16], sizes = [16, 8], strides = [1, 1]} : vector<16x32xf32> to vector<16x8xf32>
    %249 = vector.extract_strided_slice %204 {offsets = [0, 16], sizes = [16, 8], strides = [1, 1]} : vector<16x32xf32> to vector<16x8xf32>
    %250 = arith.truncf %247 : vector<12x8xf32> to vector<12x8xbf16>
    %251 = arith.truncf %248 : vector<16x8xf32> to vector<16x8xbf16>
    %cst_81 = arith.constant dense<0.000000e+00> : vector<12x16xf32>
    %252 = tpu.matmul %250, %251, %cst_81 {dimension_numbers = #tpu.dot_dimension_numbers<[1], [1], [0], [0], [0, 0, 1, 0], [], []>} : vector<12x8xbf16>, vector<16x8xbf16>, vector<12x16xf32> -> vector<12x16xf32>
    %cst_82 = arith.constant 0.353553385 : f32
    %253 = vector.broadcast %cst_82 : f32 to vector<12x16xf32>
    %254 = arith.mulf %252, %253 : vector<12x16xf32>
    %cst_83 = arith.constant dense<0xFF800000> : vector<12xf32>
    %255 = vector.multi_reduction <maximumf>, %254, %cst_83 [1] : vector<12x16xf32> to vector<12xf32>
    %256 = vector.shape_cast %255 : vector<12xf32> to vector<12x1xf32>
    %257 = vector.broadcast %256 : vector<12x1xf32> to vector<12x16xf32>
    %258 = arith.subf %254, %257 : vector<12x16xf32>
    %259 = math.exp %258 : vector<12x16xf32>
    %cst_84 = arith.constant dense<0.000000e+00> : vector<12xf32>
    %260 = vector.multi_reduction <add>, %259, %cst_84 [1] : vector<12x16xf32> to vector<12xf32>
    %261 = vector.shape_cast %260 : vector<12xf32> to vector<12x1xf32>
    %262 = tpu.reciprocal %261 {approx = true} : vector<12x1xf32> -> vector<12x1xf32>
    %263 = vector.broadcast %262 : vector<12x1xf32> to vector<12x16xf32>
    %264 = arith.mulf %259, %263 : vector<12x16xf32>
    %265 = arith.truncf %264 : vector<12x16xf32> to vector<12x16xbf16>
    %266 = arith.truncf %249 : vector<16x8xf32> to vector<16x8xbf16>
    %cst_85 = arith.constant dense<0.000000e+00> : vector<12x8xf32>
    %267 = tpu.matmul %265, %266, %cst_85 {dimension_numbers = #tpu.dot_dimension_numbers<[1], [0], [0], [1], [0, 0, 1, 1], [], []>} : vector<12x16xbf16>, vector<16x8xbf16>, vector<12x8xf32> -> vector<12x8xf32>
    %268 = vector.extract_strided_slice %195 {offsets = [0, 24], sizes = [12, 8], strides = [1, 1]} : vector<12x32xf32> to vector<12x8xf32>
    %269 = vector.extract_strided_slice %203 {offsets = [0, 24], sizes = [16, 8], strides = [1, 1]} : vector<16x32xf32> to vector<16x8xf32>
    %270 = vector.extract_strided_slice %204 {offsets = [0, 24], sizes = [16, 8], strides = [1, 1]} : vector<16x32xf32> to vector<16x8xf32>
    %271 = arith.truncf %268 : vector<12x8xf32> to vector<12x8xbf16>
    %272 = arith.truncf %269 : vector<16x8xf32> to vector<16x8xbf16>
    %cst_86 = arith.constant dense<0.000000e+00> : vector<12x16xf32>
    %273 = tpu.matmul %271, %272, %cst_86 {dimension_numbers = #tpu.dot_dimension_numbers<[1], [1], [0], [0], [0, 0, 1, 0], [], []>} : vector<12x8xbf16>, vector<16x8xbf16>, vector<12x16xf32> -> vector<12x16xf32>
    %cst_87 = arith.constant 0.353553385 : f32
    %274 = vector.broadcast %cst_87 : f32 to vector<12x16xf32>
    %275 = arith.mulf %273, %274 : vector<12x16xf32>
    %cst_88 = arith.constant dense<0xFF800000> : vector<12xf32>
    %276 = vector.multi_reduction <maximumf>, %275, %cst_88 [1] : vector<12x16xf32> to vector<12xf32>
    %277 = vector.shape_cast %276 : vector<12xf32> to vector<12x1xf32>
    %278 = vector.broadcast %277 : vector<12x1xf32> to vector<12x16xf32>
    %279 = arith.subf %275, %278 : vector<12x16xf32>
    %280 = math.exp %279 : vector<12x16xf32>
    %cst_89 = arith.constant dense<0.000000e+00> : vector<12xf32>
    %281 = vector.multi_reduction <add>, %280, %cst_89 [1] : vector<12x16xf32> to vector<12xf32>
    %282 = vector.shape_cast %281 : vector<12xf32> to vector<12x1xf32>
    %283 = tpu.reciprocal %282 {approx = true} : vector<12x1xf32> -> vector<12x1xf32>
    %284 = vector.broadcast %283 : vector<12x1xf32> to vector<12x16xf32>
    %285 = arith.mulf %280, %284 : vector<12x16xf32>
    %286 = arith.truncf %285 : vector<12x16xf32> to vector<12x16xbf16>
    %287 = arith.truncf %270 : vector<16x8xf32> to vector<16x8xbf16>
    %cst_90 = arith.constant dense<0.000000e+00> : vector<12x8xf32>
    %288 = tpu.matmul %286, %287, %cst_90 {dimension_numbers = #tpu.dot_dimension_numbers<[1], [0], [0], [1], [0, 0, 1, 1], [], []>} : vector<12x16xbf16>, vector<16x8xbf16>, vector<12x8xf32> -> vector<12x8xf32>
    %289 = tpu.concatenate %225, %246, %267, %288 in 1 : vector<12x8xf32>, vector<12x8xf32>, vector<12x8xf32>, vector<12x8xf32> -> vector<12x32xf32>
    %c0_91 = arith.constant 0 : index
    %c0_92 = arith.constant 0 : index
    %290 = vector.load %arg11[%c0_91, %c0_92] : memref<32x32xf32, #tpu.memory_space<vmem>>, vector<32x32xf32>
    %291 = arith.truncf %289 : vector<12x32xf32> to vector<12x32xbf16>
    %292 = arith.truncf %290 : vector<32x32xf32> to vector<32x32xbf16>
    %cst_93 = arith.constant dense<0.000000e+00> : vector<12x32xf32>
    %293 = tpu.matmul %291, %292, %cst_93 {dimension_numbers = #tpu.dot_dimension_numbers<[1], [0], [0], [1], [0, 0, 1, 1], [], []>} : vector<12x32xbf16>, vector<32x32xbf16>, vector<12x32xf32> -> vector<12x32xf32>
    %294 = arith.addf %188, %293 : vector<12x32xf32>
    %c0_94 = arith.constant 0 : index
    %c0_95 = arith.constant 0 : index
    %295 = vector.load %arg12[%c0_94, %c0_95] : memref<1x32xf32, #tpu.memory_space<vmem>>, vector<1x32xf32>
    %296 = vector.broadcast %295 : vector<1x32xf32> to vector<12x32xf32>
    %297 = arith.addf %294, %296 : vector<12x32xf32>
    %c2 = arith.constant 2 : index
    %c0_96 = arith.constant 0 : index
    %298 = vector.load %arg17[%c2, %c0_96] : memref<6x32xf32, #tpu.memory_space<vmem>>, vector<1x32xf32>
    %c3 = arith.constant 3 : index
    %c0_97 = arith.constant 0 : index
    %299 = vector.load %arg17[%c3, %c0_97] : memref<6x32xf32, #tpu.memory_space<vmem>>, vector<1x32xf32>
    %cst_98 = arith.constant dense<0.000000e+00> : vector<12xf32>
    %300 = vector.multi_reduction <add>, %297, %cst_98 [1] : vector<12x32xf32> to vector<12xf32>
    %301 = vector.shape_cast %300 : vector<12xf32> to vector<12x1xf32>
    %cst_99 = arith.constant 3.200000e+01 : f32
    %302 = vector.broadcast %cst_99 : f32 to vector<12x1xf32>
    %303 = arith.divf %301, %302 : vector<12x1xf32>
    %304 = vector.broadcast %303 : vector<12x1xf32> to vector<12x32xf32>
    %305 = arith.subf %297, %304 : vector<12x32xf32>
    %306 = arith.mulf %305, %305 : vector<12x32xf32>
    %cst_100 = arith.constant dense<0.000000e+00> : vector<12xf32>
    %307 = vector.multi_reduction <add>, %306, %cst_100 [1] : vector<12x32xf32> to vector<12xf32>
    %308 = vector.shape_cast %307 : vector<12xf32> to vector<12x1xf32>
    %cst_101 = arith.constant 3.200000e+01 : f32
    %309 = vector.broadcast %cst_101 : f32 to vector<12x1xf32>
    %310 = arith.divf %308, %309 : vector<12x1xf32>
    %311 = vector.broadcast %303 : vector<12x1xf32> to vector<12x32xf32>
    %312 = arith.subf %297, %311 : vector<12x32xf32>
    %cst_102 = arith.constant 9.99999974E-6 : f32
    %313 = vector.broadcast %cst_102 : f32 to vector<12x1xf32>
    %314 = arith.addf %310, %313 : vector<12x1xf32>
    %315 = math.rsqrt %314 : vector<12x1xf32>
    %316 = vector.broadcast %315 : vector<12x1xf32> to vector<12x32xf32>
    %317 = arith.mulf %312, %316 : vector<12x32xf32>
    %318 = vector.broadcast %298 : vector<1x32xf32> to vector<12x32xf32>
    %319 = arith.mulf %317, %318 : vector<12x32xf32>
    %320 = vector.broadcast %299 : vector<1x32xf32> to vector<12x32xf32>
    %321 = arith.addf %319, %320 : vector<12x32xf32>
    %c0_103 = arith.constant 0 : index
    %c0_104 = arith.constant 0 : index
    %322 = vector.load %arg13[%c0_103, %c0_104] : memref<32x32xf32, #tpu.memory_space<vmem>>, vector<32x32xf32>
    %323 = arith.truncf %321 : vector<12x32xf32> to vector<12x32xbf16>
    %324 = arith.truncf %322 : vector<32x32xf32> to vector<32x32xbf16>
    %cst_105 = arith.constant dense<0.000000e+00> : vector<12x32xf32>
    %325 = tpu.matmul %323, %324, %cst_105 {dimension_numbers = #tpu.dot_dimension_numbers<[1], [0], [0], [1], [0, 0, 1, 1], [], []>} : vector<12x32xbf16>, vector<32x32xbf16>, vector<12x32xf32> -> vector<12x32xf32>
    %c0_106 = arith.constant 0 : index
    %c0_107 = arith.constant 0 : index
    %326 = vector.load %arg14[%c0_106, %c0_107] : memref<1x32xf32, #tpu.memory_space<vmem>>, vector<1x32xf32>
    %327 = vector.broadcast %326 : vector<1x32xf32> to vector<12x32xf32>
    %328 = arith.addf %325, %327 : vector<12x32xf32>
    %329 = arith.mulf %328, %328 : vector<12x32xf32>
    %330 = arith.mulf %328, %329 : vector<12x32xf32>
    %cst_108 = arith.constant 4.471500e-02 : f32
    %331 = vector.broadcast %cst_108 : f32 to vector<12x32xf32>
    %332 = arith.mulf %331, %330 : vector<12x32xf32>
    %333 = arith.addf %328, %332 : vector<12x32xf32>
    %cst_109 = arith.constant 0.797884583 : f32
    %334 = vector.broadcast %cst_109 : f32 to vector<12x32xf32>
    %335 = arith.mulf %334, %333 : vector<12x32xf32>
    %336 = math.tanh %335 : vector<12x32xf32>
    %cst_110 = arith.constant 1.000000e+00 : f32
    %337 = vector.broadcast %cst_110 : f32 to vector<12x32xf32>
    %338 = arith.addf %337, %336 : vector<12x32xf32>
    %cst_111 = arith.constant 5.000000e-01 : f32
    %339 = vector.broadcast %cst_111 : f32 to vector<12x32xf32>
    %340 = arith.mulf %339, %338 : vector<12x32xf32>
    %341 = arith.mulf %328, %340 : vector<12x32xf32>
    %c0_112 = arith.constant 0 : index
    %c0_113 = arith.constant 0 : index
    %342 = vector.load %arg15[%c0_112, %c0_113] : memref<32x32xf32, #tpu.memory_space<vmem>>, vector<32x32xf32>
    %343 = arith.truncf %341 : vector<12x32xf32> to vector<12x32xbf16>
    %344 = arith.truncf %342 : vector<32x32xf32> to vector<32x32xbf16>
    %cst_114 = arith.constant dense<0.000000e+00> : vector<12x32xf32>
    %345 = tpu.matmul %343, %344, %cst_114 {dimension_numbers = #tpu.dot_dimension_numbers<[1], [0], [0], [1], [0, 0, 1, 1], [], []>} : vector<12x32xbf16>, vector<32x32xbf16>, vector<12x32xf32> -> vector<12x32xf32>
    %c0_115 = arith.constant 0 : index
    %c0_116 = arith.constant 0 : index
    %346 = vector.load %arg16[%c0_115, %c0_116] : memref<1x32xf32, #tpu.memory_space<vmem>>, vector<1x32xf32>
    %347 = vector.broadcast %346 : vector<1x32xf32> to vector<12x32xf32>
    %348 = arith.addf %345, %347 : vector<12x32xf32>
    %349 = arith.addf %321, %348 : vector<12x32xf32>
    %c4 = arith.constant 4 : index
    %c0_117 = arith.constant 0 : index
    %350 = vector.load %arg17[%c4, %c0_117] : memref<6x32xf32, #tpu.memory_space<vmem>>, vector<1x32xf32>
    %c5 = arith.constant 5 : index
    %c0_118 = arith.constant 0 : index
    %351 = vector.load %arg17[%c5, %c0_118] : memref<6x32xf32, #tpu.memory_space<vmem>>, vector<1x32xf32>
    %cst_119 = arith.constant dense<0.000000e+00> : vector<12xf32>
    %352 = vector.multi_reduction <add>, %349, %cst_119 [1] : vector<12x32xf32> to vector<12xf32>
    %353 = vector.shape_cast %352 : vector<12xf32> to vector<12x1xf32>
    %cst_120 = arith.constant 3.200000e+01 : f32
    %354 = vector.broadcast %cst_120 : f32 to vector<12x1xf32>
    %355 = arith.divf %353, %354 : vector<12x1xf32>
    %356 = vector.broadcast %355 : vector<12x1xf32> to vector<12x32xf32>
    %357 = arith.subf %349, %356 : vector<12x32xf32>
    %358 = arith.mulf %357, %357 : vector<12x32xf32>
    %cst_121 = arith.constant dense<0.000000e+00> : vector<12xf32>
    %359 = vector.multi_reduction <add>, %358, %cst_121 [1] : vector<12x32xf32> to vector<12xf32>
    %360 = vector.shape_cast %359 : vector<12xf32> to vector<12x1xf32>
    %cst_122 = arith.constant 3.200000e+01 : f32
    %361 = vector.broadcast %cst_122 : f32 to vector<12x1xf32>
    %362 = arith.divf %360, %361 : vector<12x1xf32>
    %363 = vector.broadcast %355 : vector<12x1xf32> to vector<12x32xf32>
    %364 = arith.subf %349, %363 : vector<12x32xf32>
    %cst_123 = arith.constant 9.99999974E-6 : f32
    %365 = vector.broadcast %cst_123 : f32 to vector<12x1xf32>
    %366 = arith.addf %362, %365 : vector<12x1xf32>
    %367 = math.rsqrt %366 : vector<12x1xf32>
    %368 = vector.broadcast %367 : vector<12x1xf32> to vector<12x32xf32>
    %369 = arith.mulf %364, %368 : vector<12x32xf32>
    %370 = vector.broadcast %350 : vector<1x32xf32> to vector<12x32xf32>
    %371 = arith.mulf %369, %370 : vector<12x32xf32>
    %372 = vector.broadcast %351 : vector<1x32xf32> to vector<12x32xf32>
    %373 = arith.addf %371, %372 : vector<12x32xf32>
    %c0_124 = arith.constant 0 : index
    %c0_125 = arith.constant 0 : index
    %c0_126 = arith.constant 0 : index
    %374 = vector.load %arg18[%c0_124, %c0_125, %c0_126] : memref<1x12x32xf32, #tpu.memory_space<vmem>>, vector<1x12x32xf32>
    %375 = vector.shape_cast %374 : vector<1x12x32xf32> to vector<12x32xf32>
    %376 = vector.shape_cast %373 : vector<12x32xf32> to vector<1x12x32xf32>
    tpu.vector_store %arg18[%c0_124, %c0_125, %c0_126], %376 {strides = array<i32>} : memref<1x12x32xf32, #tpu.memory_space<vmem>>, vector<1x12x32xf32>,
    return
  }
  func.func @transform_0(%arg0: i32) -> (i32, i32, i32) {
    %c0_i32 = arith.constant 0 : i32
    %c0_i32_0 = arith.constant 0 : i32
    %c0_i32_1 = arith.constant 0 : i32
    return %arg0, %c0_i32, %c0_i32_0 : i32, i32, i32
  }
  func.func @transform_1(%arg0: i32) -> (i32, i32, i32) {
    %c0_i32 = arith.constant 0 : i32
    %c0_i32_0 = arith.constant 0 : i32
    %c0_i32_1 = arith.constant 0 : i32
    return %arg0, %c0_i32, %c0_i32_0 : i32, i32, i32
  }
  func.func @transform_2(%arg0: i32) -> (i32, i32) {
    %c0_i32 = arith.constant 0 : i32
    %c0_i32_0 = arith.constant 0 : i32
    %c0_i32_1 = arith.constant 0 : i32
    return %c0_i32, %c0_i32_0 : i32, i32
  }
  func.func @transform_3(%arg0: i32) -> (i32, i32) {
    %c0_i32 = arith.constant 0 : i32
    %c0_i32_0 = arith.constant 0 : i32
    %c0_i32_1 = arith.constant 0 : i32
    return %c0_i32, %c0_i32_0 : i32, i32
  }
  func.func @transform_4(%arg0: i32) -> (i32, i32) {
    %c0_i32 = arith.constant 0 : i32
    %c0_i32_0 = arith.constant 0 : i32
    %c0_i32_1 = arith.constant 0 : i32
    return %c0_i32, %c0_i32_0 : i32, i32
  }
  func.func @transform_5(%arg0: i32) -> (i32, i32) {
    %c0_i32 = arith.constant 0 : i32
    %c0_i32_0 = arith.constant 0 : i32
    %c0_i32_1 = arith.constant 0 : i32
    return %c0_i32, %c0_i32_0 : i32, i32
  }
  func.func @transform_6(%arg0: i32) -> (i32, i32) {
    %c0_i32 = arith.constant 0 : i32
    %c0_i32_0 = arith.constant 0 : i32
    %c0_i32_1 = arith.constant 0 : i32
    return %c0_i32, %c0_i32_0 : i32, i32
  }
  func.func @transform_7(%arg0: i32) -> (i32, i32) {
    %c0_i32 = arith.constant 0 : i32
    %c0_i32_0 = arith.constant 0 : i32
    %c0_i32_1 = arith.constant 0 : i32
    return %c0_i32, %c0_i32_0 : i32, i32
  }
  func.func @transform_8(%arg0: i32) -> (i32, i32) {
    %c0_i32 = arith.constant 0 : i32
    %c0_i32_0 = arith.constant 0 : i32
    %c0_i32_1 = arith.constant 0 : i32
    return %c0_i32, %c0_i32_0 : i32, i32
  }
  func.func @transform_9(%arg0: i32) -> (i32, i32) {
    %c0_i32 = arith.constant 0 : i32
    %c0_i32_0 = arith.constant 0 : i32
    %c0_i32_1 = arith.constant 0 : i32
    return %c0_i32, %c0_i32_0 : i32, i32
  }
  func.func @transform_10(%arg0: i32) -> (i32, i32) {
    %c0_i32 = arith.constant 0 : i32
    %c0_i32_0 = arith.constant 0 : i32
    %c0_i32_1 = arith.constant 0 : i32
    return %c0_i32, %c0_i32_0 : i32, i32
  }
  func.func @transform_11(%arg0: i32) -> (i32, i32) {
    %c0_i32 = arith.constant 0 : i32
    %c0_i32_0 = arith.constant 0 : i32
    %c0_i32_1 = arith.constant 0 : i32
    return %c0_i32, %c0_i32_0 : i32, i32
  }
  func.func @transform_12(%arg0: i32) -> (i32, i32) {
    %c0_i32 = arith.constant 0 : i32
    %c0_i32_0 = arith.constant 0 : i32
    %c0_i32_1 = arith.constant 0 : i32
    return %c0_i32, %c0_i32_0 : i32, i32
  }
  func.func @transform_13(%arg0: i32) -> (i32, i32) {
    %c0_i32 = arith.constant 0 : i32
    %c0_i32_0 = arith.constant 0 : i32
    %c0_i32_1 = arith.constant 0 : i32
    return %c0_i32, %c0_i32_0 : i32, i32
  }
  func.func @transform_14(%arg0: i32) -> (i32, i32) {
    %c0_i32 = arith.constant 0 : i32
    %c0_i32_0 = arith.constant 0 : i32
    %c0_i32_1 = arith.constant 0 : i32
    return %c0_i32, %c0_i32_0 : i32, i32
  }
  func.func @transform_15(%arg0: i32) -> (i32, i32) {
    %c0_i32 = arith.constant 0 : i32
    %c0_i32_0 = arith.constant 0 : i32
    %c0_i32_1 = arith.constant 0 : i32
    return %c0_i32, %c0_i32_0 : i32, i32
  }
  func.func @transform_16(%arg0: i32) -> (i32, i32) {
    %c0_i32 = arith.constant 0 : i32
    %c0_i32_0 = arith.constant 0 : i32
    %c0_i32_1 = arith.constant 0 : i32
    return %c0_i32, %c0_i32_0 : i32, i32
  }
  func.func @transform_17(%arg0: i32) -> (i32, i32, i32) {
    %c0_i32 = arith.constant 0 : i32
    %c0_i32_0 = arith.constant 0 : i32
    %c0_i32_1 = arith.constant 0 : i32
    return %arg0, %c0_i32, %c0_i32_0 : i32, i32, i32
  }
}

</mosaic_0001>

<bundles_post_ra>
// kernel: informer_stack_forward.8
= control target key start
LH: loop header
LB: loop body
LE: loop exit
PB: predicated region body
PF: predicated region fallthrough
CT: control target
= control target key end

     0   :  { %s478_s18 = smov 0   ;;  %s515_s0 = inlined_call_operand.vmem [shape: f32[2,16,4], index: 0, kind: input, shape index: {}]   ;;  %s516_s1 = inlined_call_operand.vmem [shape: f32[2,16,32], index: 1, kind: input, shape index: {}]   ;;  %s517_s2 = inlined_call_operand.vmem [shape: f32[4,32], index: 2, kind: input, shape index: {}]   ;;  %s518_s3 = inlined_call_operand.vmem [shape: f32[4,32], index: 3, kind: input, shape index: {}]   ;;  %s519_s4 = inlined_call_operand.vmem [shape: f32[4,32], index: 4, kind: input, shape index: {}]   ;;  %s520_s5 = inlined_call_operand.vmem [shape: f32[2,16,32], index: 5, kind: output, shape index: {}]  }
   0x1 LB: > { %s413_s19 = sadd.s32 4294967295, %s446_s18   ;;  %p417_p0 = scmp.ge.s32.totalorder %s446_s18, 1  ;;  %s446_s18 = sphi %s478_s18, %s15_s18  }
   0x2   : > { %p197_p1 = scmp.lt.s32.totalorder %s446_s18, 3 }
   0x4   : > { %p198_p2 = pnand %p417_p0, %p197_p1 }
   0x5   : > { %p230_p3 = scmp.lt.s32.totalorder (!%p198_p2), %s413_s19, 1 }
   0x6   : > { %201 = sbr.rel (%p198_p2) target bundleno = 166 (0xa6), region = 40 }
   0xb   : > { %v269_v0 = vld [vmem:[%s518_s3] sm:$0xf]  ;;  %vm276_vm0 = vcmask 1041408   ;;  %s522_s19 = smov (!%p230_p3, %s413_s19), 1  ;;  %vm272_vm1 = vcmask 31744   ;;  %vm252_vm2 = vcmask 1040384  }
   0xc   : > { %v271_v1 = vpack.c.bf16 %v269_v0, %v269_v0  ;;  %v266_v2 = vld [vmem:[%s517_s2] sm:$0xf]  ;;  %s495_s26 = sshll.u32 %s522_s19, 4  ;;  %vm258_vm3 = vcmask 1046528   ;;  %vm343_vm4 = vcmask 261120  }
   0xd   : > { %v314_v3 = vld [vmem:[%s519_s4] sm:$0xf]  ;;  %v268_v4 = vpack.c.bf16 %v266_v2, %v266_v2  ;;  %s234_s29 = scalar_lea.vmem %s515_s0, %s495_s26  ;;  %s239_s7 = scalar_lea.vmem %s516_s1, %s495_s26 }
   0xe   : > { %v316_v5 = vpack.c.bf16 %v314_v3, %v314_v3  ;;  %v278_v6 = vsel %vm276_vm0, %v271_v1, 0  ;;  %v246_v9 = vld [vmem:[%s234_s29] sm:$0xff]  ;;  %v247_v10 = vld [vmem:[%s234_s29 + $0x8] sm:$0xff]  ;;  %s244_s10 = scalar_lea.vmem %s520_s5, %s495_s26 }
   0xf   : > { %287 = vmatpush.bf16.msra.mxu0 %v278_v6  ;;  %v298_v7 = vsel %vm276_vm0, %v268_v4, 0  ;;  %v249_v11 = vrot.slane %v247_v10, 7  ;;  %v253_v12 = vrot.slane %v246_v9, 7  ;;  %v259_v13 = vrot.slane %v246_v9, 1  ;;  %v339_v26 = vld [vmem:[%s239_s7] sm:$0xff]  ;;  %v340_v33 = vld [vmem:[%s239_s7 + $0x8] sm:$0xff] }
  0x10   : > { %v321_v8 = vsel %vm276_vm0, %v316_v5, 0  ;;  %307 = vmatpush.bf16.msra.mxu1 %v298_v7  ;;  %v260_v14 = vrot.slane %v247_v10, 1  ;;  %v270_v15 = vpack.c.bf16 %v247_v10, %v246_v9 }
  0x11   : > { %330 = vmatpush.bf16.msra.mxu2 %v321_v8  ;;  %v254_v16 = vsel %vm252_vm2, %v253_v12, %v249_v11  ;;  %v257_v17 = vsel %vm252_vm2, %v249_v11, %v253_v12 }
  0x12   : > { %v261_v18 = vsel %vm258_vm3, %v259_v13, %v260_v14  ;;  %v265_v19 = vsel %vm258_vm3, %v260_v14, %v259_v13  ;;  %424 = vmatmul.msk.bf16.vlgmr.msra.gmra.mxu0 %vm272_vm1, %v270_v15  ;;  %v267_v20 = vpack.c.bf16 %v254_v16, %v257_v17 }
  0x13   : > { %v315_v21 = vpack.c.bf16 %v265_v19, %v261_v18 }
  0x14   : > { %425 = vmatmul.msk.bf16.vlgmr.msra.gmra.mxu1 %vm272_vm1, %v267_v20 }
  0x15   : > { %426 = vmatmul.msk.bf16.vlgmr.msra.gmra.mxu2 %vm272_vm1, %v315_v21 }
  0x8f   : > { %v289_v23 = vpop.f32.mrf.mxu0 }
  0x91   : > { %v309_v22 = vpop.f32.mrf.mxu1 }
  0x92   : > { %v310_v24 = vadd.f32 %v309_v22, %v289_v23 }
  0x97   : > { %v291_v30 = vpop.f32.mrf.mxu0 }
  0x98   : > { %v332_v25 = vpop.f32.mrf.mxu2 }
  0x99   : > { %v337_v27 = vadd.f32 %v332_v25, %v310_v24  ;;  %v311_v29 = vpop.f32.mrf.mxu1 }
  0x9a   : > { %v312_v31 = vadd.f32 %v311_v29, %v291_v30 }
  0x9b   : > { %v341_v28 = vadd.f32 %v339_v26, %v337_v27 }
  0x9d   : > { %344 = vst.msk [vmem:[%s244_s10] sm:$0xff] %vm343_vm4, %v341_v28 }
  0xa0   : > { %v334_v32 = vpop.f32.mrf.mxu2 }
  0xa1   : > { %v338_v34 = vadd.f32 %v334_v32, %v312_v31 }
  0xa3   : > { %v342_v35 = vadd.f32 %v340_v33, %v338_v34 }
  0xa5   : > { %345 = vst.msk [vmem:[%s244_s10 + $0x8] sm:$0xff] %vm343_vm4, %v342_v35 }
  0xa6 PF: > { %s15_s18 = sadd.s32 1, %s446_s18  }
  0xa7   : > { %p12_p4 = scmp.ge.s32.totalorder %s15_s18, 4  }
  0xa9   :  { %14 = sbr.rel (!%p12_p4) target bundleno = 1 (0x1), region = 73 }

// kernel: informer_stack_forward.10
= control target key start
LH: loop header
LB: loop body
LE: loop exit
PB: predicated region body
PF: predicated region fallthrough
CT: control target
= control target key end

     0   :  { %vm31_vm0 = vcmask 1040384   ;;  %vm37_vm1 = vcmask 1046528   ;;  %vm59_vm2 = vcmask 261120   ;;  %v381_v63 = vmov 32.0   ;;  %s520_s2 = inlined_call_operand.vmem [shape: f32[32,32], index: 2, kind: input, shape index: {}]   ;;  %s521_s1 = inlined_call_operand.vmem [shape: f32[32,32], index: 1, kind: input, shape index: {}]   ;;  %s522_s3 = inlined_call_operand.vmem [shape: f32[32,32], index: 3, kind: input, shape index: {}]   ;;  %s523_s0 = inlined_call_operand.vmem [shape: f32[2,16,32], index: 0, kind: input, shape index: {}]   ;;  %s524_s4 = inlined_call_operand.vmem [shape: f32[1,32], index: 4, kind: input, shape index: {}]   ;;  %s525_s5 = inlined_call_operand.vmem [shape: f32[2,32], index: 5, kind: input, shape index: {}]   ;;  %s526_s6 = inlined_call_operand.vmem [shape: f32[2,16,32], index: 6, kind: output, shape index: {}]  }
   0x1   :  { %v54_v0 = vld [vmem:[%s520_s2 + $0x10] sm:$0xff]  ;;  %v55_v1 = vld [vmem:[%s520_s2 + $0x18] sm:$0xff]  ;;  %v52_v9 = vld [vmem:[%s520_s2] sm:$0xff]  ;;  %369 = vrcp.f32 %v381_v63 }
   0x2   :  { %v47_v2 = vld [vmem:[%s521_s1 + $0x10] sm:$0xff]  ;;  %v58_v3 = vpack.c.bf16 %v55_v1, %v54_v0  ;;  %v48_v4 = vld [vmem:[%s521_s1 + $0x18] sm:$0xff]  ;;  %v53_v10 = vld [vmem:[%s520_s2 + $0x8] sm:$0xff] }
   0x3   :  { %v96_v5 = vld [vmem:[%s522_s3 + $0x10] sm:$0xff]  ;;  %v97_v6 = vld [vmem:[%s522_s3 + $0x18] sm:$0xff]  ;;  %v51_v7 = vpack.c.bf16 %v48_v4, %v47_v2  ;;  %v45_v11 = vld [vmem:[%s521_s1] sm:$0xff]  ;;  %v57_v12 = vpack.c.bf16 %v53_v10, %v52_v9 }
   0x4   :  { %v100_v8 = vpack.c.bf16 %v97_v6, %v96_v5  ;;  %69 = vmatpush.bf16.msra.mxu0 %v58_v3  ;;  %155 = vmatpush.bf16.msra.mxu3 %v58_v3  ;;  %v46_v13 = vld [vmem:[%s521_s1 + $0x8] sm:$0xff]  ;;  %v94_v14 = vld [vmem:[%s522_s3] sm:$0xff]  ;;  %v354_v24 = vld [vmem:[%s523_s0 + $0x10] sm:$0xff] }
   0x5   :  { %v95_v15 = vld [vmem:[%s522_s3 + $0x8] sm:$0xff]  ;;  %86 = vmatpush.bf16.msra.mxu1 %v51_v7  ;;  %v50_v16 = vpack.c.bf16 %v46_v13, %v45_v11  ;;  %v25_v18 = vld [vmem:[%s523_s0] sm:$0xff]  ;;  %v355_v25 = vld [vmem:[%s523_s0 + $0x18] sm:$0xff]  ;;  %v132_v35 = vrot.slane %v354_v24, 7  ;;  %v137_v36 = vrot.slane %v354_v24, 1 }
   0x6   :  { %110 = vmatpush.bf16.msra.mxu2 %v100_v8  ;;  %v99_v17 = vpack.c.bf16 %v95_v15, %v94_v14  ;;  %v26_v19 = vld [vmem:[%s523_s0 + $0x8] sm:$0xff]  ;;  %v32_v21 = vrot.slane %v25_v18, 7  ;;  %v38_v22 = vrot.slane %v25_v18, 1  ;;  %v145_v32 = vpack.c.bf16 %v355_v25, %v354_v24  ;;  %v366_v51 = vld [vmem:[%s524_s4] ss:$0 sm:$0xff] }
   0x7   :  { %v28_v20 = vrot.slane %v26_v19, 7  ;;  %v39_v23 = vrot.slane %v26_v19, 1  ;;  %v56_v26 = vpack.c.bf16 %v26_v19, %v25_v18  ;;  %v129_v34 = vrot.slane %v355_v25, 7  ;;  %v370_v6 = vpop.eup %369 }
   0x8   :  { %70 = vmatpush.bf16.msra.mxu0 %v57_v12  ;;  %156 = vmatpush.bf16.msra.mxu3 %v57_v12  ;;  %v138_v37 = vrot.slane %v355_v25, 1  ;;  %v223_v12 = vmul.f32 32.0, %v370_v6  ;;  %vm227_vm3 = vweird.f32 %v370_v6 }
   0x9   :  { %v33_v27 = vsel %vm31_vm0, %v32_v21, %v28_v20  ;;  %v36_v28 = vsel %vm31_vm0, %v28_v20, %v32_v21  ;;  %v40_v29 = vsel %vm37_vm1, %v38_v22, %v39_v23  ;;  %87 = vmatpush.bf16.msra.mxu1 %v50_v16  ;;  %v44_v31 = vsel %vm37_vm1, %v39_v23, %v38_v22 }
   0xa   :  { %111 = vmatpush.bf16.msra.mxu2 %v99_v17  ;;  %v49_v30 = vpack.c.bf16 %v33_v27, %v36_v28  ;;  %v98_v33 = vpack.c.bf16 %v44_v31, %v40_v29  ;;  %v133_v38 = vsel %vm31_vm0, %v132_v35, %v129_v34  ;;  %v136_v39 = vsel %vm31_vm0, %v129_v34, %v132_v35 }
   0xb   :  { %351 = vmatmul.msk.bf16.vlgmr.msra.gmra.mxu0 %vm59_vm2, %v56_v26  ;;  %356 = vmatmul.msk.bf16.vlgmr.msra.gmra.mxu3 %vm59_vm2, %v145_v32  ;;  %v139_v40 = vsel %vm37_vm1, %v137_v36, %v138_v37  ;;  %v143_v41 = vsel %vm37_vm1, %v138_v37, %v137_v36  ;;  %v144_v42 = vpack.c.bf16 %v133_v38, %v136_v39 }
   0xc   :  { %172 = vmatpush.bf16.msrb.mxu0 %v51_v7  ;;  %352 = vmatmul.msk.bf16.vlgmr.msra.gmra.mxu1 %vm59_vm2, %v49_v30  ;;  %v180_v43 = vpack.c.bf16 %v143_v41, %v139_v40 }
   0xd   :  { %190 = vmatpush.bf16.msrb.mxu1 %v100_v8  ;;  %353 = vmatmul.msk.bf16.vlgmr.msra.gmra.mxu2 %vm59_vm2, %v98_v33 }
  0x10   :  { %173 = vmatpush.bf16.msrb.mxu0 %v50_v16 }
  0x11   :  { %191 = vmatpush.bf16.msrb.mxu1 %v99_v17  ;;  %v224_v17 = vsub.f32 1.0, %v223_v12 }
  0x13   :  { %v225_v21 = vmul.f32 %v370_v6, %v224_v17 }
  0x15   :  { %v226_v25 = vadd.f32 %v370_v6, %v225_v21 }
  0x17   :  { %v228_v29 = vsel %vm227_vm3, %v370_v6, %v226_v25 }
  0x1b   :  { %357 = vmatmul.msk.bf16.vlgmr.msrb.gmra.mxu0 %vm59_vm2, %v144_v42 }
  0x1c   :  { %358 = vmatmul.msk.bf16.vlgmr.msrb.gmra.mxu1 %vm59_vm2, %v180_v43 }
  0x88   :  { %v72_v44 = vpop.f32.mrf.mxu0 }
  0x89   :  { %v89_v45 = vpop.f32.mrf.mxu1 }
  0x8a   :  { %v90_v49 = vadd.f32 %v89_v45, %v72_v44 }
  0x8e   :  { %v158_v53 = vpop.f32.mrf.mxu3 }
  0x90   :  { %v113_v46 = vpop.f32.mrf.mxu2  ;;  %v74_v47 = vpop.f32.mrf.mxu0 }
  0x91   :  { %v91_v48 = vpop.f32.mrf.mxu1  ;;  %v118_v50 = vadd.f32 %v113_v46, %v90_v49 }
  0x92   :  { %v92_v52 = vadd.f32 %v91_v48, %v74_v47 }
  0x93   :  { %v123_v55 = vadd.f32 %v366_v51, %v118_v50 }
  0x95   :  { %v202_v61 = vsel %vm59_vm2, %v123_v55, 0.0 }
  0x96   :  { %v160_v3 = vpop.f32.mrf.mxu3 }
  0x98   :  { %v115_v54 = vpop.f32.mrf.mxu2  ;;  %v175_v57 = vpop.f32.mrf.mxu0 }
  0x99   :  { %v119_v56 = vadd.f32 %v115_v54, %v92_v52  ;;  %v193_v58 = vpop.f32.mrf.mxu1  ;;  %v176_v60 = vadd.f32 %v175_v57, %v158_v53 }
  0x9b   :  { %v124_v59 = vadd.f32 %v366_v51, %v119_v56  ;;  %v198_v1 = vadd.f32 %v193_v58, %v176_v60 }
  0x9d   :  { %v203_v62 = vsel %vm59_vm2, %v124_v59, 0.0  ;;  %v200_v8 = vadd.f32 %v366_v51, %v198_v1 }
  0x9e   :  { %v204_v0 = vadd.f32 %v203_v62, %v202_v61 }
  0x9f   :  { %v212_v13 = vsel %vm59_vm2, %v200_v8, 0.0 }
  0xa0   :  { %v205_v2 = vrot.slane %v204_v0, 4  ;;  %v177_v4 = vpop.f32.mrf.mxu0 }
  0xa1   :  { %v178_v5 = vadd.f32 %v177_v4, %v160_v3  ;;  %v195_v7 = vpop.f32.mrf.mxu1  ;;  %v367_v3 = vld [vmem:[%s525_s5] ss:$0 sm:$0xff] }
  0xa2   :  { %v206_v10 = vadd.f32 %v205_v2, %v204_v0 }
  0xa3   :  { %v199_v9 = vadd.f32 %v195_v7, %v178_v5  ;;  %v368_v7 = vld [vmem:[%s525_s5 + $0x1] ss:$0 sm:$0xff] }
  0xa4   :  { %v207_v15 = vrot.slane %v206_v10, 2 }
  0xa5   :  { %v201_v11 = vadd.f32 %v366_v51, %v199_v9 }
  0xa6   :  { %v208_v19 = vadd.f32 %v207_v15, %v206_v10 }
  0xa7   :  { %v213_v14 = vsel %vm59_vm2, %v201_v11, 0.0 }
  0xa8   :  { %v214_v16 = vadd.f32 %v213_v14, %v212_v13  ;;  %v209_v23 = vrot.slane %v208_v19, 1 }
  0xaa   :  { %v215_v18 = vrot.slane %v214_v16, 4  ;;  %v210_v27 = vadd.f32 %v209_v23, %v208_v19 }
  0xac   :  { %v216_v20 = vadd.f32 %v215_v18, %v214_v16 }
  0xae   :  { %v217_v22 = vrot.slane %v216_v20, 2 }
  0xb0   :  { %v218_v24 = vadd.f32 %v217_v22, %v216_v20 }
  0xb2   :  { %v219_v26 = vrot.slane %v218_v24, 1 }
  0xb4   :  { %v220_v28 = vadd.f32 %v219_v26, %v218_v24 }
  0xb6   :  { %v221_v30 = vadd.f32 %v220_v28, %v210_v27 }
  0xb8   :  { %v229_v31 = vmul.f32 %v228_v29, %v221_v30 }
  0xba   :  { %v230_v32 = vsub.f32 %v123_v55, %v229_v31  ;;  %v231_v33 = vsub.f32 %v124_v59, %v229_v31  ;;  %v244_v34 = vsub.f32 %v200_v8, %v229_v31  ;;  %v245_v35 = vsub.f32 %v201_v11, %v229_v31 }
  0xbc   :  { %v232_v36 = vmul.f32 %v230_v32, %v230_v32  ;;  %v233_v37 = vmul.f32 %v231_v33, %v231_v33  ;;  %v246_v38 = vmul.f32 %v244_v34, %v244_v34  ;;  %v247_v39 = vmul.f32 %v245_v35, %v245_v35 }
  0xbe   :  { %v234_v40 = vsel %vm59_vm2, %v232_v36, 0.0  ;;  %v235_v41 = vsel %vm59_vm2, %v233_v37, 0.0  ;;  %v248_v42 = vsel %vm59_vm2, %v246_v38, 0.0  ;;  %v249_v43 = vsel %vm59_vm2, %v247_v39, 0.0 }
  0xbf   :  { %v236_v44 = vadd.f32 %v235_v41, %v234_v40  ;;  %v250_v45 = vadd.f32 %v249_v43, %v248_v42 }
  0xc1   :  { %v237_v46 = vrot.slane %v236_v44, 4  ;;  %v251_v47 = vrot.slane %v250_v45, 4 }
  0xc3   :  { %v238_v48 = vadd.f32 %v237_v46, %v236_v44  ;;  %v252_v49 = vadd.f32 %v251_v47, %v250_v45 }
  0xc5   :  { %v239_v50 = vrot.slane %v238_v48, 2  ;;  %v253_v51 = vrot.slane %v252_v49, 2 }
  0xc7   :  { %v240_v52 = vadd.f32 %v239_v50, %v238_v48  ;;  %v254_v53 = vadd.f32 %v253_v51, %v252_v49 }
  0xc9   :  { %v241_v54 = vrot.slane %v240_v52, 1  ;;  %v255_v55 = vrot.slane %v254_v53, 1 }
  0xcb   :  { %v242_v56 = vadd.f32 %v241_v54, %v240_v52  ;;  %v256_v57 = vadd.f32 %v255_v55, %v254_v53 }
  0xcd   :  { %v257_v58 = vadd.f32 %v256_v57, %v242_v56 }
  0xcf   :  { %v258_v59 = vmul.f32 %v257_v58, %v228_v29 }
  0xd1   :  { %v259_v60 = vadd.f32 1e-05, %v258_v59 }
  0xd3   :  { %371 = vrsqrt.f32 %v259_v60  ;;  %vm266_vm5 = vweird.f32 %v259_v60 }
  0xd9   :  { %v372_v61 = vpop.eup %371 }
  0xda   :  { %v261_v62 = vmul.f32 %v372_v61, %v259_v60  ;;  %vm267_vm4 = vweird.f32 %v372_v61 }
  0xdb   :  { %vm268_vm6 = vmor %vm266_vm5, %vm267_vm4 }
  0xdc   :  { %v262_v63 = vmul.f32 %v372_v61, %v261_v62 }
  0xde   :  { %v263_v0 = vmul.f32 0.5, %v262_v63 }
  0xe0   :  { %v264_v1 = vsub.f32 1.5, %v263_v0 }
  0xe2   :  { %v265_v2 = vmul.f32 %v372_v61, %v264_v1 }
  0xe4   :  { %v269_v4 = vsel %vm268_vm6, %v372_v61, %v265_v2 }
  0xe5   :  { %v272_v5 = vmul.f32 %v269_v4, %v230_v32  ;;  %v273_v6 = vmul.f32 %v269_v4, %v231_v33  ;;  %v310_v8 = vmul.f32 %v269_v4, %v244_v34  ;;  %v311_v9 = vmul.f32 %v269_v4, %v245_v35 }
  0xe7   :  { %v275_v10 = vmul.f32 %v367_v3, %v272_v5  ;;  %v276_v11 = vmul.f32 %v367_v3, %v273_v6  ;;  %v312_v12 = vmul.f32 %v367_v3, %v310_v8  ;;  %v313_v13 = vmul.f32 %v367_v3, %v311_v9 }
  0xe9   :  { %v278_v14 = vadd.f32 %v368_v7, %v275_v10  ;;  %v279_v15 = vadd.f32 %v368_v7, %v276_v11  ;;  %v314_v16 = vadd.f32 %v368_v7, %v312_v12  ;;  %v315_v17 = vadd.f32 %v368_v7, %v313_v13 }
  0xeb   :  { %v282_v18 = vmul.f32 1.442695, %v278_v14  ;;  %v284_v19 = vmul.f32 1.442695, %v279_v15  ;;  %v318_v20 = vmul.f32 1.442695, %v314_v16 }
  0xec   :  { %v320_v21 = vmul.f32 1.442695, %v315_v17  ;;  %vm280_vm7 = vcmp.gt.f32.partialorder %v278_v14, 0.0  ;;  %vm281_vm8 = vcmp.gt.f32.partialorder %v279_v15, 0.0  ;;  %vm316_vm9 = vcmp.gt.f32.partialorder %v314_v16, 0.0 }
  0xed   :  { %373 = vpow2.f32 %v282_v18  ;;  %vm317_vm10 = vcmp.gt.f32.partialorder %v315_v17, 0.0 }
  0xee   :  { %375 = vpow2.f32 %v284_v19 }
  0xef   :  { %377 = vpow2.f32 %v318_v20 }
  0xf0   :  { %379 = vpow2.f32 %v320_v21 }
  0xf3   :  { %v374_v22 = vpop.eup %373 }
  0xf4   :  { %v376_v23 = vpop.eup %375  ;;  %v359_v24 = vadd.f32 -1.0, %v374_v22 }
  0xf5   :  { %v378_v25 = vpop.eup %377  ;;  %v360_v26 = vadd.f32 -1.0, %v376_v23 }
  0xf6   :  { %v380_v27 = vpop.eup %379  ;;  %v288_v28 = vsel %vm280_vm7, %v278_v14, %v359_v24  ;;  %v361_v29 = vadd.f32 -1.0, %v378_v25 }
  0xf7   :  { %v289_v30 = vsel %vm281_vm8, %v279_v15, %v360_v26  ;;  %v292_v31 = vrot.slane %v288_v28, 7  ;;  %v298_v32 = vrot.slane %v288_v28, 1  ;;  %v362_v33 = vadd.f32 -1.0, %v380_v27 }
  0xf8   :  { %v293_v34 = vrot.slane %v289_v30, 7  ;;  %v299_v35 = vrot.slane %v289_v30, 1  ;;  %v324_v36 = vsel %vm316_vm9, %v314_v16, %v361_v29 }
  0xf9   :  { %v297_v37 = vsel %vm31_vm0, -inf, %v292_v31  ;;  %v325_v38 = vsel %vm317_vm10, %v315_v17, %v362_v33  ;;  %v328_v39 = vrot.slane %v324_v36, 7  ;;  %v334_v40 = vrot.slane %v324_v36, 1 }
  0xfa   :  { %v294_v41 = vsel %vm31_vm0, %v292_v31, %v293_v34  ;;  %v300_v42 = vsel %vm37_vm1, %v298_v32, %v299_v35  ;;  %v304_v43 = vmax.f32 %v297_v37, %v288_v28  ;;  %v329_v45 = vrot.slane %v325_v38, 7 }
  0xfb   :  { %v305_v44 = vmax.f32 %v294_v41, %v289_v30  ;;  %v333_v46 = vsel %vm31_vm0, -inf, %v328_v39  ;;  %v335_v47 = vrot.slane %v325_v38, 1  ;;  %v303_v48 = vsel %vm37_vm1, %v299_v35, -inf }
  0xfc   :  { %v306_v49 = vmax.f32 %v304_v43, %v300_v42  ;;  %v340_v50 = vmax.f32 %v333_v46, %v324_v36  ;;  %v330_v52 = vsel %vm31_vm0, %v328_v39, %v329_v45 }
  0xfd   :  { %v307_v51 = vmax.f32 %v305_v44, %v303_v48  ;;  %v336_v53 = vsel %vm37_vm1, %v334_v40, %v335_v47  ;;  %v341_v54 = vmax.f32 %v330_v52, %v325_v38  ;;  %v339_v56 = vsel %vm37_vm1, %v335_v47, -inf }
  0xfe   :  { %308 = vst.msk [vmem:[%s526_s6] sm:$0xff] %vm59_vm2, %v306_v49  ;;  %v342_v55 = vmax.f32 %v340_v50, %v336_v53 }
  0xff   :  { %309 = vst.msk [vmem:[%s526_s6 + $0x8] sm:$0xff] %vm59_vm2, %v307_v51  ;;  %v343_v57 = vmax.f32 %v341_v54, %v339_v56 }
 0x100   :  { %363 = vst.msk [vmem:[%s526_s6 + $0x10] sm:$0xff] %vm59_vm2, %v342_v55 }
 0x101   :  { %364 = vst.msk [vmem:[%s526_s6 + $0x18] sm:$0xff] %vm59_vm2, %v343_v57 }

// kernel: informer_stack_forward.9
= control target key start
LH: loop header
LB: loop body
LE: loop exit
PB: predicated region body
PF: predicated region fallthrough
CT: control target
= control target key end

     0   :  { %s1172_s13 = smov 0   ;;  %s1358_s0 = inlined_call_operand.vmem [shape: f32[2,16,32], index: 0, kind: input, shape index: {}]   ;;  %s1359_s1 = inlined_call_operand.vmem [shape: f32[32,96], index: 1, kind: input, shape index: {}]   ;;  %s1360_s2 = inlined_call_operand.vmem [shape: f32[1,96], index: 2, kind: input, shape index: {}]   ;;  %s1361_s3 = inlined_call_operand.vmem [shape: f32[32,32], index: 3, kind: input, shape index: {}]   ;;  %s1362_s4 = inlined_call_operand.vmem [shape: f32[1,32], index: 4, kind: input, shape index: {}]   ;;  %s1363_s5 = inlined_call_operand.vmem [shape: f32[32,32], index: 5, kind: input, shape index: {}]   ;;  %s1364_s6 = inlined_call_operand.vmem [shape: f32[1,32], index: 6, kind: input, shape index: {}]   ;;  %s1365_s7 = inlined_call_operand.vmem [shape: f32[32,32], index: 7, kind: input, shape index: {}]   ;;  %s1366_s8 = inlined_call_operand.vmem [shape: f32[1,32], index: 8, kind: input, shape index: {}]   ;;  %s1367_s9 = inlined_call_operand.vmem [shape: f32[4,32], index: 9, kind: input, shape index: {}]   ;;  %s1368_s10 = inlined_call_operand.vmem [shape: f32[2,16,32], index: 10, kind: output, shape index: {}]  }
   0x1 LB: > { %s977_s14 = sadd.s32 4294967295, %s1100_s13   ;;  %p981_p0 = scmp.ge.s32.totalorder %s1100_s13, 1  ;;  %s1100_s13 = sphi %s1172_s13, %s20_s13  }
   0x2   : > { %p312_p1 = scmp.lt.s32.totalorder %s1100_s13, 3 }
   0x4   : > { %p313_p2 = pnand %p981_p0, %p312_p1 }
   0x5   : > { %p350_p3 = scmp.lt.s32.totalorder (!%p313_p2), %s977_s14, 1  ;;  %s1102_s29 = smov (!%p313_p2), 104  }
   0x6   : > { %316 = sbr.rel (%p313_p2) target bundleno = 1952 (0x7a0), region = 60  ;;  %s1103_s30 = smov (!%p313_p2), 120  }
   0x7   : > { %s1104_s11 = smov (!%p313_p2), 96   ;;  %s1105_s12 = smov (!%p313_p2), 80  }
   0x8   : > { %s1106_s15 = smov (!%p313_p2), 72   ;;  %s1107_s16 = smov (!%p313_p2), 88  }
   0x9   : > { %s1108_s17 = smov (!%p313_p2), 112   ;;  %s1109_s18 = smov (!%p313_p2), 64  }
   0xa   : > { %s1110_s19 = smov (!%p313_p2), 56   ;;  %s1111_s20 = smov (!%p313_p2), 40  }
   0xb   : > { %v365_v0 = vld [vmem:[%s1359_s1 + $0x10] sm:$0xff]  ;;  %v366_v1 = vld [vmem:[%s1359_s1 + $0x18] sm:$0xff]  ;;  %v363_v2 = vld [vmem:[%s1359_s1] sm:$0xff]  ;;  %s1370_s14 = smov (!%p350_p3, %s977_s14), 1  ;;  %vm374_vm0 = vcmask 261120   ;;  %vm396_vm1 = vcmask 64512  }
   0xc   : > { %v369_v3 = vpack.c.bf16 %v366_v1, %v365_v0  ;;  %v364_v4 = vld [vmem:[%s1359_s1 + $0x8] sm:$0xff]  ;;  %s1000_s23 = sshll.u32 %s1370_s14, 4  ;;  %v1040_v10 = vld [vmem:[%s1360_s2] ss:$0 sm:$0xff]  ;;  %vm419_vm2 = vcmask 130048   ;;  %s1112_s21 = smov 48  }
   0xd   : > { %v368_v5 = vpack.c.bf16 %v364_v4, %v363_v2  ;;  %s354_s26 = scalar_lea.vmem %s1358_s0, %s1000_s23  ;;  %s1113_s22 = smov 8   ;;  %vm698_vm3 = vcmask 195584  }
   0xe   : > { %384 = vmatpush.bf16.msra.mxu0 %v369_v3  ;;  %v1200_v6 = vld [vmem:[%s354_s26] sm:$0xff]  ;;  %v1202_v7 = vld [vmem:[%s354_s26 + $0x8] sm:$0xff]  ;;  %s1114_s24 = smov 24   ;;  %s1115_s25 = smov 16  }
   0xf   : > { %v367_v8 = vpack.c.bf16 %v1202_v7, %v1200_v6 }
  0x12   : > { %385 = vmatpush.bf16.msra.mxu0 %v368_v5 }
  0x15   : > { %986 = vmatmul.msk.bf16.vlgmr.msra.gmra.mxu0 %vm374_vm0, %v367_v8 }
  0x92   : > { %v387_v9 = vpop.f32.mrf.mxu0 }
  0x93   : > { %v388_v12 = vadd.f32 %v1040_v10, %v387_v9 }
  0x9a   : > { %v389_v11 = vpop.f32.mrf.mxu0 }
  0x9b   : > { %v390_v13 = vadd.f32 %v1040_v10, %v389_v11 }
  0x9d   : > { %v1210_v14 = vpack.c.bf16 %v390_v13, %v388_v12 }
  0x9f   : > { %601 = vrot.lane.b32.xlu2 %v1210_v14, %s1102_s29  ;;  %463 = vrot.lane.b32.xlu1 %v1210_v14, %s1103_s30 }
  0xa0   : > { %394 = vrot.lane.b32.xlu0 %v1210_v14, %s1104_s11 }
  0xa7   : > { %534 = vrot.lane.b32.xlu2 %v1210_v14, %s1105_s12  ;;  %603 = vrot.lane.b32.xlu1 %v1210_v14, %s1106_s15  ;;  %s359_s12 = scalar_lea.vmem %s1368_s10, %s1000_s23 }
  0xa8   : > { %465 = vrot.lane.b32.xlu0 %v1210_v14, %s1107_s16 }
  0xb0   : > { %532 = vrot.lane.b32.xlu0 %v1210_v14, %s1108_s17 }
  0xf9   : > { %v602_v15 = vpop.permute.xlu2 %601 }
 0x101   : > { %v535_v16 = vpop.permute.xlu2 %534 }
 0x102   : > { %v540_v17 = vsel %vm396_vm1, %v535_v16, 0 }
 0x103   : > { %549 = vmatpush.bf16.xpose.msrb.mxu0 %v540_v17 }
 0x111   : > { %v464_v18 = vpop.permute.xlu1 %463 }
 0x112   : > { %v395_v19 = vpop.permute.xlu0 %394 }
 0x113   : > { %v401_v20 = vsel %vm396_vm1, %v395_v19, 0 }
 0x114   : > { %410 = vmatpush.bf16.xpose.msra.mxu1 %v401_v20 }
 0x119   : > { %v604_v21 = vpop.permute.xlu1 %603 }
 0x11a   : > { %v466_v22 = vpop.permute.xlu0 %465  ;;  %v609_v23 = vsel %vm396_vm1, %v604_v21, 0 }
 0x11b   : > { %987 = vmatmul.msk.bf16.vlgmr.msra.gmra.mxu1 %vm396_vm1, %v1210_v14  ;;  %v471_v24 = vsel %vm396_vm1, %v466_v22, 0 }
 0x11c   : > { %480 = vmatpush.bf16.xpose.msra.mxu3 %v471_v24 }
 0x122   : > { %v533_v25 = vpop.permute.xlu0 %532 }
 0x123   : > { %989 = vmatmul.msk.bf16.vlgmr.msra.gmra.mxu3 %vm396_vm1, %v464_v18  ;;  %991 = vmatmul.msk.bf16.vlgmr.msrb.gmra.mxu0 %vm396_vm1, %v533_v25 }
 0x124   : > { %618 = vmatpush.bf16.xpose.msrb.mxu3 %v609_v23 }
 0x133   : > { %993 = vmatmul.msk.bf16.vlgmr.msrb.gmra.mxu3 %vm396_vm1, %v602_v15 }
 0x198   : > { %v412_v26 = vpop.f32.mrf.mxu1 }
 0x199   : > { %v417_v27 = vmul.f32 0.35355338, %v412_v26 }
 0x19b   : > { %v420_v28 = vsel %vm419_vm2, %v417_v27, -inf }
 0x19c   : > { %421 = vmax.xlane.f32.xlu1 %v420_v28 }
 0x1a0   : > { %v414_v29 = vpop.f32.mrf.mxu1  ;;  %v551_v30 = vpop.f32.mrf.mxu0 }
 0x1a1   : > { %v418_v31 = vmul.f32 0.35355338, %v414_v29  ;;  %v556_v32 = vmul.f32 0.35355338, %v551_v30 }
 0x1a3   : > { %v423_v33 = vsel %vm419_vm2, %v418_v31, -inf  ;;  %v558_v34 = vsel %vm419_vm2, %v556_v32, -inf }
 0x1a4   : > { %424 = vmax.xlane.f32.xlu2 %v423_v33  ;;  %559 = vmax.xlane.f32.xlu0 %v558_v34 }
 0x1a6   : > { %v482_v35 = vpop.f32.mrf.mxu3 }
 0x1a7   : > { %v487_v36 = vmul.f32 0.35355338, %v482_v35 }
 0x1a8   : > { %v553_v37 = vpop.f32.mrf.mxu0 }
 0x1a9   : > { %v557_v38 = vmul.f32 0.35355338, %v553_v37  ;;  %v489_v39 = vsel %vm419_vm2, %v487_v36, -inf }
 0x1ab   : > { %v561_v40 = vsel %vm419_vm2, %v557_v38, -inf }
 0x1ac   : > { %490 = vmax.xlane.f32.xlu0 %v489_v39  ;;  %562 = vmax.xlane.f32.xlu1 %v561_v40 }
 0x1ae   : > { %v484_v41 = vpop.f32.mrf.mxu3 }
 0x1af   : > { %v488_v42 = vmul.f32 0.35355338, %v484_v41 }
 0x1b1   : > { %v492_v43 = vsel %vm419_vm2, %v488_v42, -inf }
 0x1b2   : > { %493 = vmax.xlane.f32.xlu2 %v492_v43 }
 0x1b6   : > { %v620_v44 = vpop.f32.mrf.mxu3 }
 0x1b7   : > { %v625_v45 = vmul.f32 0.35355338, %v620_v44 }
 0x1b9   : > { %v627_v46 = vsel %vm419_vm2, %v625_v45, -inf }
 0x1ba   : > { %628 = vmax.xlane.f32.xlu1 %v627_v46 }
 0x1be   : > { %v622_v47 = vpop.f32.mrf.mxu3 }
 0x1bf   : > { %v626_v48 = vmul.f32 0.35355338, %v622_v47 }
 0x1c1   : > { %v630_v49 = vsel %vm419_vm2, %v626_v48, -inf }
 0x1c2   : > { %631 = vmax.xlane.f32.xlu2 %v630_v49 }
 0x1d3   : > { %443 = vrot.lane.b32.xlu1 %v1210_v14, %s1109_s18 }
 0x1da   : > { %512 = vrot.lane.b32.xlu2 %v1210_v14, %s1110_s19 }
 0x20f   : > { %v422_v50 = vpop.xlane.xlu1 %421 }
 0x210   : > { %v426_v51 = vsub.f32 %v417_v27, %v422_v50 }
 0x212   : > { %v428_v52 = vmul.f32 1.442695, %v426_v51 }
 0x214   : > { %1048 = vpow2.f32 %v428_v52 }
 0x217   : > { %v425_v53 = vpop.xlane.xlu2 %424  ;;  %v560_v54 = vpop.xlane.xlu0 %559 }
 0x218   : > { %v427_v55 = vsub.f32 %v418_v31, %v425_v53  ;;  %v564_v56 = vsub.f32 %v556_v32, %v560_v54 }
 0x21a   : > { %v1238_v57 = vpop.eup %1048  ;;  %v430_v58 = vmul.f32 1.442695, %v427_v55  ;;  %v566_v59 = vmul.f32 1.442695, %v564_v56 }
 0x21b   : > { %v432_v60 = vsel %vm419_vm2, %v1238_v57, 0.0 }
 0x21c   : > { %1050 = vpow2.f32 %v430_v58  ;;  %433 = vadd.xlane.f32.xlu2 %v432_v60 }
 0x21d   : > { %1052 = vpow2.f32 %v566_v59 }
 0x21f   : > { %v491_v61 = vpop.xlane.xlu0 %490  ;;  %v563_v62 = vpop.xlane.xlu1 %562 }
 0x220   : > { %v495_v63 = vsub.f32 %v487_v36, %v491_v61  ;;  %v565_v0 = vsub.f32 %v557_v38, %v563_v62 }
 0x222   : > { %v1051_v1 = vpop.eup %1050  ;;  %v497_v2 = vmul.f32 1.442695, %v495_v63  ;;  %v568_v3 = vmul.f32 1.442695, %v565_v0 }
 0x223   : > { %v1242_v4 = vpop.eup %1052  ;;  %v435_v5 = vsel %vm419_vm2, %v1051_v1, 0.0 }
 0x224   : > { %1054 = vpow2.f32 %v497_v2  ;;  %436 = vadd.xlane.f32.xlu0 %v435_v5  ;;  %v570_v8 = vsel %vm419_vm2, %v1242_v4, 0.0 }
 0x225   : > { %1056 = vpow2.f32 %v568_v3  ;;  %571 = vadd.xlane.f32.xlu1 %v570_v8  ;;  %v494_v9 = vpop.xlane.xlu2 %493 }
 0x226   : > { %v496_v10 = vsub.f32 %v488_v42, %v494_v9  ;;  %v703_v9 = vld [vmem:[%s1361_s3 + $0x10] sm:$0xff] }
 0x228   : > { %v499_v11 = vmul.f32 1.442695, %v496_v10  ;;  %v704_v10 = vld [vmem:[%s1361_s3 + $0x18] sm:$0xff] }
 0x22a   : > { %v1055_v12 = vpop.eup %1054  ;;  %1058 = vpow2.f32 %v499_v11  ;;  %v701_v11 = vld [vmem:[%s1361_s3] sm:$0xff] }
 0x22b   : > { %v1247_v13 = vpop.eup %1056  ;;  %v501_v15 = vsel %vm419_vm2, %v1055_v12, 0.0 }
 0x22c   : > { %502 = vadd.xlane.f32.xlu2 %v501_v15  ;;  %v573_v16 = vsel %vm419_vm2, %v1247_v13, 0.0 }
 0x22d   : > { %574 = vadd.xlane.f32.xlu0 %v573_v16  ;;  %v629_v17 = vpop.xlane.xlu1 %628 }
 0x22e   : > { %v633_v18 = vsub.f32 %v625_v45, %v629_v17 }
 0x230   : > { %v635_v19 = vmul.f32 1.442695, %v633_v18  ;;  %v1059_v20 = vpop.eup %1058 }
 0x231   : > { %v504_v21 = vsel %vm419_vm2, %v1059_v20, 0.0 }
 0x232   : > { %1060 = vpow2.f32 %v635_v19 }
 0x235   : > { %505 = vadd.xlane.f32.xlu0 %v504_v21  ;;  %v632_v22 = vpop.xlane.xlu2 %631 }
 0x236   : > { %v634_v23 = vsub.f32 %v626_v48, %v632_v22 }
 0x238   : > { %v637_v24 = vmul.f32 1.442695, %v634_v23  ;;  %v1061_v25 = vpop.eup %1060 }
 0x239   : > { %v639_v26 = vsel %vm419_vm2, %v1061_v25, 0.0 }
 0x23a   : > { %1062 = vpow2.f32 %v637_v24 }
 0x23d   : > { %640 = vadd.xlane.f32.xlu0 %v639_v26  ;;  %v513_v30 = vpop.permute.xlu2 %512 }
 0x240   : > { %v1063_v27 = vpop.eup %1062 }
 0x241   : > { %v642_v28 = vsel %vm419_vm2, %v1063_v27, 0.0 }
 0x244   : > { %650 = vrot.lane.b32.xlu2 %v1210_v14, %s1111_s20 }
 0x245   : > { %643 = vadd.xlane.f32.xlu0 %v642_v28  ;;  %v444_v29 = vpop.permute.xlu1 %443 }
 0x246   : > { %456 = vmatpush.bf16.msra.mxu2 %v444_v29 }
 0x24a   : > { %525 = vmatpush.bf16.msrb.mxu2 %v513_v30 }
 0x259   : > { %581 = vrot.lane.b32.xlu0 %v1210_v14, %s1112_s21 }
 0x28f   : > { %v434_v31 = vpop.xlane.xlu2 %433 }
 0x290   : > { %1064 = vrcp.f32 %v434_v31 }
 0x296   : > { %v1065_v33 = vpop.eup %1064 }
 0x297   : > { %v437_v32 = vpop.xlane.xlu0 %436  ;;  %v440_v36 = vmul.f32 %v1065_v33, %v1238_v57 }
 0x298   : > { %1066 = vrcp.f32 %v437_v32  ;;  %v572_v50 = vpop.xlane.xlu1 %571  ;;  %v1041_v32 = vld [vmem:[%s1362_s4] ss:$0 sm:$0xff] }
 0x29e   : > { %v1067_v34 = vpop.eup %1066 }
 0x29f   : > { %v503_v35 = vpop.xlane.xlu2 %502  ;;  %v441_v37 = vmul.f32 %v1067_v34, %v1051_v1 }
 0x2a0   : > { %v575_v38 = vpop.xlane.xlu0 %574  ;;  %1068 = vrcp.f32 %v503_v35 }
 0x2a1   : > { %v442_v39 = vpack.c.bf16 %v441_v37, %v440_v36 }
 0x2a3   : > { %988 = vmatmul.msk.bf16.vlgmr.msra.gmra.mxu2 %vm419_vm2, %v442_v39 }
 0x2a6   : > { %v1069_v14 = vpop.eup %1068 }
 0x2a7   : > { %v651_v40 = vpop.permute.xlu2 %650  ;;  %v509_v43 = vmul.f32 %v1069_v14, %v1055_v12  ;;  %v707_v12 = vpack.c.bf16 %v704_v10, %v703_v9 }
 0x2a8   : > { %v506_v41 = vpop.xlane.xlu0 %505  ;;  %663 = vmatpush.bf16.msra.mxu2 %v651_v40 }
 0x2a9   : > { %1070 = vrcp.f32 %v506_v41  ;;  %717 = vmatpush.bf16.msra.mxu0 %v707_v12  ;;  %v1116_v41 = vmov 32.0  }
 0x2af   : > { %v1071_v42 = vpop.eup %1070 }
 0x2b0   : > { %v510_v44 = vmul.f32 %v1071_v42, %v1059_v20  ;;  %v641_v45 = vpop.xlane.xlu0 %640 }
 0x2b1   : > { %1072 = vrcp.f32 %v641_v45 }
 0x2b2   : > { %v511_v46 = vpack.c.bf16 %v510_v44, %v509_v43 }
 0x2b4   : > { %990 = vmatmul.msk.bf16.vlgmr.msrb.gmra.mxu2 %vm419_vm2, %v511_v46 }
 0x2b7   : > { %v1073_v48 = vpop.eup %1072 }
 0x2b8   : > { %v644_v47 = vpop.xlane.xlu0 %643  ;;  %v647_v51 = vmul.f32 %v1073_v48, %v1061_v25 }
 0x2b9   : > { %1074 = vrcp.f32 %v644_v47 }
 0x2ba   : > { %1076 = vrcp.f32 %v575_v38 }
 0x2bb   : > { %1078 = vrcp.f32 %v572_v50 }
 0x2bc   : > { %1080 = vrcp.f32 %v1116_v41 }
 0x2bf   : > { %v1075_v49 = vpop.eup %1074 }
 0x2c0   : > { %v648_v52 = vmul.f32 %v1075_v49, %v1063_v27  ;;  %v1077_v54 = vpop.eup %1076 }
 0x2c1   : > { %v1079_v55 = vpop.eup %1078  ;;  %v579_v56 = vmul.f32 %v1077_v54, %v1247_v13  ;;  %v702_v13 = vld [vmem:[%s1361_s3 + $0x8] sm:$0xff] }
 0x2c2   : > { %v649_v53 = vpack.c.bf16 %v648_v52, %v647_v51  ;;  %v578_v57 = vmul.f32 %v1079_v55, %v1242_v4  ;;  %v706_v15 = vpack.c.bf16 %v702_v13, %v701_v11  ;;  %v1081_v14 = vpop.eup %1080  ;;  %v794_v55 = vld [vmem:[%s1363_s5 + $0x10] sm:$0xff] }
 0x2c3   : > { %v742_v42 = vmul.f32 32.0, %v1081_v14  ;;  %vm746_vm4 = vweird.f32 %v1081_v14 }
 0x2c4   : > { %994 = vmatmul.msk.bf16.vlgmr.msra.gmra.mxu2 %vm419_vm2, %v649_v53  ;;  %v580_v59 = vpack.c.bf16 %v579_v56, %v578_v57  ;;  %718 = vmatpush.bf16.msra.mxu0 %v706_v15  ;;  %v795_v56 = vld [vmem:[%s1363_s5 + $0x18] sm:$0xff] }
 0x2c5   : > { %v743_v43 = vsub.f32 1.0, %v742_v42  ;;  %v798_v57 = vpack.c.bf16 %v795_v56, %v794_v55 }
 0x2c7   : > { %v744_v44 = vmul.f32 %v1081_v14, %v743_v43 }
 0x2c9   : > { %v745_v45 = vadd.f32 %v1081_v14, %v744_v44 }
 0x2cb   : > { %v582_v58 = vpop.permute.xlu0 %581 }
 0x2cc   : > { %594 = vmatpush.bf16.msrb.mxu1 %v582_v58 }
 0x2cf   : > { %992 = vmatmul.msk.bf16.vlgmr.msrb.gmra.mxu1 %vm419_vm2, %v580_v59 }
 0x2d0   : > { %812 = vmatpush.bf16.msra.mxu1 %v798_v57  ;;  %v1045_v57 = vld [vmem:[%s1366_s8] ss:$0 sm:$0xff] }
 0x326   : > { %v458_v60 = vpop.f32.mrf.mxu2 }
 0x32e   : > { %v460_v61 = vpop.f32.mrf.mxu2 }
 0x337   : > { %v527_v62 = vpop.f32.mrf.mxu2 }
 0x33f   : > { %v529_v63 = vpop.f32.mrf.mxu2 }
 0x340   : > { %v1025_v0 = vpack.i.bf16 %v529_v63, %v527_v62 }
 0x342   : > { %1026 = vrot.lane.b32.xlu2 %v1025_v0, %s1113_s22 }
 0x347   : > { %v665_v1 = vpop.f32.mrf.mxu2 }
 0x34c   : > { %v596_v2 = vpop.f32.mrf.mxu1 }
 0x34f   : > { %v667_v3 = vpop.f32.mrf.mxu2 }
 0x350   : > { %v1035_v5 = vpack.i.bf16 %v667_v3, %v665_v1 }
 0x352   : > { %1036 = vrot.lane.b32.xlu0 %v1035_v5, %s1114_s24 }
 0x354   : > { %v598_v8 = vpop.f32.mrf.mxu1 }
 0x355   : > { %v1030_v4 = vpack.i.bf16 %v598_v8, %v596_v2 }
 0x357   : > { %1031 = vrot.lane.b32.xlu2 %v1030_v4, %s1115_s25 }
 0x39c   : > { %v1027_v16 = vpop.permute.xlu2 %1026 }
 0x39d   : > { %v1029_v18 = vunpack.i.h.bf16 %v1027_v16  ;;  %v1028_v19 = vunpack.i.l.bf16 %v1027_v16 }
 0x39f   : > { %v695_v23 = vsel %vm396_vm1, %v460_v61, %v1029_v18  ;;  %v694_v24 = vsel %vm396_vm1, %v458_v60, %v1028_v19  ;;  %v792_v60 = vld [vmem:[%s1363_s5] sm:$0xff]  ;;  %v793_v61 = vld [vmem:[%s1363_s5 + $0x8] sm:$0xff] }
 0x3a0   : > { %v797_v62 = vpack.c.bf16 %v793_v61, %v792_v60  ;;  %v1042_v18 = vld [vmem:[%s1367_s9] ss:$0 sm:$0xff] }
 0x3a2   : > { %813 = vmatpush.bf16.msra.mxu1 %v797_v62 }
 0x3b1   : > { %v1032_v17 = vpop.permute.xlu2 %1031 }
 0x3b2   : > { %v1034_v20 = vunpack.i.h.bf16 %v1032_v17  ;;  %v1033_v21 = vunpack.i.l.bf16 %v1032_v17 }
 0x3b4   : > { %v697_v27 = vsel %vm419_vm2, %v695_v23, %v1034_v20  ;;  %v696_v28 = vsel %vm419_vm2, %v694_v24, %v1033_v21 }
 0x3c4   : > { %v1037_v22 = vpop.permute.xlu0 %1036 }
 0x3c5   : > { %v1039_v25 = vunpack.i.h.bf16 %v1037_v22  ;;  %v1038_v26 = vunpack.i.l.bf16 %v1037_v22  ;;  %v1043_v22 = vld [vmem:[%s1367_s9 + $0x1] ss:$0 sm:$0xff] }
 0x3c7   : > { %v699_v29 = vsel %vm698_vm3, %v696_v28, %v1038_v26  ;;  %v700_v30 = vsel %vm698_vm3, %v697_v27, %v1039_v25 }
 0x3c8   : > { %v705_v31 = vpack.c.bf16 %v700_v30, %v699_v29  ;;  %v840_v29 = vld [vmem:[%s1365_s7 + $0x10] sm:$0xff]  ;;  %v841_v30 = vld [vmem:[%s1365_s7 + $0x18] sm:$0xff] }
 0x3ca   : > { %995 = vmatmul.msk.bf16.vlgmr.msra.gmra.mxu0 %vm374_vm0, %v705_v31  ;;  %v844_v31 = vpack.c.bf16 %v841_v30, %v840_v29  ;;  %v1046_v29 = vld [vmem:[%s1367_s9 + $0x2] ss:$0 sm:$0xff] }
 0x3cc   : > { %858 = vmatpush.bf16.msra.mxu3 %v844_v31  ;;  %v1047_v31 = vld [vmem:[%s1367_s9 + $0x3] ss:$0 sm:$0xff] }
 0x447   : > { %v720_v33 = vpop.f32.mrf.mxu0 }
 0x448   : > { %v725_v34 = vadd.f32 %v720_v33, %v1200_v6  ;;  %v1288_v6 = vsel %vm746_vm4, %v1081_v14, %v745_v45  ;;  %v838_v33 = vld [vmem:[%s1365_s7] sm:$0xff] }
 0x44a   : > { %v731_v35 = vadd.f32 %v1041_v32, %v725_v34  ;;  %v839_v34 = vld [vmem:[%s1365_s7 + $0x8] sm:$0xff] }
 0x44c   : > { %v735_v36 = vsel %vm374_vm0, %v731_v35, 0.0 }
 0x44d   : > { %736 = vadd.xlane.f32.xlu2 %v735_v36 }
 0x44f   : > { %v722_v37 = vpop.f32.mrf.mxu0 }
 0x450   : > { %v726_v38 = vadd.f32 %v722_v37, %v1202_v7 }
 0x452   : > { %v732_v39 = vadd.f32 %v1041_v32, %v726_v38  ;;  %v1044_v32 = vld [vmem:[%s1364_s6] ss:$0 sm:$0xff] }
 0x454   : > { %v738_v40 = vsel %vm374_vm0, %v732_v39, 0.0 }
 0x455   : > { %739 = vadd.xlane.f32.xlu1 %v738_v40 }
 0x4c0   : > { %v737_v46 = vpop.xlane.xlu2 %736 }
 0x4c1   : > { %v748_v47 = vmul.f32 %v1288_v6, %v737_v46 }
 0x4c3   : > { %v750_v48 = vsub.f32 %v731_v35, %v748_v47  ;;  %v843_v35 = vpack.c.bf16 %v839_v34, %v838_v33 }
 0x4c5   : > { %v752_v49 = vmul.f32 %v750_v48, %v750_v48  ;;  %859 = vmatpush.bf16.msra.mxu3 %v843_v35 }
 0x4c7   : > { %v754_v7 = vsel %vm374_vm0, %v752_v49, 0.0 }
 0x4c8   : > { %755 = vadd.xlane.f32.xlu0 %v754_v7  ;;  %v740_v50 = vpop.xlane.xlu1 %739 }
 0x4c9   : > { %v749_v51 = vmul.f32 %v1288_v6, %v740_v50 }
 0x4cb   : > { %v751_v52 = vsub.f32 %v732_v39, %v749_v51 }
 0x4cd   : > { %v753_v53 = vmul.f32 %v751_v52, %v751_v52 }
 0x4cf   : > { %v757_v54 = vsel %vm374_vm0, %v753_v53, 0.0 }
 0x4d0   : > { %758 = vadd.xlane.f32.xlu1 %v757_v54 }
 0x53b   : > { %v756_v58 = vpop.xlane.xlu0 %755 }
 0x53c   : > { %v760_v59 = vmul.f32 %v756_v58, %v1288_v6 }
 0x53e   : > { %v762_v63 = vadd.f32 1e-05, %v760_v59 }
 0x540   : > { %1082 = vrsqrt.f32 %v762_v63  ;;  %vm770_vm6 = vweird.f32 %v762_v63 }
 0x543   : > { %v759_v0 = vpop.xlane.xlu1 %758 }
 0x544   : > { %v761_v1 = vmul.f32 %v759_v0, %v1288_v6 }
 0x546   : > { %v1083_v2 = vpop.eup %1082  ;;  %v763_v3 = vadd.f32 1e-05, %v761_v1 }
 0x547   : > { %v765_v5 = vmul.f32 %v1083_v2, %v762_v63  ;;  %vm771_vm5 = vweird.f32 %v1083_v2 }
 0x548   : > { %1084 = vrsqrt.f32 %v763_v3  ;;  %vm772_vm7 = vmor %vm770_vm6, %vm771_vm5  ;;  %vm780_vm9 = vweird.f32 %v763_v3 }
 0x549   : > { %v766_v8 = vmul.f32 %v1083_v2, %v765_v5 }
 0x54b   : > { %v767_v4 = vmul.f32 0.5, %v766_v8 }
 0x54d   : > { %v768_v9 = vsub.f32 1.5, %v767_v4 }
 0x54e   : > { %v1085_v10 = vpop.eup %1084 }
 0x54f   : > { %v769_v11 = vmul.f32 %v1083_v2, %v768_v9  ;;  %v775_v12 = vmul.f32 %v1085_v10, %v763_v3  ;;  %vm781_vm8 = vweird.f32 %v1085_v10 }
 0x550   : > { %vm782_vm10 = vmor %vm780_vm9, %vm781_vm8 }
 0x551   : > { %v776_v13 = vmul.f32 %v1085_v10, %v775_v12  ;;  %v773_v15 = vsel %vm772_vm7, %v1083_v2, %v769_v11 }
 0x552   : > { %v784_v19 = vmul.f32 %v773_v15, %v750_v48 }
 0x553   : > { %v777_v16 = vmul.f32 0.5, %v776_v13 }
 0x554   : > { %v787_v23 = vmul.f32 %v1042_v18, %v784_v19 }
 0x555   : > { %v778_v17 = vsub.f32 1.5, %v777_v16 }
 0x556   : > { %v790_v26 = vadd.f32 %v1043_v22, %v787_v23 }
 0x557   : > { %v779_v20 = vmul.f32 %v1085_v10, %v778_v17 }
 0x559   : > { %v783_v21 = vsel %vm782_vm10, %v1085_v10, %v779_v20 }
 0x55a   : > { %v785_v24 = vmul.f32 %v783_v21, %v751_v52 }
 0x55c   : > { %v788_v25 = vmul.f32 %v1042_v18, %v785_v24 }
 0x55e   : > { %v791_v27 = vadd.f32 %v1043_v22, %v788_v25 }
 0x560   : > { %v796_v28 = vpack.c.bf16 %v791_v27, %v790_v26 }
 0x562   : > { %996 = vmatmul.msk.bf16.vlgmr.msra.gmra.mxu1 %vm374_vm0, %v796_v28 }
 0x5df   : > { %v815_v36 = vpop.f32.mrf.mxu1 }
 0x5e0   : > { %v816_v37 = vadd.f32 %v1044_v32, %v815_v36 }
 0x5e2   : > { %v820_v38 = vmul.f32 %v816_v37, %v816_v37 }
 0x5e4   : > { %v822_v39 = vmul.f32 %v820_v38, %v816_v37 }
 0x5e6   : > { %v824_v40 = vmul.f32 0.044715, %v822_v39 }
 0x5e7   : > { %v817_v41 = vpop.f32.mrf.mxu1 }
 0x5e8   : > { %v826_v14 = vadd.f32 %v824_v40, %v816_v37  ;;  %v818_v42 = vadd.f32 %v1044_v32, %v817_v41 }
 0x5ea   : > { %v828_v43 = vmul.f32 0.7978846, %v826_v14  ;;  %v821_v44 = vmul.f32 %v818_v42, %v818_v42 }
 0x5ec   : > { %v823_v45 = vmul.f32 %v821_v44, %v818_v42  ;;  %1086 = vtanh.f32 %v828_v43 }
 0x5ee   : > { %v825_v46 = vmul.f32 0.044715, %v823_v45 }
 0x5f0   : > { %v827_v47 = vadd.f32 %v825_v46, %v818_v42 }
 0x5f2   : > { %v829_v48 = vmul.f32 0.7978846, %v827_v47  ;;  %v1087_v49 = vpop.eup %1086 }
 0x5f3   : > { %v832_v7 = vadd.f32 1.0, %v1087_v49 }
 0x5f4   : > { %1088 = vtanh.f32 %v829_v48 }
 0x5f5   : > { %v834_v51 = vmul.f32 0.5, %v832_v7 }
 0x5f7   : > { %v836_v54 = vmul.f32 %v834_v51, %v816_v37 }
 0x5fa   : > { %v1089_v50 = vpop.eup %1088 }
 0x5fb   : > { %v833_v52 = vadd.f32 1.0, %v1089_v50 }
 0x5fd   : > { %v835_v53 = vmul.f32 0.5, %v833_v52 }
 0x5ff   : > { %v837_v55 = vmul.f32 %v835_v53, %v818_v42 }
 0x601   : > { %v842_v56 = vpack.c.bf16 %v837_v55, %v836_v54 }
 0x603   : > { %997 = vmatmul.msk.bf16.vlgmr.msra.gmra.mxu3 %vm374_vm0, %v842_v56 }
 0x686   : > { %v861_v58 = vpop.f32.mrf.mxu3 }
 0x687   : > { %v862_v59 = vadd.f32 %v1045_v57, %v861_v58 }
 0x689   : > { %v866_v60 = vadd.f32 %v862_v59, %v790_v26 }
 0x68b   : > { %v870_v61 = vsel %vm374_vm0, %v866_v60, 0.0 }
 0x68c   : > { %871 = vadd.xlane.f32.xlu1 %v870_v61 }
 0x68e   : > { %v863_v62 = vpop.f32.mrf.mxu3 }
 0x68f   : > { %v864_v63 = vadd.f32 %v1045_v57, %v863_v62 }
 0x691   : > { %v867_v0 = vadd.f32 %v864_v63, %v791_v27 }
 0x693   : > { %v873_v1 = vsel %vm374_vm0, %v867_v0, 0.0 }
 0x694   : > { %874 = vadd.xlane.f32.xlu1 %v873_v1 }
 0x6ff   : > { %v872_v2 = vpop.xlane.xlu1 %871 }
 0x700   : > { %v876_v3 = vmul.f32 %v872_v2, %v1288_v6 }
 0x702   : > { %v878_v5 = vsub.f32 %v866_v60, %v876_v3 }
 0x704   : > { %v880_v8 = vmul.f32 %v878_v5, %v878_v5 }
 0x706   : > { %v882_v4 = vsel %vm374_vm0, %v880_v8, 0.0 }
 0x707   : > { %883 = vadd.xlane.f32.xlu1 %v882_v4  ;;  %v875_v9 = vpop.xlane.xlu1 %874 }
 0x708   : > { %v877_v10 = vmul.f32 %v875_v9, %v1288_v6 }
 0x70a   : > { %v879_v11 = vsub.f32 %v867_v0, %v877_v10 }
 0x70c   : > { %v881_v12 = vmul.f32 %v879_v11, %v879_v11 }
 0x70e   : > { %v885_v13 = vsel %vm374_vm0, %v881_v12, 0.0 }
 0x70f   : > { %886 = vadd.xlane.f32.xlu2 %v885_v13 }
 0x77a   : > { %v884_v15 = vpop.xlane.xlu1 %883 }
 0x77b   : > { %v888_v16 = vmul.f32 %v884_v15, %v1288_v6 }
 0x77d   : > { %v890_v17 = vadd.f32 1e-05, %v888_v16 }
 0x77f   : > { %1090 = vrsqrt.f32 %v890_v17  ;;  %vm898_vm12 = vweird.f32 %v890_v17 }
 0x782   : > { %v887_v18 = vpop.xlane.xlu2 %886 }
 0x783   : > { %v889_v19 = vmul.f32 %v887_v18, %v1288_v6 }
 0x785   : > { %v1091_v20 = vpop.eup %1090  ;;  %v891_v21 = vadd.f32 1e-05, %v889_v19 }
 0x786   : > { %v893_v22 = vmul.f32 %v1091_v20, %v890_v17  ;;  %vm899_vm11 = vweird.f32 %v1091_v20 }
 0x787   : > { %1092 = vrsqrt.f32 %v891_v21  ;;  %vm900_vm13 = vmor %vm898_vm12, %vm899_vm11  ;;  %vm908_vm15 = vweird.f32 %v891_v21 }
 0x788   : > { %v894_v23 = vmul.f32 %v1091_v20, %v893_v22 }
 0x78a   : > { %v895_v24 = vmul.f32 0.5, %v894_v23 }
 0x78c   : > { %v896_v25 = vsub.f32 1.5, %v895_v24 }
 0x78d   : > { %v1093_v26 = vpop.eup %1092 }
 0x78e   : > { %v897_v27 = vmul.f32 %v1091_v20, %v896_v25  ;;  %v903_v28 = vmul.f32 %v1093_v26, %v891_v21  ;;  %vm909_vm14 = vweird.f32 %v1093_v26 }
 0x78f   : > { %vm910_vm1 = vmor %vm908_vm15, %vm909_vm14 }
 0x790   : > { %v901_v30 = vsel %vm900_vm13, %v1091_v20, %v897_v27  ;;  %v904_v6 = vmul.f32 %v1093_v26, %v903_v28 }
 0x791   : > { %v912_v32 = vmul.f32 %v901_v30, %v878_v5 }
 0x792   : > { %v905_v33 = vmul.f32 0.5, %v904_v6 }
 0x793   : > { %v915_v34 = vmul.f32 %v1046_v29, %v912_v32 }
 0x794   : > { %v906_v35 = vsub.f32 1.5, %v905_v33 }
 0x795   : > { %v918_v36 = vadd.f32 %v1047_v31, %v915_v34 }
 0x796   : > { %v907_v37 = vmul.f32 %v1093_v26, %v906_v35 }
 0x797   : > { %920 = vst.msk [vmem:[%s359_s12] sm:$0xff] %vm374_vm0, %v918_v36 }
 0x798   : > { %v911_v38 = vsel %vm910_vm1, %v1093_v26, %v907_v37 }
 0x799   : > { %v913_v39 = vmul.f32 %v911_v38, %v879_v11 }
 0x79b   : > { %v916_v40 = vmul.f32 %v1046_v29, %v913_v39 }
 0x79d   : > { %v919_v41 = vadd.f32 %v1047_v31, %v916_v40 }
 0x79f   : > { %921 = vst.msk [vmem:[%s359_s12 + $0x8] sm:$0xff] %vm374_vm0, %v919_v41 }
 0x7a0 PF: > { %s20_s13 = sadd.s32 1, %s1100_s13  }
 0x7a1   : > { %p17_p4 = scmp.ge.s32.totalorder %s20_s13, 4  }
 0x7a3   :  { %19 = sbr.rel (!%p17_p4) target bundleno = 1 (0x1), region = 90 }

// kernel: informer_stack_forward.11
= control target key start
LH: loop header
LB: loop body
LE: loop exit
PB: predicated region body
PF: predicated region fallthrough
CT: control target
= control target key end

     0   :  { %s1028_s13 = smov 0   ;;  %s1193_s0 = inlined_call_operand.vmem [shape: f32[2,8,32], index: 0, kind: input, shape index: {}]   ;;  %s1194_s1 = inlined_call_operand.vmem [shape: f32[32,96], index: 1, kind: input, shape index: {}]   ;;  %s1195_s2 = inlined_call_operand.vmem [shape: f32[1,96], index: 2, kind: input, shape index: {}]   ;;  %s1196_s3 = inlined_call_operand.vmem [shape: f32[32,32], index: 3, kind: input, shape index: {}]   ;;  %s1197_s4 = inlined_call_operand.vmem [shape: f32[1,32], index: 4, kind: input, shape index: {}]   ;;  %s1198_s5 = inlined_call_operand.vmem [shape: f32[32,32], index: 5, kind: input, shape index: {}]   ;;  %s1199_s6 = inlined_call_operand.vmem [shape: f32[1,32], index: 6, kind: input, shape index: {}]   ;;  %s1200_s7 = inlined_call_operand.vmem [shape: f32[32,32], index: 7, kind: input, shape index: {}]   ;;  %s1201_s8 = inlined_call_operand.vmem [shape: f32[1,32], index: 8, kind: input, shape index: {}]   ;;  %s1202_s9 = inlined_call_operand.vmem [shape: f32[6,32], index: 9, kind: input, shape index: {}]   ;;  %s1203_s10 = inlined_call_operand.vmem [shape: f32[2,8,32], index: 10, kind: output, shape index: {}]  }
   0x1 LB: > { %s870_s14 = sadd.s32 4294967295, %s956_s13   ;;  %p874_p0 = scmp.ge.s32.totalorder %s956_s13, 1  ;;  %s956_s13 = sphi %s1028_s13, %s20_s13  }
   0x2   : > { %p311_p1 = scmp.lt.s32.totalorder %s956_s13, 3 }
   0x4   : > { %p312_p2 = pnand %p874_p0, %p311_p1 }
   0x5   : > { %p347_p3 = scmp.lt.s32.totalorder (!%p312_p2), %s870_s14, 1  ;;  %s958_s29 = smov (!%p312_p2), 104  }
   0x6   : > { %315 = sbr.rel (%p312_p2) target bundleno = 2181 (0x885), region = 60  ;;  %s959_s30 = smov (!%p312_p2), 120  }
   0x7   : > { %s960_s11 = smov (!%p312_p2), 96   ;;  %s961_s12 = smov (!%p312_p2), 80  }
   0x8   : > { %s962_s15 = smov (!%p312_p2), 72   ;;  %s963_s16 = smov (!%p312_p2), 88  }
   0x9   : > { %s964_s17 = smov (!%p312_p2), 112   ;;  %s965_s18 = smov (!%p312_p2), 64  }
   0xa   : > { %s966_s19 = smov (!%p312_p2), 40   ;;  %s967_s20 = smov (!%p312_p2), 56  }
   0xb   : > { %v359_v0 = vld [vmem:[%s1194_s1 + $0x10] sm:$0xff]  ;;  %v360_v1 = vld [vmem:[%s1194_s1 + $0x18] sm:$0xff]  ;;  %v357_v2 = vld [vmem:[%s1194_s1] sm:$0xff]  ;;  %s1205_s14 = smov (!%p347_p3, %s870_s14), 1  ;;  %vm368_vm0 = vcmask 261120   ;;  %vm389_vm1 = vcmask 64512  }
   0xc   : > { %v363_v3 = vpack.c.bf16 %v360_v1, %v359_v0  ;;  %v358_v4 = vld [vmem:[%s1194_s1 + $0x8] sm:$0xff]  ;;  %s875_s23 = sshll.u32 %s1205_s14, 3  ;;  %v914_v8 = vld [vmem:[%s1195_s2] ss:$0 sm:$0xff]  ;;  %vm427_vm2 = vcmask 1043456   ;;  %s968_s21 = smov 48  }
   0xd   : > { %v362_v5 = vpack.c.bf16 %v358_v4, %v357_v2  ;;  %s350_s26 = scalar_lea.vmem %s1193_s0, %s875_s23  ;;  %s969_s22 = smov 8   ;;  %vm628_vm3 = vcmask 130048   ;;  %vm630_vm4 = vcmask 195584  }
   0xe   : > { %378 = vmatpush.bf16.msra.mxu0 %v363_v3  ;;  %v1056_v6 = vld [vmem:[%s350_s26] sm:$0xff]  ;;  %s970_s24 = smov 16   ;;  %s971_s25 = smov 24  }
   0xf   : > { %v361_v7 = vpack.c.bf16 %v1056_v6, %v1056_v6 }
  0x12   : > { %379 = vmatpush.bf16.msra.mxu0 %v362_v5 }
  0x15   : > { %877 = vmatmul.msk.bf16.vlgmr.msra.gmra.mxu0 %vm368_vm0, %v361_v7 }
  0x92   : > { %v381_v9 = vpop.f32.mrf.mxu0 }
  0x93   : > { %v382_v10 = vadd.f32 %v914_v8, %v381_v9 }
  0x95   : > { %v1064_v11 = vpack.c.bf16 %v382_v10, %v382_v10 }
  0x97   : > { %558 = vrot.lane.b32.xlu2 %v1064_v11, %s958_s29  ;;  %444 = vrot.lane.b32.xlu1 %v1064_v11, %s959_s30 }
  0x98   : > { %387 = vrot.lane.b32.xlu0 %v1064_v11, %s960_s11 }
  0x9a   : > { %v383_v12 = vpop.f32.mrf.mxu0 }
  0x9f   : > { %503 = vrot.lane.b32.xlu2 %v1064_v11, %s961_s12  ;;  %560 = vrot.lane.b32.xlu1 %v1064_v11, %s962_s15 }
  0xa0   : > { %446 = vrot.lane.b32.xlu0 %v1064_v11, %s963_s16 }
  0xa8   : > { %501 = vrot.lane.b32.xlu0 %v1064_v11, %s964_s17 }
  0xf1   : > { %v559_v13 = vpop.permute.xlu2 %558 }
  0xf9   : > { %v504_v14 = vpop.permute.xlu2 %503 }
  0xfa   : > { %v509_v15 = vsel %vm389_vm1, %v504_v14, 0 }
  0xfb   : > { %518 = vmatpush.bf16.xpose.msrb.mxu0 %v509_v15 }
 0x109   : > { %v445_v16 = vpop.permute.xlu1 %444 }
 0x10a   : > { %v388_v17 = vpop.permute.xlu0 %387 }
 0x10b   : > { %v394_v18 = vsel %vm389_vm1, %v388_v17, 0 }
 0x10c   : > { %403 = vmatpush.bf16.xpose.msra.mxu1 %v394_v18 }
 0x111   : > { %v561_v19 = vpop.permute.xlu1 %560 }
 0x112   : > { %v447_v20 = vpop.permute.xlu0 %446  ;;  %v566_v21 = vsel %vm389_vm1, %v561_v19, 0 }
 0x113   : > { %878 = vmatmul.msk.bf16.vlgmr.msra.gmra.mxu1 %vm389_vm1, %v1064_v11  ;;  %v452_v22 = vsel %vm389_vm1, %v447_v20, 0 }
 0x114   : > { %461 = vmatpush.bf16.xpose.msra.mxu3 %v452_v22 }
 0x11a   : > { %v502_v23 = vpop.permute.xlu0 %501 }
 0x11b   : > { %880 = vmatmul.msk.bf16.vlgmr.msra.gmra.mxu3 %vm389_vm1, %v445_v16  ;;  %882 = vmatmul.msk.bf16.vlgmr.msrb.gmra.mxu0 %vm389_vm1, %v502_v23 }
 0x11c   : > { %575 = vmatpush.bf16.xpose.msrb.mxu3 %v566_v21 }
 0x12b   : > { %884 = vmatmul.msk.bf16.vlgmr.msrb.gmra.mxu3 %vm389_vm1, %v559_v13 }
 0x190   : > { %v405_v24 = vpop.f32.mrf.mxu1 }
 0x191   : > { %v409_v25 = vmul.f32 0.35355338, %v405_v24 }
 0x193   : > { %v410_v26 = vsel %vm389_vm1, %v409_v25, -inf }
 0x194   : > { %411 = vmax.xlane.f32.xlu1 %v410_v26 }
 0x198   : > { %v407_v27 = vpop.f32.mrf.mxu1  ;;  %v520_v28 = vpop.f32.mrf.mxu0 }
 0x199   : > { %v524_v33 = vmul.f32 0.35355338, %v520_v28 }
 0x19b   : > { %v525_v35 = vsel %vm389_vm1, %v524_v33, -inf }
 0x19e   : > { %v463_v29 = vpop.f32.mrf.mxu3 }
 0x19f   : > { %v467_v30 = vmul.f32 0.35355338, %v463_v29  ;;  %v634_v29 = vld [vmem:[%s1196_s3 + $0x10] sm:$0xff] }
 0x1a0   : > { %v522_v31 = vpop.f32.mrf.mxu0 }
 0x1a1   : > { %v468_v32 = vsel %vm389_vm1, %v467_v30, -inf  ;;  %v632_v31 = vld [vmem:[%s1196_s3] sm:$0xff] }
 0x1a2   : > { %469 = vmax.xlane.f32.xlu2 %v468_v32 }
 0x1a6   : > { %v465_v34 = vpop.f32.mrf.mxu3 }
 0x1aa   : > { %526 = vmax.xlane.f32.xlu2 %v525_v35 }
 0x1ae   : > { %v577_v36 = vpop.f32.mrf.mxu3 }
 0x1af   : > { %v581_v37 = vmul.f32 0.35355338, %v577_v36 }
 0x1b1   : > { %v582_v38 = vsel %vm389_vm1, %v581_v37, -inf }
 0x1b2   : > { %583 = vmax.xlane.f32.xlu0 %v582_v38 }
 0x1b6   : > { %v579_v39 = vpop.f32.mrf.mxu3 }
 0x1c2   : > { %422 = vrot.lane.b32.xlu2 %v1064_v11, %s965_s18  ;;  %s354_s18 = scalar_lea.vmem %s1203_s10, %s875_s23 }
 0x1ca   : > { %594 = vrot.lane.b32.xlu2 %v1064_v11, %s966_s19 }
 0x207   : > { %v412_v40 = vpop.xlane.xlu1 %411 }
 0x208   : > { %v413_v41 = vsub.f32 %v409_v25, %v412_v40 }
 0x20a   : > { %v414_v42 = vmul.f32 1.442695, %v413_v41 }
 0x20c   : > { %924 = vpow2.f32 %v414_v42  ;;  %v915_v42 = vld [vmem:[%s1197_s4] ss:$0 sm:$0xff] }
 0x212   : > { %v925_v43 = vpop.eup %924 }
 0x213   : > { %v416_v44 = vsel %vm389_vm1, %v925_v43, 0.0 }
 0x214   : > { %417 = vadd.xlane.f32.xlu1 %v416_v44 }
 0x215   : > { %v470_v45 = vpop.xlane.xlu2 %469 }
 0x216   : > { %v471_v48 = vsub.f32 %v467_v30, %v470_v45  ;;  %v635_v30 = vld [vmem:[%s1196_s3 + $0x18] sm:$0xff] }
 0x217   : > { %v638_v32 = vpack.c.bf16 %v635_v30, %v634_v29 }
 0x218   : > { %v472_v50 = vmul.f32 1.442695, %v471_v48  ;;  %v972_v48 = vmov 32.0  }
 0x219   : > { %648 = vmatpush.bf16.msra.mxu0 %v638_v32 }
 0x21d   : > { %v527_v46 = vpop.xlane.xlu2 %526 }
 0x21e   : > { %v528_v47 = vsub.f32 %v524_v33, %v527_v46  ;;  %v633_v33 = vld [vmem:[%s1196_s3 + $0x8] sm:$0xff] }
 0x21f   : > { %v637_v34 = vpack.c.bf16 %v633_v33, %v632_v31 }
 0x220   : > { %v529_v49 = vmul.f32 1.442695, %v528_v47 }
 0x221   : > { %649 = vmatpush.bf16.msra.mxu0 %v637_v34 }
 0x222   : > { %926 = vpow2.f32 %v529_v49 }
 0x223   : > { %928 = vpow2.f32 %v472_v50 }
 0x225   : > { %v423_v51 = vpop.permute.xlu2 %422  ;;  %v584_v52 = vpop.xlane.xlu0 %583 }
 0x226   : > { %v429_v53 = vsel %vm427_vm2, %v423_v51, 0  ;;  %v585_v55 = vsub.f32 %v581_v37, %v584_v52 }
 0x227   : > { %438 = vmatpush.bf16.msra.mxu2 %v429_v53 }
 0x228   : > { %v927_v54 = vpop.eup %926  ;;  %v586_v57 = vmul.f32 1.442695, %v585_v55 }
 0x229   : > { %v531_v56 = vsel %vm389_vm1, %v927_v54, 0.0  ;;  %v929_v58 = vpop.eup %928 }
 0x22a   : > { %532 = vadd.xlane.f32.xlu0 %v531_v56  ;;  %930 = vpow2.f32 %v586_v57  ;;  %v474_v59 = vsel %vm389_vm1, %v929_v58, 0.0 }
 0x22d   : > { %480 = vrot.lane.b32.xlu1 %v1064_v11, %s967_s20  ;;  %v595_v3 = vpop.permute.xlu2 %594 }
 0x22e   : > { %v600_v7 = vsel %vm427_vm2, %v595_v3, 0 }
 0x230   : > { %v931_v60 = vpop.eup %930 }
 0x231   : > { %v588_v61 = vsel %vm389_vm1, %v931_v60, 0.0 }
 0x232   : > { %475 = vadd.xlane.f32.xlu0 %v474_v59  ;;  %v698_v59 = vld [vmem:[%s1198_s5 + $0x10] sm:$0xff] }
 0x23a   : > { %589 = vadd.xlane.f32.xlu0 %v588_v61 }
 0x24e   : > { %537 = vrot.lane.b32.xlu0 %v1064_v11, %s968_s21 }
 0x287   : > { %v418_v62 = vpop.xlane.xlu1 %417 }
 0x288   : > { %932 = vrcp.f32 %v418_v62  ;;  %v696_v62 = vld [vmem:[%s1198_s5] sm:$0xff] }
 0x28e   : > { %v933_v63 = vpop.eup %932 }
 0x28f   : > { %v420_v0 = vmul.f32 %v933_v63, %v925_v43  ;;  %v697_v63 = vld [vmem:[%s1198_s5 + $0x8] sm:$0xff] }
 0x291   : > { %v421_v1 = vpack.c.bf16 %v420_v0, %v420_v0  ;;  %v701_v0 = vpack.c.bf16 %v697_v63, %v696_v62 }
 0x293   : > { %879 = vmatmul.msk.bf16.vlgmr.msra.gmra.mxu2 %vm389_vm1, %v421_v1 }
 0x29d   : > { %v533_v2 = vpop.xlane.xlu0 %532 }
 0x29f   : > { %v481_v4 = vpop.permute.xlu1 %480 }
 0x2a0   : > { %v486_v5 = vsel %vm427_vm2, %v481_v4, 0 }
 0x2a1   : > { %495 = vmatpush.bf16.msrb.mxu2 %v486_v5 }
 0x2a5   : > { %609 = vmatpush.bf16.msra.mxu2 %v600_v7  ;;  %v476_v8 = vpop.xlane.xlu0 %475 }
 0x2a6   : > { %934 = vrcp.f32 %v476_v8 }
 0x2ac   : > { %v935_v9 = vpop.eup %934 }
 0x2ad   : > { %v478_v10 = vmul.f32 %v935_v9, %v929_v58  ;;  %v590_v11 = vpop.xlane.xlu0 %589 }
 0x2ae   : > { %936 = vrcp.f32 %v590_v11  ;;  %v916_v11 = vld [vmem:[%s1202_s9] ss:$0 sm:$0xff] }
 0x2af   : > { %v479_v12 = vpack.c.bf16 %v478_v10, %v478_v10  ;;  %938 = vrcp.f32 %v533_v2 }
 0x2b0   : > { %940 = vrcp.f32 %v972_v48 }
 0x2b1   : > { %881 = vmatmul.msk.bf16.vlgmr.msrb.gmra.mxu2 %vm389_vm1, %v479_v12 }
 0x2b4   : > { %v937_v13 = vpop.eup %936 }
 0x2b5   : > { %v592_v14 = vmul.f32 %v937_v13, %v931_v60  ;;  %v939_v15 = vpop.eup %938  ;;  %v699_v60 = vld [vmem:[%s1198_s5 + $0x18] sm:$0xff]  ;;  %v917_v13 = vld [vmem:[%s1202_s9 + $0x1] ss:$0 sm:$0xff] }
 0x2b6   : > { %v535_v16 = vmul.f32 %v939_v15, %v927_v54  ;;  %v941_v49 = vpop.eup %940  ;;  %v702_v61 = vpack.c.bf16 %v699_v60, %v698_v59 }
 0x2b7   : > { %v593_v17 = vpack.c.bf16 %v592_v14, %v592_v14  ;;  %v667_v50 = vmul.f32 32.0, %v941_v49  ;;  %vm671_vm5 = vweird.f32 %v941_v49 }
 0x2b8   : > { %v536_v20 = vpack.c.bf16 %v535_v16, %v535_v16 }
 0x2b9   : > { %v668_v51 = vsub.f32 1.0, %v667_v50 }
 0x2bb   : > { %v669_v52 = vmul.f32 %v941_v49, %v668_v51 }
 0x2bd   : > { %v670_v53 = vadd.f32 %v941_v49, %v669_v52 }
 0x2bf   : > { %v1121_v54 = vsel %vm671_vm5, %v941_v49, %v670_v53 }
 0x2c0   : > { %v538_v18 = vpop.permute.xlu0 %537 }
 0x2c1   : > { %885 = vmatmul.msk.bf16.vlgmr.msra.gmra.mxu2 %vm389_vm1, %v593_v17  ;;  %v543_v19 = vsel %vm427_vm2, %v538_v18, 0  ;;  %v734_v18 = vld [vmem:[%s1200_s7 + $0x10] sm:$0xff] }
 0x2c2   : > { %552 = vmatpush.bf16.msrb.mxu1 %v543_v19  ;;  %v735_v19 = vld [vmem:[%s1200_s7 + $0x18] sm:$0xff] }
 0x2c5   : > { %883 = vmatmul.msk.bf16.vlgmr.msrb.gmra.mxu1 %vm389_vm1, %v536_v20  ;;  %v738_v20 = vpack.c.bf16 %v735_v19, %v734_v18 }
 0x2c6   : > { %716 = vmatpush.bf16.msra.mxu1 %v702_v61  ;;  %v921_v61 = vld [vmem:[%s1202_s9 + $0x3] ss:$0 sm:$0xff] }
 0x2c7   : > { %752 = vmatpush.bf16.msra.mxu3 %v738_v20 }
 0x2ca   : > { %717 = vmatpush.bf16.msra.mxu1 %v701_v0 }
 0x316   : > { %v440_v21 = vpop.f32.mrf.mxu2 }
 0x31e   : > { %v442_v22 = vpop.f32.mrf.mxu2 }
 0x31f   : > { %v733_v22 = vld [vmem:[%s1200_s7 + $0x8] sm:$0xff] }
 0x334   : > { %v497_v23 = vpop.f32.mrf.mxu2 }
 0x335   : > { %616 = vrot.lane.b32.xlu1 %v497_v23, %s969_s22 }
 0x33c   : > { %v499_v24 = vpop.f32.mrf.mxu2 }
 0x33d   : > { %v918_v24 = vld [vmem:[%s1199_s6] ss:$0 sm:$0xff] }
 0x342   : > { %v554_v25 = vpop.f32.mrf.mxu1 }
 0x343   : > { %620 = vrot.lane.b32.xlu2 %v554_v25, %s970_s24 }
 0x344   : > { %v611_v26 = vpop.f32.mrf.mxu2 }
 0x345   : > { %624 = vrot.lane.b32.xlu1 %v611_v26, %s971_s25 }
 0x34a   : > { %v556_v27 = vpop.f32.mrf.mxu1 }
 0x34c   : > { %v613_v28 = vpop.f32.mrf.mxu2 }
 0x39d   : > { %v621_v37 = vpop.permute.xlu2 %620 }
 0x3a7   : > { %v617_v35 = vpop.permute.xlu1 %616 }
 0x3a8   : > { %v627_v36 = vsel %vm389_vm1, %v440_v21, %v617_v35  ;;  %v732_v21 = vld [vmem:[%s1200_s7] sm:$0xff] }
 0x3a9   : > { %v629_v39 = vsel %vm628_vm3, %v627_v36, %v621_v37  ;;  %v737_v23 = vpack.c.bf16 %v733_v22, %v732_v21 }
 0x3ab   : > { %753 = vmatpush.bf16.msra.mxu3 %v737_v23 }
 0x3b7   : > { %v625_v38 = vpop.permute.xlu1 %624 }
 0x3b8   : > { %v631_v40 = vsel %vm630_vm4, %v629_v39, %v625_v38  ;;  %v919_v38 = vld [vmem:[%s1201_s8] ss:$0 sm:$0xff] }
 0x3b9   : > { %v636_v41 = vpack.c.bf16 %v631_v40, %v631_v40 }
 0x3bb   : > { %886 = vmatmul.msk.bf16.vlgmr.msra.gmra.mxu0 %vm368_vm0, %v636_v41 }
 0x438   : > { %v651_v43 = vpop.f32.mrf.mxu0 }
 0x439   : > { %v655_v44 = vadd.f32 %v651_v43, %v1056_v6 }
 0x43b   : > { %v660_v45 = vadd.f32 %v915_v42, %v655_v44 }
 0x43d   : > { %v663_v46 = vsel %vm368_vm0, %v660_v45, 0.0 }
 0x43e   : > { %664 = vadd.xlane.f32.xlu2 %v663_v46 }
 0x440   : > { %v653_v47 = vpop.f32.mrf.mxu0 }
 0x4b1   : > { %v665_v55 = vpop.xlane.xlu2 %664 }
 0x4b2   : > { %v673_v56 = vmul.f32 %v1121_v54, %v665_v55 }
 0x4b4   : > { %v674_v57 = vsub.f32 %v660_v45, %v673_v56 }
 0x4b6   : > { %v675_v6 = vmul.f32 %v674_v57, %v674_v57 }
 0x4b8   : > { %v676_v58 = vsel %vm368_vm0, %v675_v6, 0.0 }
 0x4b9   : > { %677 = vadd.xlane.f32.xlu1 %v676_v58  ;;  %v920_v58 = vld [vmem:[%s1202_s9 + $0x2] ss:$0 sm:$0xff] }
 0x52c   : > { %v678_v1 = vpop.xlane.xlu1 %677 }
 0x52d   : > { %v679_v2 = vmul.f32 %v678_v1, %v1121_v54 }
 0x52f   : > { %v680_v3 = vadd.f32 1e-05, %v679_v2 }
 0x531   : > { %942 = vrsqrt.f32 %v680_v3  ;;  %vm687_vm7 = vweird.f32 %v680_v3 }
 0x537   : > { %v943_v4 = vpop.eup %942 }
 0x538   : > { %v682_v5 = vmul.f32 %v943_v4, %v680_v3  ;;  %vm688_vm6 = vweird.f32 %v943_v4 }
 0x539   : > { %vm689_vm8 = vmor %vm687_vm7, %vm688_vm6 }
 0x53a   : > { %v683_v7 = vmul.f32 %v943_v4, %v682_v5 }
 0x53c   : > { %v684_v8 = vmul.f32 0.5, %v683_v7 }
 0x53e   : > { %v685_v9 = vsub.f32 1.5, %v684_v8 }
 0x540   : > { %v686_v10 = vmul.f32 %v943_v4, %v685_v9 }
 0x542   : > { %v690_v12 = vsel %vm689_vm8, %v943_v4, %v686_v10 }
 0x543   : > { %v691_v14 = vmul.f32 %v690_v12, %v674_v57 }
 0x545   : > { %v693_v15 = vmul.f32 %v916_v11, %v691_v14 }
 0x547   : > { %v695_v16 = vadd.f32 %v917_v13, %v693_v15 }
 0x549   : > { %v700_v17 = vpack.c.bf16 %v695_v16, %v695_v16 }
 0x54b   : > { %887 = vmatmul.msk.bf16.vlgmr.msra.gmra.mxu1 %vm368_vm0, %v700_v17 }
 0x5c8   : > { %v719_v25 = vpop.f32.mrf.mxu1 }
 0x5c9   : > { %v720_v26 = vadd.f32 %v918_v24, %v719_v25 }
 0x5cb   : > { %v723_v27 = vmul.f32 %v720_v26, %v720_v26 }
 0x5cd   : > { %v724_v28 = vmul.f32 %v723_v27, %v720_v26 }
 0x5cf   : > { %v725_v29 = vmul.f32 0.044715, %v724_v28 }
 0x5d0   : > { %v721_v30 = vpop.f32.mrf.mxu1 }
 0x5d1   : > { %v726_v31 = vadd.f32 %v725_v29, %v720_v26 }
 0x5d3   : > { %v727_v32 = vmul.f32 0.7978846, %v726_v31 }
 0x5d5   : > { %944 = vtanh.f32 %v727_v32 }
 0x5db   : > { %v945_v33 = vpop.eup %944 }
 0x5dc   : > { %v729_v34 = vadd.f32 1.0, %v945_v33 }
 0x5de   : > { %v730_v35 = vmul.f32 0.5, %v729_v34 }
 0x5e0   : > { %v731_v36 = vmul.f32 %v730_v35, %v720_v26 }
 0x5e2   : > { %v736_v37 = vpack.c.bf16 %v731_v36, %v731_v36 }
 0x5e4   : > { %888 = vmatmul.msk.bf16.vlgmr.msra.gmra.mxu3 %vm368_vm0, %v736_v37 }
 0x667   : > { %v755_v39 = vpop.f32.mrf.mxu3 }
 0x668   : > { %v756_v40 = vadd.f32 %v919_v38, %v755_v39 }
 0x66a   : > { %v759_v41 = vadd.f32 %v756_v40, %v695_v16  ;;  %v922_v16 = vld [vmem:[%s1202_s9 + $0x4] ss:$0 sm:$0xff] }
 0x66c   : > { %v762_v42 = vsel %vm368_vm0, %v759_v41, 0.0 }
 0x66d   : > { %763 = vadd.xlane.f32.xlu0 %v762_v42 }
 0x66f   : > { %v757_v43 = vpop.f32.mrf.mxu3 }
 0x6e0   : > { %v764_v44 = vpop.xlane.xlu0 %763 }
 0x6e1   : > { %v765_v45 = vmul.f32 %v764_v44, %v1121_v54 }
 0x6e3   : > { %v766_v46 = vsub.f32 %v759_v41, %v765_v45 }
 0x6e5   : > { %v767_v47 = vmul.f32 %v766_v46, %v766_v46 }
 0x6e7   : > { %v768_v48 = vsel %vm368_vm0, %v767_v47, 0.0 }
 0x6e8   : > { %769 = vadd.xlane.f32.xlu2 %v768_v48 }
 0x75b   : > { %v770_v49 = vpop.xlane.xlu2 %769 }
 0x75c   : > { %v771_v50 = vmul.f32 %v770_v49, %v1121_v54 }
 0x75e   : > { %v772_v51 = vadd.f32 1e-05, %v771_v50 }
 0x760   : > { %946 = vrsqrt.f32 %v772_v51  ;;  %vm779_vm10 = vweird.f32 %v772_v51 }
 0x766   : > { %v947_v52 = vpop.eup %946 }
 0x767   : > { %v774_v53 = vmul.f32 %v947_v52, %v772_v51  ;;  %vm780_vm9 = vweird.f32 %v947_v52 }
 0x768   : > { %vm781_vm11 = vmor %vm779_vm10, %vm780_vm9 }
 0x769   : > { %v775_v55 = vmul.f32 %v947_v52, %v774_v53 }
 0x76b   : > { %v776_v56 = vmul.f32 0.5, %v775_v55 }
 0x76d   : > { %v777_v57 = vsub.f32 1.5, %v776_v56 }
 0x76f   : > { %v778_v6 = vmul.f32 %v947_v52, %v777_v57 }
 0x771   : > { %v782_v59 = vsel %vm781_vm11, %v947_v52, %v778_v6 }
 0x772   : > { %v783_v60 = vmul.f32 %v782_v59, %v766_v46 }
 0x774   : > { %v785_v62 = vmul.f32 %v920_v58, %v783_v60 }
 0x776   : > { %v787_v63 = vadd.f32 %v921_v61, %v785_v62 }
 0x778   : > { %v790_v0 = vsel %vm368_vm0, %v787_v63, 0.0 }
 0x779   : > { %791 = vadd.xlane.f32.xlu1 %v790_v0 }
 0x7ec   : > { %v792_v1 = vpop.xlane.xlu1 %791 }
 0x7ed   : > { %v793_v2 = vmul.f32 %v792_v1, %v1121_v54 }
 0x7ef   : > { %v794_v3 = vsub.f32 %v787_v63, %v793_v2 }
 0x7f1   : > { %v795_v4 = vmul.f32 %v794_v3, %v794_v3 }
 0x7f3   : > { %v796_v5 = vsel %vm368_vm0, %v795_v4, 0.0 }
 0x7f4   : > { %797 = vadd.xlane.f32.xlu0 %v796_v5 }
 0x867   : > { %v798_v7 = vpop.xlane.xlu0 %797 }
 0x868   : > { %v799_v8 = vmul.f32 %v798_v7, %v1121_v54  ;;  %v923_v54 = vld [vmem:[%s1202_s9 + $0x5] ss:$0 sm:$0xff] }
 0x86a   : > { %v800_v9 = vadd.f32 1e-05, %v799_v8 }
 0x86c   : > { %948 = vrsqrt.f32 %v800_v9  ;;  %vm807_vm13 = vweird.f32 %v800_v9 }
 0x872   : > { %v949_v10 = vpop.eup %948 }
 0x873   : > { %v802_v11 = vmul.f32 %v949_v10, %v800_v9  ;;  %vm808_vm12 = vweird.f32 %v949_v10 }
 0x874   : > { %vm809_vm14 = vmor %vm807_vm13, %vm808_vm12 }
 0x875   : > { %v803_v12 = vmul.f32 %v949_v10, %v802_v11 }
 0x877   : > { %v804_v13 = vmul.f32 0.5, %v803_v12 }
 0x879   : > { %v805_v14 = vsub.f32 1.5, %v804_v13 }
 0x87b   : > { %v806_v15 = vmul.f32 %v949_v10, %v805_v14 }
 0x87d   : > { %v810_v17 = vsel %vm809_vm14, %v949_v10, %v806_v15 }
 0x87e   : > { %v811_v18 = vmul.f32 %v810_v17, %v794_v3 }
 0x880   : > { %v813_v19 = vmul.f32 %v922_v16, %v811_v18 }
 0x882   : > { %v815_v20 = vadd.f32 %v923_v54, %v813_v19 }
 0x884   : > { %816 = vst.msk [vmem:[%s354_s18] sm:$0xff] %vm368_vm0, %v815_v20 }
 0x885 PF: > { %s20_s13 = sadd.s32 1, %s956_s13  }
 0x886   : > { %p17_p4 = scmp.ge.s32.totalorder %s20_s13, 4  }
 0x888   :  { %19 = sbr.rel (!%p17_p4) target bundleno = 1 (0x1), region = 90 }

// kernel: informer_stack_forward.15
= control target key start
LH: loop header
LB: loop body
LE: loop exit
PB: predicated region body
PF: predicated region fallthrough
CT: control target
= control target key end

     0   :  { %vm26_vm0 = vcmask 261120   ;;  %v172_v6 = vmov 32.0   ;;  %vm148_vm11 = vcmask 31744   ;;  %s255_s0 = inlined_call_operand.vmem [shape: f32[24,32], index: 0, kind: input, shape index: {}]   ;;  %s256_s1 = inlined_call_operand.vmem [shape: f32[1,32], index: 1, kind: input, shape index: {}]   ;;  %s257_s2 = inlined_call_operand.vmem [shape: f32[1,32], index: 2, kind: input, shape index: {}]   ;;  %s258_s4 = inlined_call_operand.vmem [shape: f32[1,4], index: 4, kind: input, shape index: {}]   ;;  %s259_s3 = inlined_call_operand.vmem [shape: f32[32,4], index: 3, kind: input, shape index: {}]   ;;  %s260_s5 = inlined_call_operand.vmem [shape: f32[24,4], index: 5, kind: output, shape index: {}]  }
   0x1   :  { %v21_v0 = vld [vmem:[%s255_s0] sm:$0xff]  ;;  %v23_v1 = vld [vmem:[%s255_s0 + $0x10] sm:$0xff]  ;;  %v22_v4 = vld [vmem:[%s255_s0 + $0x8] sm:$0xff]  ;;  %164 = vrcp.f32 %v172_v6 }
   0x2   :  { %v27_v2 = vsel %vm26_vm0, %v21_v0, 0.0  ;;  %v33_v3 = vsel %vm26_vm0, %v23_v1, 0.0  ;;  %v30_v5 = vsel %vm26_vm0, %v22_v4, 0.0  ;;  %v114_v28 = vld [vmem:[%s259_s3 + $0x10] sm:$0xff]  ;;  %v115_v29 = vld [vmem:[%s259_s3 + $0x18] sm:$0xff]  ;;  %v112_v33 = vld [vmem:[%s259_s3] sm:$0xff] }
   0x3   :  { %28 = vadd.xlane.f32.xlu0 %v27_v2  ;;  %34 = vadd.xlane.f32.xlu1 %v33_v3  ;;  %v119_v30 = vpack.c.bf16 %v115_v29, %v114_v28  ;;  %v113_v34 = vld [vmem:[%s259_s3 + $0x8] sm:$0xff]  ;;  %v161_v57 = vld [vmem:[%s256_s1] ss:$0 sm:$0xff] }
   0x4   :  { %v118_v35 = vpack.c.bf16 %v113_v34, %v112_v33 }
   0x5   :  { %136 = vmatpush.bf16.msra.mxu0 %v119_v30  ;;  %158 = vmatpush.bf16.msra.mxu1 %v119_v30 }
   0x7   :  { %v165_v7 = vpop.eup %164 }
   0x8   :  { %v37_v8 = vmul.f32 32.0, %v165_v7  ;;  %vm41_vm1 = vweird.f32 %v165_v7 }
   0x9   :  { %137 = vmatpush.bf16.msra.mxu0 %v118_v35  ;;  %159 = vmatpush.bf16.msra.mxu1 %v118_v35 }
   0xa   :  { %v38_v9 = vsub.f32 1.0, %v37_v8 }
   0xb   :  { %31 = vadd.xlane.f32.xlu0 %v30_v5 }
   0xc   :  { %v39_v10 = vmul.f32 %v165_v7, %v38_v9 }
   0xe   :  { %v40_v11 = vadd.f32 %v165_v7, %v39_v10 }
  0x10   :  { %v42_v12 = vsel %vm41_vm1, %v165_v7, %v40_v11 }
  0x76   :  { %v29_v13 = vpop.xlane.xlu0 %28  ;;  %v35_v17 = vpop.xlane.xlu1 %34 }
  0x77   :  { %v43_v14 = vmul.f32 %v42_v12, %v29_v13  ;;  %v45_v21 = vmul.f32 %v42_v12, %v35_v17  ;;  %v163_v13 = vld [vmem:[%s258_s4] ss:$0 sm:$0xff] }
  0x79   :  { %v46_v15 = vsub.f32 %v21_v0, %v43_v14  ;;  %v216_v23 = vsub.f32 %v23_v1, %v45_v21  ;;  %v162_v0 = vld [vmem:[%s257_s2] ss:$0 sm:$0xff] }
  0x7b   :  { %v49_v16 = vmul.f32 %v46_v15, %v46_v15  ;;  %v51_v26 = vmul.f32 %v216_v23, %v216_v23 }
  0x7d   :  { %v52_v18 = vsel %vm26_vm0, %v49_v16, 0.0  ;;  %v58_v27 = vsel %vm26_vm0, %v51_v26, 0.0 }
  0x7e   :  { %53 = vadd.xlane.f32.xlu1 %v52_v18  ;;  %v32_v19 = vpop.xlane.xlu0 %31 }
  0x7f   :  { %v44_v20 = vmul.f32 %v42_v12, %v32_v19 }
  0x81   :  { %v47_v22 = vsub.f32 %v22_v4, %v44_v20 }
  0x83   :  { %v50_v24 = vmul.f32 %v47_v22, %v47_v22 }
  0x85   :  { %v55_v25 = vsel %vm26_vm0, %v50_v24, 0.0 }
  0x86   :  { %56 = vadd.xlane.f32.xlu2 %v55_v25 }
  0x8e   :  { %59 = vadd.xlane.f32.xlu2 %v58_v27 }
  0xf1   :  { %v54_v31 = vpop.xlane.xlu1 %53 }
  0xf2   :  { %v61_v32 = vmul.f32 %v54_v31, %v42_v12 }
  0xf4   :  { %v64_v36 = vadd.f32 1e-05, %v61_v32 }
  0xf6   :  { %166 = vrsqrt.f32 %v64_v36  ;;  %vm73_vm3 = vweird.f32 %v64_v36 }
  0xf9   :  { %v57_v37 = vpop.xlane.xlu2 %56 }
  0xfa   :  { %v62_v38 = vmul.f32 %v57_v37, %v42_v12 }
  0xfc   :  { %v167_v39 = vpop.eup %166  ;;  %v65_v40 = vadd.f32 1e-05, %v62_v38 }
  0xfd   :  { %v68_v41 = vmul.f32 %v167_v39, %v64_v36  ;;  %vm74_vm2 = vweird.f32 %v167_v39 }
  0xfe   :  { %168 = vrsqrt.f32 %v65_v40  ;;  %vm75_vm4 = vmor %vm73_vm3, %vm74_vm2  ;;  %vm83_vm6 = vweird.f32 %v65_v40 }
  0xff   :  { %v69_v42 = vmul.f32 %v167_v39, %v68_v41 }
 0x101   :  { %v70_v43 = vmul.f32 0.5, %v69_v42  ;;  %v60_v44 = vpop.xlane.xlu2 %59 }
 0x102   :  { %v63_v45 = vmul.f32 %v60_v44, %v42_v12 }
 0x103   :  { %v71_v46 = vsub.f32 1.5, %v70_v43 }
 0x104   :  { %v169_v47 = vpop.eup %168  ;;  %v66_v48 = vadd.f32 1e-05, %v63_v45 }
 0x105   :  { %v72_v49 = vmul.f32 %v167_v39, %v71_v46  ;;  %v78_v50 = vmul.f32 %v169_v47, %v65_v40  ;;  %vm84_vm5 = vweird.f32 %v169_v47 }
 0x106   :  { %170 = vrsqrt.f32 %v66_v48  ;;  %vm85_vm7 = vmor %vm83_vm6, %vm84_vm5  ;;  %vm93_vm9 = vweird.f32 %v66_v48 }
 0x107   :  { %v79_v51 = vmul.f32 %v169_v47, %v78_v50  ;;  %v76_v52 = vsel %vm75_vm4, %v167_v39, %v72_v49 }
 0x108   :  { %v97_v56 = vmul.f32 %v76_v52, %v46_v15 }
 0x109   :  { %v80_v53 = vmul.f32 0.5, %v79_v51 }
 0x10a   :  { %v103_v63 = vmul.f32 %v161_v57, %v97_v56 }
 0x10b   :  { %v81_v54 = vsub.f32 1.5, %v80_v53 }
 0x10c   :  { %v171_v55 = vpop.eup %170  ;;  %v109_v4 = vadd.f32 %v162_v0, %v103_v63 }
 0x10d   :  { %v82_v58 = vmul.f32 %v169_v47, %v81_v54  ;;  %v88_v59 = vmul.f32 %v171_v55, %v66_v48  ;;  %vm94_vm8 = vweird.f32 %v171_v55 }
 0x10e   :  { %vm95_vm10 = vmor %vm93_vm9, %vm94_vm8 }
 0x10f   :  { %v86_v60 = vsel %vm85_vm7, %v169_v47, %v82_v58  ;;  %v89_v61 = vmul.f32 %v171_v55, %v88_v59 }
 0x110   :  { %v98_v62 = vmul.f32 %v86_v60, %v47_v22 }
 0x111   :  { %v90_v1 = vmul.f32 0.5, %v89_v61 }
 0x112   :  { %v104_v2 = vmul.f32 %v161_v57, %v98_v62 }
 0x113   :  { %v91_v3 = vsub.f32 1.5, %v90_v1 }
 0x114   :  { %v110_v5 = vadd.f32 %v162_v0, %v104_v2 }
 0x115   :  { %v92_v6 = vmul.f32 %v171_v55, %v91_v3 }
 0x116   :  { %v116_v7 = vpack.c.bf16 %v110_v5, %v109_v4 }
 0x117   :  { %v96_v8 = vsel %vm95_vm10, %v171_v55, %v92_v6 }
 0x118   :  { %156 = vmatmul.msk.bf16.vlgmr.msra.gmra.mxu0 %vm26_vm0, %v116_v7  ;;  %v99_v9 = vmul.f32 %v96_v8, %v216_v23 }
 0x11a   :  { %v105_v10 = vmul.f32 %v161_v57, %v99_v9 }
 0x11c   :  { %v111_v11 = vadd.f32 %v162_v0, %v105_v10 }
 0x11e   :  { %v117_v12 = vpack.c.bf16 %v111_v11, %v111_v11 }
 0x120   :  { %157 = vmatmul.msk.bf16.vlgmr.msra.gmra.mxu1 %vm26_vm0, %v117_v12 }
 0x195   :  { %v139_v14 = vpop.f32.mrf.mxu0 }
 0x196   :  { %v140_v15 = vadd.f32 %v163_v13, %v139_v14 }
 0x198   :  { %149 = vst.msk [vmem:[%s260_s5] sm:$0xff] %vm148_vm11, %v140_v15 }
 0x19d   :  { %v141_v16 = vpop.f32.mrf.mxu0  ;;  %v144_v17 = vpop.f32.mrf.mxu1 }
 0x19e   :  { %v142_v18 = vadd.f32 %v163_v13, %v141_v16  ;;  %v145_v19 = vadd.f32 %v163_v13, %v144_v17 }
 0x1a0   :  { %150 = vst.msk [vmem:[%s260_s5 + $0x8] sm:$0xff] %vm148_vm11, %v142_v18 }
 0x1a1   :  { %151 = vst.msk [vmem:[%s260_s5 + $0x10] sm:$0xff] %vm148_vm11, %v145_v19 }
 0x1a5   :  { %v146_v20 = vpop.f32.mrf.mxu1 }

// kernel: informer_stack_forward.13
= control target key start
LH: loop header
LB: loop body
LE: loop exit
PB: predicated region body
PF: predicated region fallthrough
CT: control target
= control target key end

     0   :  { %s482_s18 = smov 0   ;;  %s519_s0 = inlined_call_operand.vmem [shape: f32[2,12,4], index: 0, kind: input, shape index: {}]   ;;  %s520_s1 = inlined_call_operand.vmem [shape: f32[2,12,32], index: 1, kind: input, shape index: {}]   ;;  %s521_s2 = inlined_call_operand.vmem [shape: f32[4,32], index: 2, kind: input, shape index: {}]   ;;  %s522_s3 = inlined_call_operand.vmem [shape: f32[4,32], index: 3, kind: input, shape index: {}]   ;;  %s523_s4 = inlined_call_operand.vmem [shape: f32[4,32], index: 4, kind: input, shape index: {}]   ;;  %s524_s5 = inlined_call_operand.vmem [shape: f32[2,12,32], index: 5, kind: output, shape index: {}]  }
   0x1 LB: > { %s417_s19 = sadd.s32 4294967295, %s450_s18   ;;  %p421_p0 = scmp.ge.s32.totalorder %s450_s18, 1  ;;  %s450_s18 = sphi %s482_s18, %s15_s18  }
   0x2   : > { %p197_p1 = scmp.lt.s32.totalorder %s450_s18, 3 }
   0x4   : > { %p198_p2 = pnand %p421_p0, %p197_p1 }
   0x5   : > { %p230_p3 = scmp.lt.s32.totalorder (!%p198_p2), %s417_s19, 1 }
   0x6   : > { %201 = sbr.rel (%p198_p2) target bundleno = 167 (0xa7), region = 40 }
   0xb   : > { %v272_v0 = vld [vmem:[%s522_s3] sm:$0xf]  ;;  %vm279_vm0 = vcmask 1041408   ;;  %s526_s19 = smov (!%p230_p3, %s417_s19), 1  ;;  %vm275_vm1 = vcmask 31744   ;;  %vm252_vm2 = vcmask 1040384  }
   0xc   : > { %v274_v1 = vpack.c.bf16 %v272_v0, %v272_v0  ;;  %v269_v2 = vld [vmem:[%s521_s2] sm:$0xf]  ;;  %s499_s26 = sshll.u32 %s526_s19, 4  ;;  %vm259_vm3 = vcmask 1046528   ;;  %vm267_vm4 = vcmask 1042432   ;;  %vm346_vm5 = vcmask 261120  }
   0xd   : > { %v317_v3 = vld [vmem:[%s523_s4] sm:$0xf]  ;;  %v271_v4 = vpack.c.bf16 %v269_v2, %v269_v2  ;;  %s234_s29 = scalar_lea.vmem %s519_s0, %s499_s26  ;;  %s239_s7 = scalar_lea.vmem %s520_s1, %s499_s26  ;;  %vm348_vm6 = vcmask 257024  }
   0xe   : > { %v319_v5 = vpack.c.bf16 %v317_v3, %v317_v3  ;;  %v281_v6 = vsel %vm279_vm0, %v274_v1, 0  ;;  %v246_v9 = vld [vmem:[%s234_s29] sm:$0xff]  ;;  %v247_v10 = vld [vmem:[%s234_s29 + $0x8] sm:$0xf]  ;;  %s244_s10 = scalar_lea.vmem %s524_s5, %s499_s26 }
   0xf   : > { %290 = vmatpush.bf16.msra.mxu0 %v281_v6  ;;  %v301_v7 = vsel %vm279_vm0, %v271_v4, 0  ;;  %v273_v11 = vpack.c.bf16 %v247_v10, %v246_v9  ;;  %v249_v12 = vrot.slane %v247_v10, 3  ;;  %v253_v13 = vrot.slane %v246_v9, 7  ;;  %v342_v28 = vld [vmem:[%s239_s7] sm:$0xff]  ;;  %v343_v35 = vld [vmem:[%s239_s7 + $0x8] sm:$0xf] }
  0x10   : > { %v324_v8 = vsel %vm279_vm0, %v319_v5, 0  ;;  %310 = vmatpush.bf16.msra.mxu1 %v301_v7  ;;  %v254_v14 = vrot.slane %v247_v10, 7  ;;  %v260_v15 = vrot.slane %v246_v9, 1  ;;  %v261_v16 = vrot.slane %v247_v10, 1 }
  0x11   : > { %333 = vmatpush.bf16.msra.mxu2 %v324_v8  ;;  %v265_v17 = vrot.slane %v246_v9, 5  ;;  %v258_v19 = vsel %vm252_vm2, %v249_v12, %v253_v13 }
  0x12   : > { %428 = vmatmul.msk.bf16.vlgmr.msra.gmra.mxu0 %vm275_vm1, %v273_v11  ;;  %v255_v18 = vsel %vm252_vm2, %v253_v13, %v254_v14  ;;  %v262_v21 = vsel %vm259_vm3, %v260_v15, %v261_v16 }
  0x13   : > { %v270_v20 = vpack.c.bf16 %v255_v18, %v258_v19  ;;  %v268_v22 = vsel %vm267_vm4, %v261_v16, %v265_v17 }
  0x14   : > { %v318_v23 = vpack.c.bf16 %v268_v22, %v262_v21 }
  0x15   : > { %429 = vmatmul.msk.bf16.vlgmr.msra.gmra.mxu1 %vm275_vm1, %v270_v20 }
  0x16   : > { %430 = vmatmul.msk.bf16.vlgmr.msra.gmra.mxu2 %vm275_vm1, %v318_v23 }
  0x8f   : > { %v292_v25 = vpop.f32.mrf.mxu0 }
  0x92   : > { %v312_v24 = vpop.f32.mrf.mxu1 }
  0x93   : > { %v313_v26 = vadd.f32 %v312_v24, %v292_v25 }
  0x97   : > { %v294_v32 = vpop.f32.mrf.mxu0 }
  0x99   : > { %v335_v27 = vpop.f32.mrf.mxu2 }
  0x9a   : > { %v340_v29 = vadd.f32 %v335_v27, %v313_v26  ;;  %v314_v31 = vpop.f32.mrf.mxu1 }
  0x9b   : > { %v315_v33 = vadd.f32 %v314_v31, %v294_v32 }
  0x9c   : > { %v344_v30 = vadd.f32 %v342_v28, %v340_v29 }
  0x9e   : > { %347 = vst.msk [vmem:[%s244_s10] sm:$0xff] %vm346_vm5, %v344_v30 }
  0xa1   : > { %v337_v34 = vpop.f32.mrf.mxu2 }
  0xa2   : > { %v341_v36 = vadd.f32 %v337_v34, %v315_v33 }
  0xa4   : > { %v345_v37 = vadd.f32 %v343_v35, %v341_v36 }
  0xa6   : > { %349 = vst.msk [vmem:[%s244_s10 + $0x8] sm:$0xf] %vm348_vm6, %v345_v37 }
  0xa7 PF: > { %s15_s18 = sadd.s32 1, %s450_s18  }
  0xa8   : > { %p12_p4 = scmp.ge.s32.totalorder %s15_s18, 4  }
  0xaa   :  { %14 = sbr.rel (!%p12_p4) target bundleno = 1 (0x1), region = 73 }

// kernel: informer_stack_forward.14
= control target key start
LH: loop header
LB: loop body
LE: loop exit
PB: predicated region body
PF: predicated region fallthrough
CT: control target
= control target key end

     0   :  { %s2097_s24 = smov 0   ;;  %s2476_s0 = inlined_call_operand.vmem [shape: f32[2,12,32], index: 0, kind: input, shape index: {}]   ;;  %s2477_s1 = inlined_call_operand.vmem [shape: f32[2,16,32], index: 1, kind: input, shape index: {}]   ;;  %s2478_s2 = inlined_call_operand.vmem [shape: f32[32,96], index: 2, kind: input, shape index: {}]   ;;  %s2479_s3 = inlined_call_operand.vmem [shape: f32[1,96], index: 3, kind: input, shape index: {}]   ;;  %s2480_s4 = inlined_call_operand.vmem [shape: f32[32,32], index: 4, kind: input, shape index: {}]   ;;  %s2481_s5 = inlined_call_operand.vmem [shape: f32[1,32], index: 5, kind: input, shape index: {}]   ;;  %s2482_s6 = inlined_call_operand.vmem [shape: f32[32,32], index: 6, kind: input, shape index: {}]   ;;  %s2483_s7 = inlined_call_operand.vmem [shape: f32[1,32], index: 7, kind: input, shape index: {}]   ;;  %s2484_s8 = inlined_call_operand.vmem [shape: f32[32,64], index: 8, kind: input, shape index: {}]   ;;  %s2485_s9 = inlined_call_operand.vmem [shape: f32[1,64], index: 9, kind: input, shape index: {}]   ;;  %s2486_s10 = inlined_call_operand.vmem [shape: f32[32,32], index: 10, kind: input, shape index: {}]   ;;  %s2487_s11 = inlined_call_operand.vmem [shape: f32[1,32], index: 11, kind: input, shape index: {}]   ;;  %s2488_s12 = inlined_call_operand.vmem [shape: f32[32,32], index: 12, kind: input, shape index: {}]   ;;  %s2489_s13 = inlined_call_operand.vmem [shape: f32[1,32], index: 13, kind: input, shape index: {}]   ;;  %s2490_s14 = inlined_call_operand.vmem [shape: f32[32,32], index: 14, kind: input, shape index: {}]   ;;  %s2491_s15 = inlined_call_operand.vmem [shape: f32[1,32], index: 15, kind: input, shape index: {}]   ;;  %s2492_s16 = inlined_call_operand.vmem [shape: f32[6,32], index: 16, kind: input, shape index: {}]   ;;  %s2493_s17 = inlined_call_operand.vmem [shape: f32[2,12,32], index: 17, kind: output, shape index: {}]  }
   0x1   :  { %2499 = sst [smem:[#allocation2_spill]] %s2476_s0 }
   0x2   :  { %2500 = sst [smem:[#allocation3_spill]] %s2477_s1 }
   0x3 LB: > { %s1791_s25 = sadd.s32 4294967295, %s1989_s24   ;;  %p1795_p0 = scmp.ge.s32.totalorder %s1989_s24, 1  ;;  %s1989_s24 = sphi %s2097_s24, %s27_s24  }
   0x4   : > { %p497_p1 = scmp.lt.s32.totalorder %s1989_s24, 3 }
   0x6   : > { %p498_p2 = pnand %p1795_p0, %p497_p1 }
   0x7   : > { %p554_p3 = scmp.lt.s32.totalorder (!%p498_p2), %s1791_s25, 1  ;;  %s2501_s22 = sld [smem:[#allocation2_spill]] (!%p498_p2) }
   0x8   : > { %501 = sbr.rel (%p498_p2) target bundleno = 3446 (0xd76), region = 88  ;;  %s1991_s27 = smov (!%p498_p2), 104  }
   0x9   : > { %s1992_s28 = smov (!%p498_p2), 120   ;;  %s2497_s29 = smov (!%p498_p2), 96  }
   0xa   : > { %s2494_s0 = smov (!%p498_p2), 80   ;;  %s2496_s30 = smov (!%p498_p2), 72  }
   0xb   : > { %s2498_s18 = smov (!%p498_p2), 88   ;;  %s1997_s19 = smov (!%p498_p2), 112  }
   0xc   : > { %s1998_s20 = smov (!%p498_p2), 64   ;;  %s1999_s21 = smov (!%p498_p2), 56  }
   0xd   : > { %v576_v0 = vld [vmem:[%s2478_s2 + $0x10] sm:$0xff]  ;;  %v577_v1 = vld [vmem:[%s2478_s2 + $0x18] sm:$0xff]  ;;  %v574_v2 = vld [vmem:[%s2478_s2] sm:$0xff]  ;;  %s2509_s25 = smov (!%p554_p3, %s1791_s25), 1  ;;  %vm585_vm0 = vcmask 261120   ;;  %vm614_vm1 = vcmask 64512   ;;  %v603_v26 = vlaneseq }
   0xe   : > { %v580_v3 = vpack.c.bf16 %v577_v1, %v576_v0  ;;  %v575_v4 = vld [vmem:[%s2478_s2 + $0x8] sm:$0xff]  ;;  %s2117_s1 = sshll.u32 %s2509_s25, 4  ;;  %v1888_v10 = vld [vmem:[%s2479_s3] ss:$0 sm:$0xff]  ;;  %vm639_vm3 = vcmask 97280   ;;  %vm643_vm5 = vcmask 93184  }
   0xf   : > { %v579_v5 = vpack.c.bf16 %v575_v4, %v574_v2  ;;  %s558_s23 = scalar_lea.vmem %s2501_s22, %s2117_s1  ;;  %v2158_v27 = vshrl.u32 %v603_v26, 7  ;;  %v2160_v28 = vand.u32 127, %v603_v26  ;;  %s2000_s22 = smov 40   ;;  %vm669_vm6 = vcmask 1045504  }
  0x10   : > { %595 = vmatpush.bf16.msra.mxu0 %v580_v3  ;;  %v2123_v6 = vld [vmem:[%s558_s23] sm:$0xff]  ;;  %v2125_v7 = vld [vmem:[%s558_s23 + $0x8] sm:$0xf]  ;;  %s2001_s23 = smov 48   ;;  %vm908_vm15 = vcmask 1043456   ;;  %s2495_s26 = smov 8  }
  0x11   : > { %v578_v8 = vpack.c.bf16 %v2125_v7, %v2123_v6  ;;  %vm608_vm2 = vcmp.le.s32.totalorder %v2160_v28, %v2158_v27  ;;  %v2169_v33 = vadd.s32 8, %v2158_v27  ;;  %s2004_s25 = smov 24  }
  0x13   : > { %vm609_vm4 = vcmp.le.s32.totalorder %v2160_v28, %v2169_v33 }
  0x14   : > { %596 = vmatpush.bf16.msra.mxu0 %v579_v5 }
  0x17   : > { %1802 = vmatmul.msk.bf16.vlgmr.msra.gmra.mxu0 %vm585_vm0, %v578_v8 }
  0x94   : > { %v598_v9 = vpop.f32.mrf.mxu0 }
  0x95   : > { %v599_v12 = vadd.f32 %v1888_v10, %v598_v9 }
  0x9c   : > { %v600_v11 = vpop.f32.mrf.mxu0 }
  0x9d   : > { %v601_v13 = vadd.f32 %v1888_v10, %v600_v11 }
  0x9f   : > { %v2133_v14 = vpack.c.bf16 %v601_v13, %v599_v12 }
  0xa1   : > { %833 = vrot.lane.b32.xlu2 %v2133_v14, %s1991_s27  ;;  %687 = vrot.lane.b32.xlu1 %v2133_v14, %s1992_s28 }
  0xa2   : > { %612 = vrot.lane.b32.xlu0 %v2133_v14, %s2497_s29 }
  0xa9   : > { %762 = vrot.lane.b32.xlu2 %v2133_v14, %s2494_s0  ;;  %835 = vrot.lane.b32.xlu1 %v2133_v14, %s2496_s30  ;;  %s568_s0 = scalar_lea.vmem %s2493_s17, %s2117_s1 }
  0xaa   : > { %689 = vrot.lane.b32.xlu0 %v2133_v14, %s2498_s18 }
  0xb2   : > { %760 = vrot.lane.b32.xlu0 %v2133_v14, %s1997_s19 }
  0xfb   : > { %v834_v15 = vpop.permute.xlu2 %833 }
 0x103   : > { %v763_v16 = vpop.permute.xlu2 %762 }
 0x104   : > { %v768_v17 = vsel %vm614_vm1, %v763_v16, 0 }
 0x105   : > { %777 = vmatpush.bf16.xpose.msrb.mxu0 %v768_v17 }
 0x113   : > { %v688_v18 = vpop.permute.xlu1 %687 }
 0x114   : > { %v613_v19 = vpop.permute.xlu0 %612 }
 0x115   : > { %v619_v20 = vsel %vm614_vm1, %v613_v19, 0 }
 0x116   : > { %628 = vmatpush.bf16.xpose.msra.mxu1 %v619_v20 }
 0x11b   : > { %v836_v21 = vpop.permute.xlu1 %835 }
 0x11c   : > { %v690_v22 = vpop.permute.xlu0 %689  ;;  %v841_v23 = vsel %vm614_vm1, %v836_v21, 0 }
 0x11d   : > { %1803 = vmatmul.msk.bf16.vlgmr.msra.gmra.mxu1 %vm614_vm1, %v2133_v14  ;;  %v695_v24 = vsel %vm614_vm1, %v690_v22, 0 }
 0x11e   : > { %704 = vmatpush.bf16.xpose.msra.mxu3 %v695_v24 }
 0x124   : > { %v761_v25 = vpop.permute.xlu0 %760 }
 0x125   : > { %1805 = vmatmul.msk.bf16.vlgmr.msra.gmra.mxu3 %vm614_vm1, %v688_v18  ;;  %1807 = vmatmul.msk.bf16.vlgmr.msrb.gmra.mxu0 %vm614_vm1, %v761_v25 }
 0x126   : > { %850 = vmatpush.bf16.xpose.msrb.mxu3 %v841_v23 }
 0x135   : > { %1809 = vmatmul.msk.bf16.vlgmr.msrb.gmra.mxu3 %vm614_vm1, %v834_v15 }
 0x19a   : > { %v630_v29 = vpop.f32.mrf.mxu1 }
 0x19b   : > { %v635_v30 = vmul.f32 0.35355338, %v630_v29 }
 0x19d   : > { %v637_v31 = vsel %vm608_vm2, %v635_v30, -1e+30 }
 0x19e   : > { %v640_v32 = vsel %vm639_vm3, %v637_v31, -inf }
 0x19f   : > { %641 = vmax.xlane.f32.xlu1 %v640_v32 }
 0x1a2   : > { %v632_v34 = vpop.f32.mrf.mxu1  ;;  %v779_v35 = vpop.f32.mrf.mxu0 }
 0x1a3   : > { %v636_v36 = vmul.f32 0.35355338, %v632_v34  ;;  %v784_v45 = vmul.f32 0.35355338, %v779_v35 }
 0x1a5   : > { %v638_v37 = vsel %vm609_vm4, %v636_v36, -1e+30  ;;  %v786_v50 = vsel %vm608_vm2, %v784_v45, -1e+30 }
 0x1a6   : > { %v644_v38 = vsel %vm643_vm5, %v638_v37, -inf  ;;  %v788_v53 = vsel %vm639_vm3, %v786_v50, -inf }
 0x1a7   : > { %645 = vmax.xlane.f32.xlu2 %v644_v38 }
 0x1a8   : > { %v706_v39 = vpop.f32.mrf.mxu3 }
 0x1a9   : > { %v711_v40 = vmul.f32 0.35355338, %v706_v39 }
 0x1aa   : > { %v781_v41 = vpop.f32.mrf.mxu0 }
 0x1ab   : > { %v785_v42 = vmul.f32 0.35355338, %v781_v41  ;;  %v713_v43 = vsel %vm608_vm2, %v711_v40, -1e+30 }
 0x1ac   : > { %v715_v44 = vsel %vm639_vm3, %v713_v43, -inf }
 0x1ad   : > { %716 = vmax.xlane.f32.xlu0 %v715_v44  ;;  %v787_v46 = vsel %vm609_vm4, %v785_v42, -1e+30 }
 0x1ae   : > { %v791_v47 = vsel %vm643_vm5, %v787_v46, -inf }
 0x1af   : > { %792 = vmax.xlane.f32.xlu1 %v791_v47 }
 0x1b0   : > { %v708_v48 = vpop.f32.mrf.mxu3 }
 0x1b1   : > { %v712_v49 = vmul.f32 0.35355338, %v708_v48 }
 0x1b3   : > { %v714_v51 = vsel %vm609_vm4, %v712_v49, -1e+30 }
 0x1b4   : > { %v718_v52 = vsel %vm643_vm5, %v714_v51, -inf }
 0x1b5   : > { %719 = vmax.xlane.f32.xlu2 %v718_v52  ;;  %789 = vmax.xlane.f32.xlu0 %v788_v53 }
 0x1b8   : > { %v852_v54 = vpop.f32.mrf.mxu3 }
 0x1b9   : > { %v857_v55 = vmul.f32 0.35355338, %v852_v54 }
 0x1bb   : > { %v859_v56 = vsel %vm608_vm2, %v857_v55, -1e+30  ;;  %vm933_vm2 = vcmask 392192  }
 0x1bc   : > { %v861_v57 = vsel %vm639_vm3, %v859_v56, -inf }
 0x1bd   : > { %862 = vmax.xlane.f32.xlu1 %v861_v57 }
 0x1c0   : > { %v854_v58 = vpop.f32.mrf.mxu3 }
 0x1c1   : > { %v858_v59 = vmul.f32 0.35355338, %v854_v58 }
 0x1c3   : > { %v860_v60 = vsel %vm609_vm4, %v858_v59, -1e+30  ;;  %vm1052_vm4 = vcmask 195584  }
 0x1c4   : > { %v864_v61 = vsel %vm643_vm5, %v860_v60, -inf }
 0x1c5   : > { %865 = vmax.xlane.f32.xlu2 %v864_v61 }
 0x1d6   : > { %664 = vrot.lane.b32.xlu1 %v2133_v14, %s1998_s20  ;;  %s2005_s20 = smov 16  }
 0x1dd   : > { %738 = vrot.lane.b32.xlu2 %v2133_v14, %s1999_s21 }
 0x212   : > { %v642_v62 = vpop.xlane.xlu1 %641 }
 0x213   : > { %v647_v63 = vsub.f32 %v637_v31, %v642_v62 }
 0x215   : > { %v649_v0 = vmul.f32 1.442695, %v647_v63 }
 0x217   : > { %1901 = vpow2.f32 %v649_v0 }
 0x21a   : > { %v646_v1 = vpop.xlane.xlu2 %645 }
 0x21b   : > { %v648_v2 = vsub.f32 %v638_v37, %v646_v1 }
 0x21d   : > { %v2203_v3 = vpop.eup %1901  ;;  %v651_v4 = vmul.f32 1.442695, %v648_v2 }
 0x21e   : > { %v653_v5 = vsel %vm639_vm3, %v2203_v3, 0.0 }
 0x21f   : > { %1903 = vpow2.f32 %v651_v4  ;;  %654 = vadd.xlane.f32.xlu2 %v653_v5 }
 0x220   : > { %v717_v8 = vpop.xlane.xlu0 %716 }
 0x221   : > { %v721_v9 = vsub.f32 %v713_v43, %v717_v8 }
 0x222   : > { %v793_v10 = vpop.xlane.xlu1 %792 }
 0x223   : > { %v723_v11 = vmul.f32 1.442695, %v721_v9  ;;  %v795_v12 = vsub.f32 %v787_v46, %v793_v10 }
 0x225   : > { %v1904_v13 = vpop.eup %1903  ;;  %1905 = vpow2.f32 %v723_v11  ;;  %v798_v15 = vmul.f32 1.442695, %v795_v12 }
 0x226   : > { %v656_v16 = vsel %vm643_vm5, %v1904_v13, 0.0 }
 0x227   : > { %1907 = vpow2.f32 %v798_v15  ;;  %657 = vadd.xlane.f32.xlu0 %v656_v16 }
 0x228   : > { %v720_v17 = vpop.xlane.xlu2 %719  ;;  %v790_v18 = vpop.xlane.xlu0 %789 }
 0x229   : > { %v722_v19 = vsub.f32 %v714_v51, %v720_v17  ;;  %v794_v20 = vsub.f32 %v786_v50, %v790_v18 }
 0x22b   : > { %v1906_v21 = vpop.eup %1905  ;;  %v725_v22 = vmul.f32 1.442695, %v722_v19  ;;  %v796_v23 = vmul.f32 1.442695, %v794_v20 }
 0x22c   : > { %v727_v24 = vsel %vm639_vm3, %v1906_v21, 0.0 }
 0x22d   : > { %v2209_v25 = vpop.eup %1907  ;;  %1909 = vpow2.f32 %v725_v22  ;;  %728 = vadd.xlane.f32.xlu2 %v727_v24  ;;  %v924_v22 = vmul.u32 4, %v2169_v33 }
 0x22e   : > { %1911 = vpow2.f32 %v796_v23  ;;  %v803_v26 = vsel %vm643_vm5, %v2209_v25, 0.0 }
 0x22f   : > { %804 = vadd.xlane.f32.xlu0 %v803_v26  ;;  %v1000_v26 = vadd.s32 3, %v924_v22  ;;  %vm926_vm10 = vcmp.eq.s32.totalorder %v2160_v28, %v924_v22 }
 0x230   : > { %v863_v29 = vpop.xlane.xlu1 %862 }
 0x231   : > { %v867_v30 = vsub.f32 %v859_v56, %v863_v29  ;;  %vm1002_vm8 = vcmp.eq.s32.totalorder %v2160_v28, %v1000_v26 }
 0x233   : > { %v1910_v31 = vpop.eup %1909  ;;  %v869_v32 = vmul.f32 1.442695, %v867_v30 }
 0x234   : > { %v2213_v34 = vpop.eup %1911  ;;  %v730_v36 = vsel %vm643_vm5, %v1910_v31, 0.0 }
 0x235   : > { %1913 = vpow2.f32 %v869_v32  ;;  %v800_v35 = vsel %vm639_vm3, %v2213_v34, 0.0 }
 0x236   : > { %801 = vadd.xlane.f32.xlu1 %v800_v35 }
 0x237   : > { %731 = vadd.xlane.f32.xlu0 %v730_v36  ;;  %v976_v36 = vadd.s32 2, %v924_v22 }
 0x238   : > { %v866_v37 = vpop.xlane.xlu2 %865 }
 0x239   : > { %v868_v38 = vsub.f32 %v860_v60, %v866_v37  ;;  %vm978_vm14 = vcmp.eq.s32.totalorder %v2160_v28, %v976_v36 }
 0x23b   : > { %v1914_v39 = vpop.eup %1913  ;;  %v871_v40 = vmul.f32 1.442695, %v868_v38 }
 0x23c   : > { %v873_v41 = vsel %vm639_vm3, %v1914_v39, 0.0 }
 0x23d   : > { %1915 = vpow2.f32 %v871_v40 }
 0x23f   : > { %874 = vadd.xlane.f32.xlu0 %v873_v41 }
 0x240   : > { %v739_v44 = vpop.permute.xlu2 %738 }
 0x241   : > { %v744_v47 = vsel %vm669_vm6, %v739_v44, 0 }
 0x243   : > { %v1916_v42 = vpop.eup %1915 }
 0x244   : > { %v876_v43 = vsel %vm643_vm5, %v1916_v42, 0.0  ;;  %vm1092_vm5 = vcmask 257024  }
 0x245   : > { %884 = vrot.lane.b32.xlu2 %v2133_v14, %s2000_s22  ;;  %s2506_s22 = smov 80  }
 0x247   : > { %877 = vadd.xlane.f32.xlu0 %v876_v43 }
 0x248   : > { %v665_v45 = vpop.permute.xlu1 %664 }
 0x249   : > { %v671_v46 = vsel %vm669_vm6, %v665_v45, 0 }
 0x24a   : > { %680 = vmatpush.bf16.msra.mxu2 %v671_v46 }
 0x24e   : > { %753 = vmatpush.bf16.msrb.mxu2 %v744_v47 }
 0x25b   : > { %811 = vrot.lane.b32.xlu0 %v2133_v14, %s2001_s23  ;;  %s2507_s23 = smov 8  }
 0x292   : > { %v655_v48 = vpop.xlane.xlu2 %654 }
 0x293   : > { %1917 = vrcp.f32 %v655_v48 }
 0x299   : > { %v1918_v50 = vpop.eup %1917 }
 0x29a   : > { %v658_v49 = vpop.xlane.xlu0 %657  ;;  %v661_v54 = vmul.f32 %v1918_v50, %v2203_v3 }
 0x29b   : > { %1919 = vrcp.f32 %v658_v49 }
 0x2a0   : > { %v729_v51 = vpop.xlane.xlu2 %728 }
 0x2a1   : > { %v1920_v52 = vpop.eup %1919  ;;  %1921 = vrcp.f32 %v729_v51 }
 0x2a2   : > { %v805_v53 = vpop.xlane.xlu0 %804  ;;  %v662_v55 = vmul.f32 %v1920_v52, %v1904_v13 }
 0x2a4   : > { %v663_v56 = vpack.c.bf16 %v662_v55, %v661_v54 }
 0x2a6   : > { %1804 = vmatmul.msk.bf16.vlgmr.msra.gmra.mxu2 %vm639_vm3, %v663_v56 }
 0x2a7   : > { %v1922_v59 = vpop.eup %1921 }
 0x2a8   : > { %v885_v57 = vpop.permute.xlu2 %884  ;;  %v735_v61 = vmul.f32 %v1922_v59, %v1906_v21  ;;  %v923_v21 = vmul.u32 4, %v2158_v27 }
 0x2a9   : > { %v890_v58 = vsel %vm669_vm6, %v885_v57, 0  ;;  %v802_v3 = vpop.xlane.xlu1 %801 }
 0x2aa   : > { %899 = vmatpush.bf16.msra.mxu2 %v890_v58  ;;  %v732_v14 = vpop.xlane.xlu0 %731  ;;  %v999_v24 = vadd.s32 3, %v923_v21  ;;  %v951_v32 = vadd.s32 1, %v923_v21  ;;  %v975_v35 = vadd.s32 2, %v923_v21  ;;  %vm925_vm9 = vcmp.eq.s32.totalorder %v2160_v28, %v923_v21 }
 0x2ab   : > { %1923 = vrcp.f32 %v732_v14 }
 0x2ac   : > { %vm1001_vm7 = vcmp.eq.s32.totalorder %v2160_v28, %v999_v24  ;;  %vm953_vm11 = vcmp.eq.s32.totalorder %v2160_v28, %v951_v32  ;;  %vm977_vm13 = vcmp.eq.s32.totalorder %v2160_v28, %v975_v35 }
 0x2b1   : > { %v1924_v60 = vpop.eup %1923 }
 0x2b2   : > { %v736_v62 = vmul.f32 %v1924_v60, %v1910_v31  ;;  %v875_v63 = vpop.xlane.xlu0 %874 }
 0x2b3   : > { %1925 = vrcp.f32 %v875_v63 }
 0x2b4   : > { %v737_v0 = vpack.c.bf16 %v736_v62, %v735_v61 }
 0x2b6   : > { %1806 = vmatmul.msk.bf16.vlgmr.msrb.gmra.mxu2 %vm639_vm3, %v737_v0 }
 0x2b9   : > { %v1926_v2 = vpop.eup %1925 }
 0x2ba   : > { %v878_v1 = vpop.xlane.xlu0 %877  ;;  %v881_v5 = vmul.f32 %v1926_v2, %v1914_v39  ;;  %v1057_v2 = vld [vmem:[%s2480_s4 + $0x10] sm:$0xff] }
 0x2bb   : > { %1927 = vrcp.f32 %v878_v1 }
 0x2bc   : > { %1929 = vrcp.f32 %v802_v3  ;;  %v1058_v3 = vld [vmem:[%s2480_s4 + $0x18] sm:$0xff] }
 0x2bd   : > { %1931 = vrcp.f32 %v805_v53 }
 0x2c1   : > { %v1928_v4 = vpop.eup %1927 }
 0x2c2   : > { %v882_v8 = vmul.f32 %v1928_v4, %v1916_v42  ;;  %v1930_v10 = vpop.eup %1929  ;;  %v1061_v4 = vpack.c.bf16 %v1058_v3, %v1057_v2  ;;  %v1147_v2 = vld [vmem:[%s2482_s6] sm:$0xff]  ;;  %v1148_v3 = vld [vmem:[%s2482_s6 + $0x8] sm:$0xff] }
 0x2c3   : > { %v1932_v11 = vpop.eup %1931  ;;  %v808_v12 = vmul.f32 %v1930_v10, %v2213_v34  ;;  %v952_v34 = vadd.s32 1, %v924_v22 }
 0x2c4   : > { %v883_v9 = vpack.c.bf16 %v882_v8, %v881_v5  ;;  %v809_v15 = vmul.f32 %v1932_v11, %v2209_v25  ;;  %v2002_v25 = vmov 0.0   ;;  %v1055_v5 = vld [vmem:[%s2480_s4] sm:$0xff]  ;;  %v1056_v8 = vld [vmem:[%s2480_s4 + $0x8] sm:$0xff] }
 0x2c5   : > { %v1003_v29 = vsel %vm1001_vm7, 1.0, %v2002_v25  ;;  %v1004_v30 = vsel %vm1002_vm8, 1.0, %v2002_v25  ;;  %vm954_vm12 = vcmp.eq.s32.totalorder %v2160_v28, %v952_v34  ;;  %v955_v33 = vsel %vm953_vm11, 1.0, %v2002_v25 }
 0x2c6   : > { %1810 = vmatmul.msk.bf16.vlgmr.msra.gmra.mxu2 %vm639_vm3, %v883_v9  ;;  %v810_v17 = vpack.c.bf16 %v809_v15, %v808_v12  ;;  %v1005_v31 = vpack.c.bf16 %v1004_v30, %v1003_v29  ;;  %v956_v37 = vsel %vm954_vm12, 1.0, %v2002_v25  ;;  %v979_v38 = vsel %vm977_vm13, 1.0, %v2002_v25 }
 0x2c7   : > { %v957_v39 = vpack.c.bf16 %v956_v37, %v955_v33  ;;  %v980_v40 = vsel %vm978_vm14, 1.0, %v2002_v25  ;;  %v927_v41 = vsel %vm925_vm9, 1.0, %v2002_v25  ;;  %v928_v42 = vsel %vm926_vm10, 1.0, %v2002_v25 }
 0x2c8   : > { %v981_v43 = vpack.c.bf16 %v980_v40, %v979_v38  ;;  %v929_v44 = vpack.c.bf16 %v928_v42, %v927_v41  ;;  %v1060_v9 = vpack.c.bf16 %v1056_v8, %v1055_v5  ;;  %v1178_v42 = vld [vmem:[%s2484_s8 + $0x18] sm:$0xff]  ;;  %vm1230_vm13 = vcmask 125952  }
 0x2cd   : > { %v812_v13 = vpop.permute.xlu0 %811 }
 0x2ce   : > { %v817_v16 = vsel %vm669_vm6, %v812_v13, 0 }
 0x2cf   : > { %826 = vmatpush.bf16.msrb.mxu1 %v817_v16 }
 0x2d2   : > { %1808 = vmatmul.msk.bf16.vlgmr.msrb.gmra.mxu1 %vm639_vm3, %v810_v17  ;;  %vm1049_vm3 = vcmask 130048  }
 0x329   : > { %v682_v18 = vpop.f32.mrf.mxu2 }
 0x331   : > { %v684_v19 = vpop.f32.mrf.mxu2 }
 0x339   : > { %v755_v20 = vpop.f32.mrf.mxu2 }
 0x33a   : > { %v909_v28 = vrot.slane %v755_v20, 4 }
 0x33c   : > { %v921_v56 = vsel %vm908_vm15, %v684_v19, %v909_v28 }
 0x33d   : > { %v930_v57 = vpack.c.bf16 %v921_v56, %v682_v18 }
 0x341   : > { %v757_v23 = vpop.f32.mrf.mxu2 }
 0x342   : > { %v910_v50 = vrot.slane %v757_v23, 4 }
 0x344   : > { %v911_v54 = vsel %vm908_vm15, %v909_v28, %v910_v50 }
 0x349   : > { %v901_v27 = vpop.f32.mrf.mxu2 }
 0x34a   : > { %v916_v48 = vrot.slane %v901_v27, 4 }
 0x34f   : > { %v828_v45 = vpop.f32.mrf.mxu1 }
 0x350   : > { %v931_v55 = vpack.c.bf16 %v828_v45, %v911_v54 }
 0x351   : > { %v903_v46 = vpop.f32.mrf.mxu2 }
 0x352   : > { %v917_v47 = vrot.slane %v903_v46, 4 }
 0x354   : > { %v918_v51 = vsel %vm908_vm15, %v916_v48, %v917_v47 }
 0x357   : > { %v830_v49 = vpop.f32.mrf.mxu1 }
 0x358   : > { %v922_v52 = vsel %vm908_vm15, %v830_v49, %v916_v48 }
 0x359   : > { %v932_v53 = vpack.c.bf16 %v918_v51, %v922_v52 }
 0x35b   : > { %942 = vmatpush.bf16.msra.mxu0 %v932_v53  ;;  %966 = vmatpush.bf16.msra.mxu1 %v932_v53 }
 0x35c   : > { %990 = vmatpush.bf16.msra.mxu3 %v932_v53  ;;  %1014 = vmatpush.bf16.msrb.mxu2 %v932_v53 }
 0x35f   : > { %943 = vmatpush.bf16.msra.mxu0 %v931_v55  ;;  %967 = vmatpush.bf16.msra.mxu1 %v931_v55 }
 0x360   : > { %991 = vmatpush.bf16.msra.mxu3 %v931_v55  ;;  %1015 = vmatpush.bf16.msrb.mxu2 %v931_v55 }
 0x363   : > { %944 = vmatpush.bf16.msra.mxu0 %v930_v57  ;;  %968 = vmatpush.bf16.msra.mxu1 %v930_v57 }
 0x364   : > { %992 = vmatpush.bf16.msra.mxu3 %v930_v57  ;;  %1016 = vmatpush.bf16.msrb.mxu2 %v930_v57 }
 0x366   : > { %1812 = vmatmul.msk.bf16.vlgmr.msra.gmra.mxu1 %vm933_vm2, %v957_v39  ;;  %1811 = vmatmul.msk.bf16.vlgmr.msra.gmra.mxu0 %vm933_vm2, %v929_v44  ;;  %v2006_v39 = vmov 32.0   ;;  %v1176_v44 = vld [vmem:[%s2484_s8 + $0x8] sm:$0xff] }
 0x367   : > { %1814 = vmatmul.msk.bf16.vlgmr.msrb.gmra.mxu2 %vm933_vm2, %v1005_v31  ;;  %1813 = vmatmul.msk.bf16.vlgmr.msra.gmra.mxu3 %vm933_vm2, %v981_v43  ;;  %v1889_v31 = vld [vmem:[%s2481_s5] ss:$0 sm:$0xff]  ;;  %1933 = vrcp.f32 %v2006_v39 }
 0x368   : > { %1071 = vmatpush.bf16.msrb.mxu0 %v1061_v4  ;;  %v1152_v4 = vpack.c.bf16 %v1148_v3, %v1147_v2 }
 0x36c   : > { %1072 = vmatpush.bf16.msrb.mxu0 %v1060_v9 }
 0x36d   : > { %v1934_v40 = vpop.eup %1933 }
 0x36e   : > { %v1097_v41 = vmul.f32 32.0, %v1934_v40  ;;  %vm1101_vm6 = vweird.f32 %v1934_v40 }
 0x370   : > { %v1098_v45 = vsub.f32 1.0, %v1097_v41 }
 0x372   : > { %v1099_v47 = vmul.f32 %v1934_v40, %v1098_v45 }
 0x374   : > { %v1100_v48 = vadd.f32 %v1934_v40, %v1099_v47 }
 0x376   : > { %v2284_v49 = vsel %vm1101_vm6, %v1934_v40, %v1100_v48 }
 0x3e3   : > { %v970_v58 = vpop.f32.mrf.mxu1  ;;  %v946_v11 = vpop.f32.mrf.mxu0 }
 0x3ea   : > { %v1018_v14 = vpop.f32.mrf.mxu2  ;;  %v994_v59 = vpop.f32.mrf.mxu3 }
 0x3eb   : > { %v972_v60 = vpop.f32.mrf.mxu1  ;;  %v948_v16 = vpop.f32.mrf.mxu0 }
 0x3ec   : > { %v1858_v61 = vpack.i.bf16 %v972_v60, %v970_v58 }
 0x3ee   : > { %1859 = vrot.lane.b32.xlu2 %v1858_v61, %s2495_s26  ;;  %s2502_s26 = sld [smem:[#allocation3_spill]]  ;;  %v1149_v61 = vld [vmem:[%s2482_s6 + $0x10] sm:$0xff] }
 0x3f2   : > { %v1020_v62 = vpop.f32.mrf.mxu2  ;;  %v996_v63 = vpop.f32.mrf.mxu3 }
 0x3f3   : > { %v1868_v0 = vpack.i.bf16 %v1020_v62, %v1018_v14  ;;  %v1863_v1 = vpack.i.bf16 %v996_v63, %v994_v59  ;;  %v1150_v62 = vld [vmem:[%s2482_s6 + $0x18] sm:$0xff] }
 0x3f4   : > { %s563_s21 = scalar_lea.vmem %s2502_s26, %s2117_s1  ;;  %v1153_v63 = vpack.c.bf16 %v1150_v62, %v1149_v61 }
 0x3f5   : > { %1869 = vrot.lane.b32.xlu0 %v1868_v0, %s2004_s25  ;;  %v572_v14 = vld [vmem:[%s563_s21] sm:$0xff]  ;;  %v573_v59 = vld [vmem:[%s563_s21 + $0x8] sm:$0xff] }
 0x3f6   : > { %1864 = vrot.lane.b32.xlu2 %v1863_v1, %s2005_s20  ;;  %v1179_v60 = vpack.c.bf16 %v573_v59, %v572_v14  ;;  %1167 = vmatpush.bf16.msrb.mxu1 %v1153_v63 }
 0x3fa   : > { %1168 = vmatpush.bf16.msrb.mxu1 %v1152_v4 }
 0x448   : > { %v1860_v10 = vpop.permute.xlu2 %1859 }
 0x449   : > { %v1862_v12 = vunpack.i.h.bf16 %v1860_v10  ;;  %v1861_v13 = vunpack.i.l.bf16 %v1860_v10 }
 0x44b   : > { %v1047_v19 = vsel %vm614_vm1, %v946_v11, %v1861_v13  ;;  %v1048_v20 = vsel %vm614_vm1, %v948_v16, %v1862_v12 }
 0x450   : > { %v1865_v15 = vpop.permute.xlu2 %1864 }
 0x451   : > { %v1867_v17 = vunpack.i.h.bf16 %v1865_v15  ;;  %v1866_v18 = vunpack.i.l.bf16 %v1865_v15 }
 0x453   : > { %v1050_v24 = vsel %vm1049_vm3, %v1047_v19, %v1866_v18  ;;  %v1051_v26 = vsel %vm1049_vm3, %v1048_v20, %v1867_v17 }
 0x467   : > { %v1870_v21 = vpop.permute.xlu0 %1869 }
 0x468   : > { %v1872_v22 = vunpack.i.h.bf16 %v1870_v21  ;;  %v1871_v23 = vunpack.i.l.bf16 %v1870_v21 }
 0x46a   : > { %v1053_v25 = vsel %vm1052_vm4, %v1050_v24, %v1871_v23  ;;  %v1054_v29 = vsel %vm1052_vm4, %v1051_v26, %v1872_v22  ;;  %v1890_v24 = vld [vmem:[%s2492_s16] ss:$0 sm:$0xff] }
 0x46b   : > { %v1059_v30 = vpack.c.bf16 %v1054_v29, %v1053_v25 }
 0x46d   : > { %1815 = vmatmul.msk.bf16.vlgmr.msrb.gmra.mxu0 %vm585_vm0, %v1059_v30  ;;  %v1891_v30 = vld [vmem:[%s2492_s16 + $0x1] ss:$0 sm:$0xff] }
 0x4ea   : > { %v1074_v32 = vpop.f32.mrf.mxu0 }
 0x4eb   : > { %v1079_v34 = vadd.f32 %v1074_v32, %v2123_v6  ;;  %v1177_v6 = vld [vmem:[%s2484_s8 + $0x10] sm:$0xff] }
 0x4ec   : > { %v1181_v43 = vpack.c.bf16 %v1178_v42, %v1177_v6 }
 0x4ed   : > { %v1085_v35 = vadd.f32 %v1889_v31, %v1079_v34 }
 0x4ee   : > { %1195 = vmatpush.bf16.msrb.mxu3 %v1181_v43 }
 0x4ef   : > { %v1089_v36 = vsel %vm585_vm0, %v1085_v35, 0.0 }
 0x4f0   : > { %1090 = vadd.xlane.f32.xlu2 %v1089_v36 }
 0x4f2   : > { %v1076_v27 = vpop.f32.mrf.mxu0 }
 0x4f3   : > { %v1080_v33 = vadd.f32 %v1076_v27, %v2125_v7  ;;  %v1175_v7 = vld [vmem:[%s2484_s8] sm:$0xff] }
 0x4f4   : > { %v1180_v46 = vpack.c.bf16 %v1176_v44, %v1175_v7  ;;  %v1893_v7 = vld [vmem:[%s2483_s7] ss:$0 sm:$0xff] }
 0x4f5   : > { %v1086_v37 = vadd.f32 %v1889_v31, %v1080_v33 }
 0x4f6   : > { %1196 = vmatpush.bf16.msrb.mxu3 %v1180_v46 }
 0x4f7   : > { %v1093_v38 = vsel %vm1092_vm5, %v1086_v37, 0.0 }
 0x4f8   : > { %1094 = vadd.xlane.f32.xlu1 %v1093_v38 }
 0x4f9   : > { %1817 = vmatmul.msk.bf16.vlgmr.msrb.gmra.mxu3 %vm585_vm0, %v1179_v60 }
 0x563   : > { %v1091_v50 = vpop.xlane.xlu2 %1090 }
 0x564   : > { %v1103_v51 = vmul.f32 %v2284_v49, %v1091_v50 }
 0x566   : > { %v1105_v52 = vsub.f32 %v1085_v35, %v1103_v51 }
 0x568   : > { %v1107_v53 = vmul.f32 %v1105_v52, %v1105_v52 }
 0x56a   : > { %v1109_v28 = vsel %vm585_vm0, %v1107_v53, 0.0 }
 0x56b   : > { %1110 = vadd.xlane.f32.xlu0 %v1109_v28  ;;  %v1095_v54 = vpop.xlane.xlu1 %1094 }
 0x56c   : > { %v1104_v55 = vmul.f32 %v2284_v49, %v1095_v54 }
 0x56e   : > { %v1106_v56 = vsub.f32 %v1086_v37, %v1104_v55  ;;  %v1892_v37 = vld [vmem:[%s2485_s9] ss:$0 sm:$0xff] }
 0x570   : > { %v1108_v57 = vmul.f32 %v1106_v56, %v1106_v56 }
 0x572   : > { %v1112_v58 = vsel %vm1092_vm5, %v1108_v57, 0.0 }
 0x573   : > { %1113 = vadd.xlane.f32.xlu1 %v1112_v58 }
 0x57c   : > { %v1198_v33 = vpop.f32.mrf.mxu3 }
 0x57d   : > { %v1199_v38 = vadd.f32 %v1892_v37, %v1198_v33 }
 0x584   : > { %v1200_v39 = vpop.f32.mrf.mxu3 }
 0x585   : > { %v1201_v40 = vadd.f32 %v1892_v37, %v1200_v39 }
 0x587   : > { %v2325_v41 = vpack.c.bf16 %v1201_v40, %v1199_v38 }
 0x589   : > { %1413 = vrot.lane.b32.xlu0 %v2325_v41, %s1991_s27  ;;  %v1209_v6 = vsel %vm614_vm1, %v2325_v41, 0 }
 0x58a   : > { %1218 = vmatpush.bf16.xpose.msra.mxu2 %v1209_v6 }
 0x58c   : > { %1275 = vrot.lane.b32.xlu1 %v2325_v41, %s1992_s28 }
 0x594   : > { %1344 = vrot.lane.b32.xlu1 %v2325_v41, %s1997_s19 }
 0x5de   : > { %v1111_v0 = vpop.xlane.xlu0 %1110 }
 0x5df   : > { %v1115_v1 = vmul.f32 %v1111_v0, %v2284_v49 }
 0x5e1   : > { %v1117_v5 = vadd.f32 1e-05, %v1115_v1 }
 0x5e3   : > { %1935 = vrsqrt.f32 %v1117_v5  ;;  %vm1125_vm8 = vweird.f32 %v1117_v5 }
 0x5e6   : > { %v1114_v8 = vpop.xlane.xlu1 %1113 }
 0x5e7   : > { %v1116_v9 = vmul.f32 %v1114_v8, %v2284_v49 }
 0x5e9   : > { %v1936_v10 = vpop.eup %1935  ;;  %v1118_v11 = vadd.f32 1e-05, %v1116_v9 }
 0x5ea   : > { %v1120_v12 = vmul.f32 %v1936_v10, %v1117_v5  ;;  %vm1126_vm7 = vweird.f32 %v1936_v10 }
 0x5eb   : > { %1937 = vrsqrt.f32 %v1118_v11  ;;  %vm1127_vm9 = vmor %vm1125_vm8, %vm1126_vm7  ;;  %vm1135_vm11 = vweird.f32 %v1118_v11 }
 0x5ec   : > { %v1121_v13 = vmul.f32 %v1936_v10, %v1120_v12 }
 0x5ee   : > { %v1122_v15 = vmul.f32 0.5, %v1121_v13 }
 0x5f0   : > { %v1123_v16 = vsub.f32 1.5, %v1122_v15 }
 0x5f1   : > { %v1938_v17 = vpop.eup %1937 }
 0x5f2   : > { %v1124_v18 = vmul.f32 %v1936_v10, %v1123_v16  ;;  %v1130_v19 = vmul.f32 %v1938_v17, %v1118_v11  ;;  %vm1136_vm10 = vweird.f32 %v1938_v17 }
 0x5f3   : > { %vm1137_vm12 = vmor %vm1135_vm11, %vm1136_vm10 }
 0x5f4   : > { %v1131_v20 = vmul.f32 %v1938_v17, %v1130_v19  ;;  %v1128_v21 = vsel %vm1127_vm9, %v1936_v10, %v1124_v18 }
 0x5f5   : > { %v1139_v26 = vmul.f32 %v1128_v21, %v1105_v52 }
 0x5f6   : > { %v1132_v22 = vmul.f32 0.5, %v1131_v20 }
 0x5f7   : > { %v1142_v31 = vmul.f32 %v1890_v24, %v1139_v26 }
 0x5f8   : > { %v1133_v23 = vsub.f32 1.5, %v1132_v22 }
 0x5f9   : > { %v2315_v35 = vadd.f32 %v1891_v30, %v1142_v31 }
 0x5fa   : > { %v1134_v25 = vmul.f32 %v1938_v17, %v1133_v23 }
 0x5fb   : > { %v1414_v48 = vpop.permute.xlu0 %1413 }
 0x5fc   : > { %v1138_v29 = vsel %vm1137_vm12, %v1938_v17, %v1134_v25  ;;  %v1419_v51 = vsel %vm614_vm1, %v1414_v48, 0 }
 0x5fd   : > { %v1140_v32 = vmul.f32 %v1138_v29, %v1106_v56 }
 0x5fe   : > { %v1276_v47 = vpop.permute.xlu1 %1275 }
 0x5ff   : > { %v1143_v34 = vmul.f32 %v1890_v24, %v1140_v32  ;;  %v1281_v50 = vsel %vm614_vm1, %v1276_v47, 0 }
 0x600   : > { %1290 = vmatpush.bf16.xpose.msra.mxu1 %v1281_v50 }
 0x601   : > { %v2317_v36 = vadd.f32 %v1891_v30, %v1143_v34 }
 0x603   : > { %v1151_v27 = vpack.c.bf16 %v2317_v36, %v2315_v35 }
 0x605   : > { %1816 = vmatmul.msk.bf16.vlgmr.msrb.gmra.mxu1 %vm585_vm0, %v1151_v27 }
 0x606   : > { %v1345_v52 = vpop.permute.xlu1 %1344 }
 0x607   : > { %v1350_v53 = vsel %vm614_vm1, %v1345_v52, 0 }
 0x608   : > { %1428 = vmatpush.bf16.xpose.msrb.mxu1 %v1419_v51  ;;  %1359 = vmatpush.bf16.xpose.msrb.mxu2 %v1350_v53 }
 0x682   : > { %v1170_v42 = vpop.f32.mrf.mxu1 }
 0x683   : > { %v1171_v44 = vadd.f32 %v1893_v7, %v1170_v42 }
 0x68a   : > { %v1172_v43 = vpop.f32.mrf.mxu1 }
 0x68b   : > { %v1173_v45 = vadd.f32 %v1893_v7, %v1172_v43 }
 0x68d   : > { %v1203_v46 = vpack.c.bf16 %v1173_v45, %v1171_v44 }
 0x68f   : > { %1342 = vrot.lane.b32.xlu1 %v1203_v46, %s1997_s19  ;;  %1273 = vrot.lane.b32.xlu2 %v1203_v46, %s1992_s28  ;;  %s2504_s28 = smov 96   ;;  %s2505_s19 = smov 72  }
 0x690   : > { %1818 = vmatmul.msk.bf16.vlgmr.msra.gmra.mxu2 %vm614_vm1, %v1203_v46 }
 0x697   : > { %1411 = vrot.lane.b32.xlu1 %v1203_v46, %s1991_s27  ;;  %s2503_s27 = smov 88  }
 0x6e9   : > { %v1274_v28 = vpop.permute.xlu2 %1273 }
 0x6ea   : > { %1820 = vmatmul.msk.bf16.vlgmr.msra.gmra.mxu1 %vm614_vm1, %v1274_v28 }
 0x701   : > { %v1343_v54 = vpop.permute.xlu1 %1342 }
 0x702   : > { %1822 = vmatmul.msk.bf16.vlgmr.msrb.gmra.mxu2 %vm614_vm1, %v1343_v54 }
 0x709   : > { %v1412_v55 = vpop.permute.xlu1 %1411 }
 0x70a   : > { %1824 = vmatmul.msk.bf16.vlgmr.msrb.gmra.mxu1 %vm614_vm1, %v1412_v55 }
 0x713   : > { %v1220_v56 = vpop.f32.mrf.mxu2 }
 0x714   : > { %v1225_v57 = vmul.f32 0.35355338, %v1220_v56 }
 0x716   : > { %v1227_v58 = vsel %vm1049_vm3, %v1225_v57, -inf }
 0x717   : > { %1228 = vmax.xlane.f32.xlu1 %v1227_v58 }
 0x71b   : > { %v1222_v14 = vpop.f32.mrf.mxu2 }
 0x71c   : > { %v1226_v59 = vmul.f32 0.35355338, %v1222_v14 }
 0x71e   : > { %v1231_v60 = vsel %vm1230_vm13, %v1226_v59, -inf }
 0x71f   : > { %1232 = vmax.xlane.f32.xlu2 %v1231_v60 }
 0x767   : > { %v1292_v61 = vpop.f32.mrf.mxu1 }
 0x768   : > { %v1297_v62 = vmul.f32 0.35355338, %v1292_v61 }
 0x76a   : > { %v1299_v63 = vsel %vm1049_vm3, %v1297_v62, -inf }
 0x76b   : > { %1300 = vmax.xlane.f32.xlu2 %v1299_v63 }
 0x76f   : > { %v1294_v0 = vpop.f32.mrf.mxu1 }
 0x770   : > { %v1298_v1 = vmul.f32 0.35355338, %v1294_v0 }
 0x772   : > { %v1302_v2 = vsel %vm1230_vm13, %v1298_v1, -inf }
 0x773   : > { %1303 = vmax.xlane.f32.xlu0 %v1302_v2 }
 0x785   : > { %v1361_v3 = vpop.f32.mrf.mxu2 }
 0x786   : > { %v1366_v4 = vmul.f32 0.35355338, %v1361_v3 }
 0x787   : > { %v1430_v5 = vpop.f32.mrf.mxu1 }
 0x788   : > { %v1368_v8 = vsel %vm1049_vm3, %v1366_v4, -inf  ;;  %v1435_v21 = vmul.f32 0.35355338, %v1430_v5 }
 0x789   : > { %1369 = vmax.xlane.f32.xlu2 %v1368_v8 }
 0x78a   : > { %v1229_v9 = vpop.xlane.xlu1 %1228  ;;  %v1437_v23 = vsel %vm1049_vm3, %v1435_v21, -inf }
 0x78b   : > { %v1234_v11 = vsub.f32 %v1225_v57, %v1229_v9 }
 0x78d   : > { %v1363_v10 = vpop.f32.mrf.mxu2  ;;  %v1236_v17 = vmul.f32 1.442695, %v1234_v11 }
 0x78e   : > { %v1367_v12 = vmul.f32 0.35355338, %v1363_v10 }
 0x78f   : > { %v1432_v13 = vpop.f32.mrf.mxu1  ;;  %1939 = vpow2.f32 %v1236_v17 }
 0x790   : > { %v1436_v15 = vmul.f32 0.35355338, %v1432_v13  ;;  %v1371_v16 = vsel %vm1230_vm13, %v1367_v12, -inf }
 0x791   : > { %1372 = vmax.xlane.f32.xlu0 %v1371_v16 }
 0x792   : > { %v1233_v18 = vpop.xlane.xlu2 %1232  ;;  %v1440_v19 = vsel %vm1230_vm13, %v1436_v15, -inf }
 0x793   : > { %v1235_v20 = vsub.f32 %v1226_v59, %v1233_v18  ;;  %1441 = vmax.xlane.f32.xlu1 %v1440_v19 }
 0x795   : > { %v1238_v22 = vmul.f32 1.442695, %v1235_v20  ;;  %v1940_v24 = vpop.eup %1939 }
 0x796   : > { %v1240_v29 = vsel %vm1049_vm3, %v1940_v24, 0.0 }
 0x797   : > { %1941 = vpow2.f32 %v1238_v22 }
 0x799   : > { %1438 = vmax.xlane.f32.xlu0 %v1437_v23 }
 0x79d   : > { %v1942_v26 = vpop.eup %1941 }
 0x79e   : > { %v1243_v25 = vsel %vm1230_vm13, %v1942_v26, 0.0 }
 0x79f   : > { %1244 = vadd.xlane.f32.xlu1 %v1243_v25 }
 0x7a1   : > { %1322 = vrot.lane.b32.xlu2 %v2325_v41, %s2503_s27  ;;  %1241 = vadd.xlane.f32.xlu0 %v1240_v29 }
 0x7b5   : > { %1252 = vrot.lane.b32.xlu0 %v2325_v41, %s2504_s28 }
 0x7de   : > { %v1301_v30 = vpop.xlane.xlu2 %1300 }
 0x7df   : > { %v1305_v31 = vsub.f32 %v1297_v62, %v1301_v30 }
 0x7e1   : > { %v1307_v32 = vmul.f32 1.442695, %v1305_v31 }
 0x7e3   : > { %1943 = vpow2.f32 %v1307_v32 }
 0x7e6   : > { %v1304_v34 = vpop.xlane.xlu0 %1303 }
 0x7e7   : > { %v1306_v27 = vsub.f32 %v1298_v1, %v1304_v34 }
 0x7e9   : > { %v1944_v33 = vpop.eup %1943  ;;  %v1309_v37 = vmul.f32 1.442695, %v1306_v27 }
 0x7ea   : > { %v1311_v38 = vsel %vm1049_vm3, %v1944_v33, 0.0 }
 0x7eb   : > { %1945 = vpow2.f32 %v1309_v37  ;;  %1312 = vadd.xlane.f32.xlu1 %v1311_v38 }
 0x7f1   : > { %v1946_v39 = vpop.eup %1945 }
 0x7f2   : > { %v1314_v40 = vsel %vm1230_vm13, %v1946_v39, 0.0 }
 0x7f3   : > { %1315 = vadd.xlane.f32.xlu2 %v1314_v40 }
 0x7fc   : > { %v1370_v6 = vpop.xlane.xlu2 %1369 }
 0x7fd   : > { %v1374_v42 = vsub.f32 %v1366_v4, %v1370_v6 }
 0x7ff   : > { %v1376_v7 = vmul.f32 1.442695, %v1374_v42 }
 0x801   : > { %1947 = vpow2.f32 %v1376_v7  ;;  %v1512_v7 = vld [vmem:[%s2486_s10 + $0x10] sm:$0xff] }
 0x804   : > { %v1323_v43 = vpop.permute.xlu2 %1322  ;;  %v1373_v44 = vpop.xlane.xlu0 %1372 }
 0x805   : > { %v1375_v45 = vsub.f32 %v1367_v12, %v1373_v44  ;;  %1335 = vmatpush.bf16.msra.mxu3 %v1323_v43  ;;  %v1513_v43 = vld [vmem:[%s2486_s10 + $0x18] sm:$0xff] }
 0x806   : > { %v1442_v50 = vpop.xlane.xlu1 %1441  ;;  %v1516_v44 = vpack.c.bf16 %v1513_v43, %v1512_v7 }
 0x807   : > { %v2364_v46 = vpop.eup %1947  ;;  %v1378_v47 = vmul.f32 1.442695, %v1375_v45  ;;  %v1444_v28 = vsub.f32 %v1436_v15, %v1442_v50  ;;  %v1510_v45 = vld [vmem:[%s2486_s10] sm:$0xff] }
 0x808   : > { %v1380_v48 = vsel %vm1049_vm3, %v2364_v46, 0.0  ;;  %1526 = vmatpush.bf16.msra.mxu2 %v1516_v44  ;;  %v1895_v44 = vld [vmem:[%s2492_s16 + $0x2] ss:$0 sm:$0xff] }
 0x809   : > { %1949 = vpow2.f32 %v1378_v47  ;;  %1381 = vadd.xlane.f32.xlu1 %v1380_v48  ;;  %v1447_v56 = vmul.f32 1.442695, %v1444_v28 }
 0x80b   : > { %1460 = vrot.lane.b32.xlu2 %v2325_v41, %s2505_s19 }
 0x80c   : > { %v1439_v51 = vpop.xlane.xlu0 %1438 }
 0x80d   : > { %v1443_v52 = vsub.f32 %v1435_v21, %v1439_v51 }
 0x80f   : > { %v1950_v53 = vpop.eup %1949  ;;  %v1445_v54 = vmul.f32 1.442695, %v1443_v52 }
 0x810   : > { %v1383_v55 = vsel %vm1230_vm13, %v1950_v53, 0.0 }
 0x811   : > { %1951 = vpow2.f32 %v1445_v54  ;;  %1384 = vadd.xlane.f32.xlu0 %v1383_v55 }
 0x812   : > { %1953 = vpow2.f32 %v1447_v56  ;;  %v1245_v59 = vpop.xlane.xlu1 %1244 }
 0x814   : > { %v1242_v14 = vpop.xlane.xlu0 %1241 }
 0x815   : > { %1955 = vrcp.f32 %v1242_v14 }
 0x816   : > { %1957 = vrcp.f32 %v1245_v59 }
 0x817   : > { %v1952_v57 = vpop.eup %1951 }
 0x818   : > { %v1449_v58 = vsel %vm1049_vm3, %v1952_v57, 0.0  ;;  %v1954_v60 = vpop.eup %1953 }
 0x819   : > { %1450 = vadd.xlane.f32.xlu1 %v1449_v58  ;;  %v1452_v61 = vsel %vm1230_vm13, %v1954_v60, 0.0 }
 0x81b   : > { %v1956_v62 = vpop.eup %1955 }
 0x81c   : > { %v1958_v63 = vpop.eup %1957  ;;  %v1248_v0 = vmul.f32 %v1956_v62, %v1940_v24 }
 0x81d   : > { %v1249_v1 = vmul.f32 %v1958_v63, %v1942_v26  ;;  %v1894_v63 = vld [vmem:[%s2487_s11] ss:$0 sm:$0xff] }
 0x81f   : > { %v1250_v3 = vpack.c.bf16 %v1249_v1, %v1248_v0 }
 0x821   : > { %1453 = vadd.xlane.f32.xlu1 %v1452_v61 }
 0x827   : > { %v1253_v2 = vpop.permute.xlu0 %1252 }
 0x828   : > { %1265 = vmatpush.bf16.msra.mxu0 %v1253_v2 }
 0x82b   : > { %1819 = vmatmul.msk.bf16.vlgmr.msra.gmra.mxu0 %vm1049_vm3, %v1250_v3 }
 0x83a   : > { %1391 = vrot.lane.b32.xlu1 %v2325_v41, %s2506_s22 }
 0x85e   : > { %v1313_v4 = vpop.xlane.xlu1 %1312 }
 0x85f   : > { %1959 = vrcp.f32 %v1313_v4 }
 0x865   : > { %v1960_v8 = vpop.eup %1959 }
 0x866   : > { %v1316_v5 = vpop.xlane.xlu2 %1315  ;;  %v1319_v10 = vmul.f32 %v1960_v8, %v1944_v33 }
 0x867   : > { %1961 = vrcp.f32 %v1316_v5 }
 0x86d   : > { %v1962_v9 = vpop.eup %1961 }
 0x86e   : > { %v1320_v11 = vmul.f32 %v1962_v9, %v1946_v39  ;;  %v1461_v12 = vpop.permute.xlu2 %1460 }
 0x86f   : > { %1473 = vmatpush.bf16.msrb.mxu3 %v1461_v12 }
 0x870   : > { %v1321_v13 = vpack.c.bf16 %v1320_v11, %v1319_v10 }
 0x872   : > { %1821 = vmatmul.msk.bf16.vlgmr.msra.gmra.mxu3 %vm1049_vm3, %v1321_v13 }
 0x87c   : > { %v1382_v15 = vpop.xlane.xlu1 %1381 }
 0x884   : > { %v1385_v21 = vpop.xlane.xlu0 %1384 }
 0x88c   : > { %v1451_v16 = vpop.xlane.xlu1 %1450 }
 0x88d   : > { %1963 = vrcp.f32 %v1451_v16 }
 0x893   : > { %v1964_v18 = vpop.eup %1963 }
 0x894   : > { %v1454_v17 = vpop.xlane.xlu1 %1453  ;;  %v1457_v19 = vmul.f32 %v1964_v18, %v1952_v57 }
 0x895   : > { %1965 = vrcp.f32 %v1454_v17 }
 0x896   : > { %1967 = vrcp.f32 %v1385_v21 }
 0x897   : > { %1969 = vrcp.f32 %v1382_v15 }
 0x89b   : > { %v1966_v41 = vpop.eup %1965 }
 0x89c   : > { %v1458_v20 = vmul.f32 %v1966_v41, %v1954_v60  ;;  %v1968_v23 = vpop.eup %1967 }
 0x89d   : > { %v1970_v24 = vpop.eup %1969  ;;  %v1389_v26 = vmul.f32 %v1968_v23, %v1950_v53  ;;  %v1594_v23 = vld [vmem:[%s2488_s12] sm:$0xff] }
 0x89e   : > { %v1459_v22 = vpack.c.bf16 %v1458_v20, %v1457_v19  ;;  %v1388_v25 = vmul.f32 %v1970_v24, %v2364_v46  ;;  %v1511_v46 = vld [vmem:[%s2486_s10 + $0x8] sm:$0xff]  ;;  %v1597_v19 = vld [vmem:[%s2488_s12 + $0x18] sm:$0xff] }
 0x89f   : > { %v1515_v47 = vpack.c.bf16 %v1511_v46, %v1510_v45  ;;  %v1595_v24 = vld [vmem:[%s2488_s12 + $0x8] sm:$0xff] }
 0x8a0   : > { %1825 = vmatmul.msk.bf16.vlgmr.msrb.gmra.mxu3 %vm1049_vm3, %v1459_v22  ;;  %v1390_v30 = vpack.c.bf16 %v1389_v26, %v1388_v25  ;;  %v1599_v25 = vpack.c.bf16 %v1595_v24, %v1594_v23 }
 0x8a1   : > { %1527 = vmatpush.bf16.msra.mxu2 %v1515_v47 }
 0x8a8   : > { %v1267_v27 = vpop.f32.mrf.mxu0 }
 0x8ac   : > { %v1392_v29 = vpop.permute.xlu1 %1391 }
 0x8ad   : > { %1404 = vmatpush.bf16.msrb.mxu0 %v1392_v29 }
 0x8b0   : > { %1823 = vmatmul.msk.bf16.vlgmr.msrb.gmra.mxu0 %vm1049_vm3, %v1390_v30  ;;  %v1269_v33 = vpop.f32.mrf.mxu0 }
 0x8f5   : > { %v1337_v31 = vpop.f32.mrf.mxu3 }
 0x8fd   : > { %v1339_v32 = vpop.f32.mrf.mxu3 }
 0x8fe   : > { %v1873_v34 = vpack.i.bf16 %v1339_v32, %v1337_v31 }
 0x900   : > { %1874 = vrot.lane.b32.xlu2 %v1873_v34, %s2507_s23 }
 0x923   : > { %v1475_v38 = vpop.f32.mrf.mxu3 }
 0x92b   : > { %v1477_v6 = vpop.f32.mrf.mxu3 }
 0x92c   : > { %v1883_v42 = vpack.i.bf16 %v1477_v6, %v1475_v38 }
 0x92d   : > { %v1406_v37 = vpop.f32.mrf.mxu0 }
 0x935   : > { %v1408_v39 = vpop.f32.mrf.mxu0 }
 0x936   : > { %v1878_v40 = vpack.i.bf16 %v1408_v39, %v1406_v37 }
 0x938   : > { %1879 = vrot.lane.b32.xlu2 %v1878_v40, %s2005_s20 }
 0x940   : > { %1884 = vrot.lane.b32.xlu2 %v1883_v42, %s2004_s25 }
 0x95a   : > { %v1875_v48 = vpop.permute.xlu2 %1874 }
 0x95b   : > { %v1877_v51 = vunpack.i.h.bf16 %v1875_v48  ;;  %v1876_v52 = vunpack.i.l.bf16 %v1875_v48  ;;  %v1896_v48 = vld [vmem:[%s2492_s16 + $0x3] ss:$0 sm:$0xff] }
 0x95d   : > { %v1505_v55 = vsel %vm614_vm1, %v1269_v33, %v1877_v51  ;;  %v1504_v56 = vsel %vm614_vm1, %v1267_v27, %v1876_v52 }
 0x992   : > { %v1880_v50 = vpop.permute.xlu2 %1879 }
 0x993   : > { %v1882_v53 = vunpack.i.h.bf16 %v1880_v50  ;;  %v1881_v28 = vunpack.i.l.bf16 %v1880_v50 }
 0x995   : > { %v1507_v14 = vsel %vm1049_vm3, %v1505_v55, %v1882_v53  ;;  %v1506_v59 = vsel %vm1049_vm3, %v1504_v56, %v1881_v28  ;;  %v1642_v55 = vld [vmem:[%s2490_s14 + $0x10] sm:$0xff]  ;;  %v1643_v56 = vld [vmem:[%s2490_s14 + $0x18] sm:$0xff] }
 0x99a   : > { %v1885_v54 = vpop.permute.xlu2 %1884 }
 0x99b   : > { %v1887_v57 = vunpack.i.h.bf16 %v1885_v54  ;;  %v1886_v58 = vunpack.i.l.bf16 %v1885_v54 }
 0x99d   : > { %v1508_v60 = vsel %vm1052_vm4, %v1506_v59, %v1886_v58  ;;  %v1509_v61 = vsel %vm1052_vm4, %v1507_v14, %v1887_v57  ;;  %v1646_v57 = vpack.c.bf16 %v1643_v56, %v1642_v55  ;;  %v1897_v58 = vld [vmem:[%s2489_s13] ss:$0 sm:$0xff]  ;;  %v1641_v59 = vld [vmem:[%s2490_s14 + $0x8] sm:$0xff]  ;;  %v1899_v55 = vld [vmem:[%s2492_s16 + $0x4] ss:$0 sm:$0xff] }
 0x99e   : > { %v1514_v62 = vpack.c.bf16 %v1509_v61, %v1508_v60  ;;  %v1640_v14 = vld [vmem:[%s2490_s14] sm:$0xff] }
 0x99f   : > { %1660 = vmatpush.bf16.msra.mxu1 %v1646_v57  ;;  %v1645_v61 = vpack.c.bf16 %v1641_v59, %v1640_v14  ;;  %v1900_v57 = vld [vmem:[%s2492_s16 + $0x5] ss:$0 sm:$0xff] }
 0x9a0   : > { %1826 = vmatmul.msk.bf16.vlgmr.msra.gmra.mxu2 %vm585_vm0, %v1514_v62 }
 0x9a3   : > { %1661 = vmatpush.bf16.msra.mxu1 %v1645_v61 }
 0xa23   : > { %v1529_v0 = vpop.f32.mrf.mxu2 }
 0xa24   : > { %v1534_v1 = vadd.f32 %v1529_v0, %v2315_v35 }
 0xa26   : > { %v1540_v2 = vadd.f32 %v1894_v63, %v1534_v1 }
 0xa28   : > { %v1544_v3 = vsel %vm585_vm0, %v1540_v2, 0.0 }
 0xa29   : > { %1545 = vadd.xlane.f32.xlu1 %v1544_v3 }
 0xa2b   : > { %v1531_v4 = vpop.f32.mrf.mxu2 }
 0xa2c   : > { %v1535_v5 = vadd.f32 %v1531_v4, %v2317_v36  ;;  %v1596_v36 = vld [vmem:[%s2488_s12 + $0x10] sm:$0xff] }
 0xa2d   : > { %v1600_v20 = vpack.c.bf16 %v1597_v19, %v1596_v36 }
 0xa2e   : > { %v1541_v8 = vadd.f32 %v1894_v63, %v1535_v5 }
 0xa2f   : > { %1614 = vmatpush.bf16.msra.mxu0 %v1600_v20  ;;  %v1898_v20 = vld [vmem:[%s2491_s15] ss:$0 sm:$0xff] }
 0xa30   : > { %v1547_v9 = vsel %vm1092_vm5, %v1541_v8, 0.0 }
 0xa31   : > { %1548 = vadd.xlane.f32.xlu2 %v1547_v9 }
 0xa33   : > { %1615 = vmatpush.bf16.msra.mxu0 %v1599_v25 }
 0xa9c   : > { %v1546_v10 = vpop.xlane.xlu1 %1545 }
 0xa9d   : > { %v1550_v11 = vmul.f32 %v1546_v10, %v2284_v49 }
 0xa9f   : > { %v1552_v12 = vsub.f32 %v1540_v2, %v1550_v11 }
 0xaa1   : > { %v1554_v13 = vmul.f32 %v1552_v12, %v1552_v12 }
 0xaa3   : > { %v1556_v15 = vsel %vm585_vm0, %v1554_v13, 0.0 }
 0xaa4   : > { %1557 = vadd.xlane.f32.xlu0 %v1556_v15  ;;  %v1549_v35 = vpop.xlane.xlu2 %1548 }
 0xaa5   : > { %v1551_v16 = vmul.f32 %v1549_v35, %v2284_v49 }
 0xaa7   : > { %v1553_v17 = vsub.f32 %v1541_v8, %v1551_v16 }
 0xaa9   : > { %v1555_v18 = vmul.f32 %v1553_v17, %v1553_v17 }
 0xaab   : > { %v1559_v41 = vsel %vm1092_vm5, %v1555_v18, 0.0 }
 0xaac   : > { %1560 = vadd.xlane.f32.xlu0 %v1559_v41 }
 0xb17   : > { %v1558_v21 = vpop.xlane.xlu0 %1557 }
 0xb18   : > { %v1562_v22 = vmul.f32 %v1558_v21, %v2284_v49 }
 0xb1a   : > { %v1564_v26 = vadd.f32 1e-05, %v1562_v22 }
 0xb1c   : > { %1971 = vrsqrt.f32 %v1564_v26  ;;  %vm1572_vm14 = vweird.f32 %v1564_v26 }
 0xb1f   : > { %v1561_v29 = vpop.xlane.xlu0 %1560 }
 0xb20   : > { %v1563_v30 = vmul.f32 %v1561_v29, %v2284_v49 }
 0xb22   : > { %v1972_v31 = vpop.eup %1971  ;;  %v1565_v32 = vadd.f32 1e-05, %v1563_v30 }
 0xb23   : > { %v1567_v34 = vmul.f32 %v1972_v31, %v1564_v26  ;;  %vm1573_vm1 = vweird.f32 %v1972_v31 }
 0xb24   : > { %1973 = vrsqrt.f32 %v1565_v32  ;;  %vm1574_vm15 = vmor %vm1572_vm14, %vm1573_vm1  ;;  %vm1582_vm3 = vweird.f32 %v1565_v32 }
 0xb25   : > { %v1568_v27 = vmul.f32 %v1972_v31, %v1567_v34 }
 0xb27   : > { %v1569_v33 = vmul.f32 0.5, %v1568_v27 }
 0xb29   : > { %v1570_v37 = vsub.f32 1.5, %v1569_v33 }
 0xb2a   : > { %v1974_v38 = vpop.eup %1973 }
 0xb2b   : > { %v1571_v39 = vmul.f32 %v1972_v31, %v1570_v37  ;;  %v1577_v40 = vmul.f32 %v1974_v38, %v1565_v32  ;;  %vm1583_vm2 = vweird.f32 %v1974_v38 }
 0xb2c   : > { %vm1584_vm4 = vmor %vm1582_vm3, %vm1583_vm2 }
 0xb2d   : > { %v1578_v6 = vmul.f32 %v1974_v38, %v1577_v40  ;;  %v1575_v42 = vsel %vm1574_vm15, %v1972_v31, %v1571_v39 }
 0xb2e   : > { %v1586_v45 = vmul.f32 %v1575_v42, %v1552_v12 }
 0xb2f   : > { %v1579_v7 = vmul.f32 0.5, %v1578_v6 }
 0xb30   : > { %v1589_v50 = vmul.f32 %v1895_v44, %v1586_v45 }
 0xb31   : > { %v1580_v43 = vsub.f32 1.5, %v1579_v7 }
 0xb32   : > { %v1592_v53 = vadd.f32 %v1896_v48, %v1589_v50 }
 0xb33   : > { %v1581_v46 = vmul.f32 %v1974_v38, %v1580_v43 }
 0xb35   : > { %v1585_v47 = vsel %vm1584_vm4, %v1974_v38, %v1581_v46 }
 0xb36   : > { %v1587_v51 = vmul.f32 %v1585_v47, %v1553_v17 }
 0xb38   : > { %v1590_v52 = vmul.f32 %v1895_v44, %v1587_v51 }
 0xb3a   : > { %v1593_v28 = vadd.f32 %v1896_v48, %v1590_v52 }
 0xb3c   : > { %v1598_v54 = vpack.c.bf16 %v1593_v28, %v1592_v53 }
 0xb3e   : > { %1827 = vmatmul.msk.bf16.vlgmr.msra.gmra.mxu0 %vm585_vm0, %v1598_v54 }
 0xbbb   : > { %v1617_v60 = vpop.f32.mrf.mxu0 }
 0xbbc   : > { %v1618_v62 = vadd.f32 %v1897_v58, %v1617_v60 }
 0xbbe   : > { %v1622_v63 = vmul.f32 %v1618_v62, %v1618_v62 }
 0xbc0   : > { %v1624_v0 = vmul.f32 %v1622_v63, %v1618_v62 }
 0xbc2   : > { %v1626_v1 = vmul.f32 0.044715, %v1624_v0 }
 0xbc3   : > { %v1619_v2 = vpop.f32.mrf.mxu0 }
 0xbc4   : > { %v1628_v3 = vadd.f32 %v1626_v1, %v1618_v62  ;;  %v1620_v4 = vadd.f32 %v1897_v58, %v1619_v2 }
 0xbc6   : > { %v1630_v5 = vmul.f32 0.7978846, %v1628_v3  ;;  %v1623_v8 = vmul.f32 %v1620_v4, %v1620_v4 }
 0xbc8   : > { %v1625_v9 = vmul.f32 %v1623_v8, %v1620_v4  ;;  %1975 = vtanh.f32 %v1630_v5 }
 0xbca   : > { %v1627_v10 = vmul.f32 0.044715, %v1625_v9 }
 0xbcc   : > { %v1629_v11 = vadd.f32 %v1627_v10, %v1620_v4 }
 0xbce   : > { %v1631_v12 = vmul.f32 0.7978846, %v1629_v11  ;;  %v1976_v13 = vpop.eup %1975 }
 0xbcf   : > { %v1634_v15 = vadd.f32 1.0, %v1976_v13 }
 0xbd0   : > { %1977 = vtanh.f32 %v1631_v12 }
 0xbd1   : > { %v1636_v16 = vmul.f32 0.5, %v1634_v15 }
 0xbd3   : > { %v1638_v41 = vmul.f32 %v1636_v16, %v1618_v62 }
 0xbd6   : > { %v1978_v35 = vpop.eup %1977 }
 0xbd7   : > { %v1635_v17 = vadd.f32 1.0, %v1978_v35 }
 0xbd9   : > { %v1637_v18 = vmul.f32 0.5, %v1635_v17 }
 0xbdb   : > { %v1639_v36 = vmul.f32 %v1637_v18, %v1620_v4 }
 0xbdd   : > { %v1644_v19 = vpack.c.bf16 %v1639_v36, %v1638_v41 }
 0xbdf   : > { %1828 = vmatmul.msk.bf16.vlgmr.msra.gmra.mxu1 %vm585_vm0, %v1644_v19 }
 0xc5c   : > { %v1663_v21 = vpop.f32.mrf.mxu1 }
 0xc5d   : > { %v1664_v22 = vadd.f32 %v1898_v20, %v1663_v21 }
 0xc5f   : > { %v1668_v23 = vadd.f32 %v1664_v22, %v1592_v53 }
 0xc61   : > { %v1672_v24 = vsel %vm585_vm0, %v1668_v23, 0.0 }
 0xc62   : > { %1673 = vadd.xlane.f32.xlu0 %v1672_v24 }
 0xc64   : > { %v1665_v26 = vpop.f32.mrf.mxu1 }
 0xc65   : > { %v1666_v25 = vadd.f32 %v1898_v20, %v1665_v26 }
 0xc67   : > { %v1669_v29 = vadd.f32 %v1666_v25, %v1593_v28 }
 0xc69   : > { %v1675_v30 = vsel %vm1092_vm5, %v1669_v29, 0.0 }
 0xc6a   : > { %1676 = vadd.xlane.f32.xlu0 %v1675_v30 }
 0xcd5   : > { %v1674_v31 = vpop.xlane.xlu0 %1673 }
 0xcd6   : > { %v1678_v32 = vmul.f32 %v1674_v31, %v2284_v49 }
 0xcd8   : > { %v1680_v34 = vsub.f32 %v1668_v23, %v1678_v32 }
 0xcda   : > { %v1682_v27 = vmul.f32 %v1680_v34, %v1680_v34 }
 0xcdc   : > { %v1684_v33 = vsel %vm585_vm0, %v1682_v27, 0.0 }
 0xcdd   : > { %1685 = vadd.xlane.f32.xlu1 %v1684_v33  ;;  %v1677_v37 = vpop.xlane.xlu0 %1676 }
 0xcde   : > { %v1679_v38 = vmul.f32 %v1677_v37, %v2284_v49 }
 0xce0   : > { %v1681_v39 = vsub.f32 %v1669_v29, %v1679_v38 }
 0xce2   : > { %v1683_v40 = vmul.f32 %v1681_v39, %v1681_v39 }
 0xce4   : > { %v1687_v6 = vsel %vm1092_vm5, %v1683_v40, 0.0 }
 0xce5   : > { %1688 = vadd.xlane.f32.xlu0 %v1687_v6 }
 0xd50   : > { %v1686_v42 = vpop.xlane.xlu1 %1685 }
 0xd51   : > { %v1690_v7 = vmul.f32 %v1686_v42, %v2284_v49 }
 0xd53   : > { %v1692_v43 = vadd.f32 1e-05, %v1690_v7 }
 0xd55   : > { %1979 = vrsqrt.f32 %v1692_v43  ;;  %vm1700_vm7 = vweird.f32 %v1692_v43 }
 0xd58   : > { %v1689_v44 = vpop.xlane.xlu0 %1688 }
 0xd59   : > { %v1691_v45 = vmul.f32 %v1689_v44, %v2284_v49 }
 0xd5b   : > { %v1980_v46 = vpop.eup %1979  ;;  %v1693_v47 = vadd.f32 1e-05, %v1691_v45 }
 0xd5c   : > { %v1695_v48 = vmul.f32 %v1980_v46, %v1692_v43  ;;  %vm1701_vm6 = vweird.f32 %v1980_v46 }
 0xd5d   : > { %1981 = vrsqrt.f32 %v1693_v47  ;;  %vm1702_vm8 = vmor %vm1700_vm7, %vm1701_vm6  ;;  %vm1710_vm10 = vweird.f32 %v1693_v47 }
 0xd5e   : > { %v1696_v50 = vmul.f32 %v1980_v46, %v1695_v48 }
 0xd60   : > { %v1697_v51 = vmul.f32 0.5, %v1696_v50 }
 0xd62   : > { %v1698_v52 = vsub.f32 1.5, %v1697_v51 }
 0xd63   : > { %v1982_v53 = vpop.eup %1981 }
 0xd64   : > { %v1699_v28 = vmul.f32 %v1980_v46, %v1698_v52  ;;  %v1705_v54 = vmul.f32 %v1982_v53, %v1693_v47  ;;  %vm1711_vm9 = vweird.f32 %v1982_v53 }
 0xd65   : > { %vm1712_vm11 = vmor %vm1710_vm10, %vm1711_vm9 }
 0xd66   : > { %v1703_v56 = vsel %vm1702_vm8, %v1980_v46, %v1699_v28  ;;  %v1706_v49 = vmul.f32 %v1982_v53, %v1705_v54 }
 0xd67   : > { %v1714_v58 = vmul.f32 %v1703_v56, %v1680_v34 }
 0xd68   : > { %v1707_v14 = vmul.f32 0.5, %v1706_v49 }
 0xd69   : > { %v1717_v59 = vmul.f32 %v1899_v55, %v1714_v58 }
 0xd6a   : > { %v1708_v60 = vsub.f32 1.5, %v1707_v14 }
 0xd6b   : > { %v1720_v61 = vadd.f32 %v1900_v57, %v1717_v59 }
 0xd6c   : > { %v1709_v62 = vmul.f32 %v1982_v53, %v1708_v60 }
 0xd6d   : > { %1722 = vst.msk [vmem:[%s568_s0] sm:$0xff] %vm585_vm0, %v1720_v61 }
 0xd6e   : > { %v1713_v63 = vsel %vm1712_vm11, %v1982_v53, %v1709_v62 }
 0xd6f   : > { %v1715_v0 = vmul.f32 %v1713_v63, %v1681_v39 }
 0xd71   : > { %v1718_v1 = vmul.f32 %v1899_v55, %v1715_v0 }
 0xd73   : > { %v1721_v2 = vadd.f32 %v1900_v57, %v1718_v1 }
 0xd75   : > { %1723 = vst.msk [vmem:[%s568_s0 + $0x8] sm:$0xf] %vm1092_vm5, %v1721_v2 }
 0xd76 PF: > { %s27_s24 = sadd.s32 1, %s1989_s24  }
 0xd77   : > { %p24_p4 = scmp.ge.s32.totalorder %s27_s24, 4  }
 0xd79   :  { %26 = sbr.rel (!%p24_p4) target bundleno = 3 (0x3), region = 121 }

</bundles_post_ra>
